<compile_context>
chip_gen: v6e
topology: v6e:2x2x1
jax: 0.10.0
libtpu: 0.0.40
codegen_flags: <defaults>
</compile_context>

<pallas_src>
import jax
import jax.numpy as jnp
from jax.experimental import pallas as pl
from jax.experimental.pallas import tpu as pltpu


def _round_up(v, m):
    return (v + m - 1) // m * m


def _sindy_shred_kernel(
    x_ref,            # (Bp, T, I)      float32
    w_in_ref,         # (I, 3*Hp)       [Wir | Wiz | Win], pre-transposed
    b_in_ref,         # (1, 3*Hp)       [b_ir+b_hr | b_iz+b_hz | b_in]
    w_hh_ref,         # (Hp, 3*Hp)      [Whr | Whz | Whn], pre-transposed
    b_hn_ref,         # (1, Hp)
    w1_ref, b1_ref,   # (Hp, L1p), (1, L1p)
    w2_ref, b2_ref,   # (L1p, L2p), (1, L2p)
    w3_ref, b3_ref,   # (L2p, Op), (1, Op)
    out_ref,          # (Bp, Op)
):
    Bp, T, I = x_ref.shape
    Hp = b_hn_ref.shape[1]

    # ---- hoisted input projection: one MXU matmul covers all T steps & gates
    x2 = x_ref[...].reshape(Bp * T, I)
    xw = (
        jnp.dot(x2, w_in_ref[...], preferred_element_type=jnp.float32)
        + b_in_ref[...]
    ).reshape(Bp, T, 3 * Hp)

    w_hh = w_hh_ref[...]
    b_hn = jnp.broadcast_to(b_hn_ref[...], (Bp, Hp))  # hoisted, not per-iter

    # ---- GRU recurrence, fully unrolled (only the h-dependent matmul remains
    #      on the serial chain: one (Bp,Hp)x(Hp,3Hp) matmul per step)
    h = jnp.zeros((Bp, Hp), dtype=jnp.float32)
    for t in range(T):
        gi = xw[:, t, :]                                           # (Bp, 3Hp)
        gh = jnp.dot(h, w_hh, preferred_element_type=jnp.float32)  # (Bp, 3Hp)
        r = jax.nn.sigmoid(gi[:, 0:Hp] + gh[:, 0:Hp])
        z = jax.nn.sigmoid(gi[:, Hp:2 * Hp] + gh[:, Hp:2 * Hp])
        n = jnp.tanh(gi[:, 2 * Hp:] + r * (gh[:, 2 * Hp:] + b_hn))
        h = n + z * (h - n)                      # == (1 - z) * n + z * h

    # ---- MLP head: relu(W1 h) -> relu(W2 .) -> W3 .
    a1 = jnp.maximum(
        jnp.dot(h, w1_ref[...], preferred_element_type=jnp.float32) + b1_ref[...],
        0.0,
    )
    a2 = jnp.maximum(
        jnp.dot(a1, w2_ref[...], preferred_element_type=jnp.float32) + b2_ref[...],
        0.0,
    )
    out_ref[...] = (
        jnp.dot(a2, w3_ref[...], preferred_element_type=jnp.float32) + b3_ref[...]
    )


def sindy_shred_forward(x, params):
    """x: (B, T, input_size) float32, PyTorch batch_first layout."""
    B, T, I = x.shape
    H = params["whr"].shape[0]
    L1 = params["w1"].shape[1]
    L2 = params["w2"].shape[1]
    O = params["w3"].shape[1]

    Bp = _round_up(B, 8)       # sublane pad
    Hp = _round_up(H, 128)     # lane pad -> gate splits land on vreg boundaries
    L1p = _round_up(L1, 128)
    L2p = _round_up(L2, 128)
    Op = _round_up(O, 128)

    def pad2(a, r, c):
        a = a.astype(jnp.float32)
        return jnp.pad(a, ((0, r - a.shape[0]), (0, c - a.shape[1])))

    # Fused + padded weights (zero padding keeps padded lanes exactly 0
    # through the recurrence, so real lanes are bit-identical).
    w_in = jnp.concatenate([pad2(params["wir"], I, Hp),
                            pad2(params["wiz"], I, Hp),
                            pad2(params["win"], I, Hp)], axis=1)       # (I, 3Hp)
    b_in = jnp.concatenate([pad2(params["br"], 1, Hp),
                            pad2(params["bz"], 1, Hp),
                            pad2(params["bin"], 1, Hp)], axis=1)       # (1, 3Hp)
    w_hh = jnp.concatenate([pad2(params["whr"], Hp, Hp),
                            pad2(params["whz"], Hp, Hp),
                            pad2(params["whn"], Hp, Hp)], axis=1)      # (Hp, 3Hp)
    b_hn = pad2(params["bhn"], 1, Hp)

    w1 = pad2(params["w1"], Hp, L1p);   b1 = pad2(params["b1"], 1, L1p)
    w2 = pad2(params["w2"], L1p, L2p);  b2 = pad2(params["b2"], 1, L2p)
    w3 = pad2(params["w3"], L2p, Op);   b3 = pad2(params["b3"], 1, Op)

    x_p = jnp.pad(x.astype(jnp.float32), ((0, Bp - B), (0, 0), (0, 0)))

    inputs = (x_p, w_in, b_in, w_hh, b_hn, w1, b1, w2, b2, w3, b3)

    vmem = pl.BlockSpec(memory_space=pltpu.MemorySpace.VMEM)
    out_p = pl.pallas_call(
        _sindy_shred_kernel,
        out_shape=jax.ShapeDtypeStruct((Bp, Op), jnp.float32),
        in_specs=[vmem] * len(inputs),
        out_specs=vmem,
    )(*inputs)
    return out_p[:B, :O]


def make_params(key, input_size, hidden_size, l1, l2, output_size):
    """Deterministic synthetic parameters (shapes match nn.GRU / nn.Linear)."""
    ks = jax.random.split(key, 16)
    s = 0.1

    def rnd(k, shape):
        return jax.random.normal(k, shape, dtype=jnp.float32) * s

    # GRU weights, PyTorch layout W_ih: (3H, I), W_hh: (3H, H), gate order r,z,n.
    w_ih = rnd(ks[0], (3 * hidden_size, input_size))
    w_hh = rnd(ks[1], (3 * hidden_size, hidden_size))
    b_ih = rnd(ks[2], (3 * hidden_size,))
    b_hh = rnd(ks[3], (3 * hidden_size,))
    H = hidden_size
    wir, wiz, win = w_ih[:H], w_ih[H:2 * H], w_ih[2 * H:]
    whr, whz, whn = w_hh[:H], w_hh[H:2 * H], w_hh[2 * H:]
    b_ir, b_iz, b_in = b_ih[:H], b_ih[H:2 * H], b_ih[2 * H:]
    b_hr, b_hz, b_hn = b_hh[:H], b_hh[H:2 * H], b_hh[2 * H:]

    params = {
        # pre-transposed to (in, out) for the kernel
        "wir": wir.T, "wiz": wiz.T, "win": win.T,
        "whr": whr.T, "whz": whz.T, "whn": whn.T,
        "br": (b_ir + b_hr).reshape(1, H),
        "bz": (b_iz + b_hz).reshape(1, H),
        "bin": b_in.reshape(1, H),
        "bhn": b_hn.reshape(1, H),
        "w1": rnd(ks[4], (hidden_size, l1)),
        "b1": rnd(ks[5], (1, l1)),
        "w2": rnd(ks[6], (l1, l2)),
        "b2": rnd(ks[7], (1, l2)),
        "w3": rnd(ks[8], (l2, output_size)),
        "b3": rnd(ks[9], (1, output_size)),
    }
    return params


def reference_forward(x, params):
    """Pure-JAX reference of the same forward (for correctness check)."""
    B, T, I = x.shape
    H = params["whr"].shape[0]
    h = jnp.zeros((B, H), jnp.float32)
    for t in range(T):
        xt = x[:, t, :]
        r = jax.nn.sigmoid(xt @ params["wir"] + h @ params["whr"] + params["br"])
        z = jax.nn.sigmoid(xt @ params["wiz"] + h @ params["whz"] + params["bz"])
        n = jnp.tanh(xt @ params["win"] + params["bin"]
                     + r * (h @ params["whn"] + params["bhn"]))
        h = (1.0 - z) * n + z * h
    a1 = jnp.maximum(h @ params["w1"] + params["b1"], 0.0)
    a2 = jnp.maximum(a1 @ params["w2"] + params["b2"], 0.0)
    return a2 @ params["w3"] + params["b3"]


if __name__ == "__main__":
    # Small shapes consistent with the module: num_sensors (input_size)=4,
    # lags (seq)=8, hidden_size=32, l1=64, l2=64, output_size=16, batch=2.
    B, T, I = 2, 8, 4
    H, L1, L2, O = 32, 64, 64, 16

    key = jax.random.PRNGKey(0)
    kx, kp = jax.random.split(key)
    x = jax.random.normal(kx, (B, T, I), dtype=jnp.float32)
    params = make_params(kp, I, H, L1, L2, O)

    out = sindy_shred_forward(x, params)
    out = jax.block_until_ready(out)

    ref = reference_forward(x, params)
    assert out.shape == (B, O)
    assert jnp.allclose(out, ref, atol=1e-5, rtol=1e-5), "mismatch vs JAX reference"

    print("KERNEL_OK")
</pallas_src>

<mosaic_0001>
module attributes {stable_mosaic.version = 11 : i64} {
  func.func @_sindy_shred_kernel(%arg0: memref<8x8x4xf32, #tpu.memory_space<vmem>>, %arg1: memref<4x384xf32, #tpu.memory_space<vmem>>, %arg2: memref<1x384xf32, #tpu.memory_space<vmem>>, %arg3: memref<128x384xf32, #tpu.memory_space<vmem>>, %arg4: memref<1x128xf32, #tpu.memory_space<vmem>>, %arg5: memref<128x128xf32, #tpu.memory_space<vmem>>, %arg6: memref<1x128xf32, #tpu.memory_space<vmem>>, %arg7: memref<128x128xf32, #tpu.memory_space<vmem>>, %arg8: memref<1x128xf32, #tpu.memory_space<vmem>>, %arg9: memref<128x128xf32, #tpu.memory_space<vmem>>, %arg10: memref<1x128xf32, #tpu.memory_space<vmem>>, %arg11: memref<8x128xf32, #tpu.memory_space<vmem>>) attributes {dimension_semantics = [], scalar_prefetch = 0 : i64, scratch_operands = 0 : i64, tpu.core_type = #tpu.core_type<tc>} {
    %c0 = arith.constant 0 : index
    %c0_0 = arith.constant 0 : index
    %c0_1 = arith.constant 0 : index
    %0 = vector.load %arg0[%c0, %c0_0, %c0_1] : memref<8x8x4xf32, #tpu.memory_space<vmem>>, vector<8x8x4xf32>
    %1 = vector.shape_cast %0 : vector<8x8x4xf32> to vector<64x4xf32>
    %c0_2 = arith.constant 0 : index
    %c0_3 = arith.constant 0 : index
    %2 = vector.load %arg1[%c0_2, %c0_3] : memref<4x384xf32, #tpu.memory_space<vmem>>, vector<4x384xf32>
    %cst = arith.constant dense<0.000000e+00> : vector<64x384xf32>
    %3 = tpu.matmul %1, %2, %cst {dimension_numbers = #tpu.dot_dimension_numbers<[1], [0], [0], [1], [0, 0, 1, 1], [], []>} : vector<64x4xf32>, vector<4x384xf32>, vector<64x384xf32> -> vector<64x384xf32>
    %c0_4 = arith.constant 0 : index
    %c0_5 = arith.constant 0 : index
    %4 = vector.load %arg2[%c0_4, %c0_5] : memref<1x384xf32, #tpu.memory_space<vmem>>, vector<1x384xf32>
    %5 = vector.broadcast %4 : vector<1x384xf32> to vector<64x384xf32>
    %6 = arith.addf %3, %5 : vector<64x384xf32>
    %7 = vector.shape_cast %6 : vector<64x384xf32> to vector<8x8x384xf32>
    %c0_6 = arith.constant 0 : index
    %c0_7 = arith.constant 0 : index
    %8 = vector.load %arg3[%c0_6, %c0_7] : memref<128x384xf32, #tpu.memory_space<vmem>>, vector<128x384xf32>
    %c0_8 = arith.constant 0 : index
    %c0_9 = arith.constant 0 : index
    %9 = vector.load %arg4[%c0_8, %c0_9] : memref<1x128xf32, #tpu.memory_space<vmem>>, vector<1x128xf32>
    %10 = vector.shape_cast %9 : vector<1x128xf32> to vector<1x128xf32>
    %11 = vector.broadcast %10 : vector<1x128xf32> to vector<8x128xf32>
    %cst_10 = arith.constant 0.000000e+00 : f32
    %12 = vector.broadcast %cst_10 : f32 to vector<8x128xf32>
    %13 = vector.extract_strided_slice %7 {offsets = [0, 0, 0], sizes = [8, 1, 384], strides = [1, 1, 1]} : vector<8x8x384xf32> to vector<8x1x384xf32>
    %14 = vector.shape_cast %13 : vector<8x1x384xf32> to vector<8x384xf32>
    %cst_11 = arith.constant dense<0.000000e+00> : vector<8x384xf32>
    %15 = tpu.matmul %12, %8, %cst_11 {dimension_numbers = #tpu.dot_dimension_numbers<[1], [0], [0], [1], [0, 0, 1, 1], [], []>} : vector<8x128xf32>, vector<128x384xf32>, vector<8x384xf32> -> vector<8x384xf32>
    %16 = vector.extract_strided_slice %14 {offsets = [0, 0], sizes = [8, 128], strides = [1, 1]} : vector<8x384xf32> to vector<8x128xf32>
    %17 = vector.extract_strided_slice %15 {offsets = [0, 0], sizes = [8, 128], strides = [1, 1]} : vector<8x384xf32> to vector<8x128xf32>
    %18 = arith.addf %16, %17 : vector<8x128xf32>
    %19 = arith.negf %18 : vector<8x128xf32>
    %20 = math.exp %19 : vector<8x128xf32>
    %cst_12 = arith.constant 1.000000e+00 : f32
    %21 = vector.broadcast %cst_12 : f32 to vector<8x128xf32>
    %22 = arith.addf %21, %20 : vector<8x128xf32>
    %23 = arith.divf %21, %22 : vector<8x128xf32>
    %24 = vector.extract_strided_slice %14 {offsets = [0, 128], sizes = [8, 128], strides = [1, 1]} : vector<8x384xf32> to vector<8x128xf32>
    %25 = vector.extract_strided_slice %15 {offsets = [0, 128], sizes = [8, 128], strides = [1, 1]} : vector<8x384xf32> to vector<8x128xf32>
    %26 = arith.addf %24, %25 : vector<8x128xf32>
    %27 = arith.negf %26 : vector<8x128xf32>
    %28 = math.exp %27 : vector<8x128xf32>
    %cst_13 = arith.constant 1.000000e+00 : f32
    %29 = vector.broadcast %cst_13 : f32 to vector<8x128xf32>
    %30 = arith.addf %29, %28 : vector<8x128xf32>
    %31 = arith.divf %29, %30 : vector<8x128xf32>
    %32 = vector.extract_strided_slice %14 {offsets = [0, 256], sizes = [8, 128], strides = [1, 1]} : vector<8x384xf32> to vector<8x128xf32>
    %33 = vector.extract_strided_slice %15 {offsets = [0, 256], sizes = [8, 128], strides = [1, 1]} : vector<8x384xf32> to vector<8x128xf32>
    %34 = arith.addf %33, %11 : vector<8x128xf32>
    %35 = arith.mulf %23, %34 : vector<8x128xf32>
    %36 = arith.addf %32, %35 : vector<8x128xf32>
    %37 = math.tanh %36 : vector<8x128xf32>
    %38 = arith.subf %12, %37 : vector<8x128xf32>
    %39 = arith.mulf %31, %38 : vector<8x128xf32>
    %40 = arith.addf %37, %39 : vector<8x128xf32>
    %41 = vector.extract_strided_slice %7 {offsets = [0, 1, 0], sizes = [8, 1, 384], strides = [1, 1, 1]} : vector<8x8x384xf32> to vector<8x1x384xf32>
    %42 = vector.shape_cast %41 : vector<8x1x384xf32> to vector<8x384xf32>
    %cst_14 = arith.constant dense<0.000000e+00> : vector<8x384xf32>
    %43 = tpu.matmul %40, %8, %cst_14 {dimension_numbers = #tpu.dot_dimension_numbers<[1], [0], [0], [1], [0, 0, 1, 1], [], []>} : vector<8x128xf32>, vector<128x384xf32>, vector<8x384xf32> -> vector<8x384xf32>
    %44 = vector.extract_strided_slice %42 {offsets = [0, 0], sizes = [8, 128], strides = [1, 1]} : vector<8x384xf32> to vector<8x128xf32>
    %45 = vector.extract_strided_slice %43 {offsets = [0, 0], sizes = [8, 128], strides = [1, 1]} : vector<8x384xf32> to vector<8x128xf32>
    %46 = arith.addf %44, %45 : vector<8x128xf32>
    %47 = arith.negf %46 : vector<8x128xf32>
    %48 = math.exp %47 : vector<8x128xf32>
    %cst_15 = arith.constant 1.000000e+00 : f32
    %49 = vector.broadcast %cst_15 : f32 to vector<8x128xf32>
    %50 = arith.addf %49, %48 : vector<8x128xf32>
    %51 = arith.divf %49, %50 : vector<8x128xf32>
    %52 = vector.extract_strided_slice %42 {offsets = [0, 128], sizes = [8, 128], strides = [1, 1]} : vector<8x384xf32> to vector<8x128xf32>
    %53 = vector.extract_strided_slice %43 {offsets = [0, 128], sizes = [8, 128], strides = [1, 1]} : vector<8x384xf32> to vector<8x128xf32>
    %54 = arith.addf %52, %53 : vector<8x128xf32>
    %55 = arith.negf %54 : vector<8x128xf32>
    %56 = math.exp %55 : vector<8x128xf32>
    %cst_16 = arith.constant 1.000000e+00 : f32
    %57 = vector.broadcast %cst_16 : f32 to vector<8x128xf32>
    %58 = arith.addf %57, %56 : vector<8x128xf32>
    %59 = arith.divf %57, %58 : vector<8x128xf32>
    %60 = vector.extract_strided_slice %42 {offsets = [0, 256], sizes = [8, 128], strides = [1, 1]} : vector<8x384xf32> to vector<8x128xf32>
    %61 = vector.extract_strided_slice %43 {offsets = [0, 256], sizes = [8, 128], strides = [1, 1]} : vector<8x384xf32> to vector<8x128xf32>
    %62 = arith.addf %61, %11 : vector<8x128xf32>
    %63 = arith.mulf %51, %62 : vector<8x128xf32>
    %64 = arith.addf %60, %63 : vector<8x128xf32>
    %65 = math.tanh %64 : vector<8x128xf32>
    %66 = arith.subf %40, %65 : vector<8x128xf32>
    %67 = arith.mulf %59, %66 : vector<8x128xf32>
    %68 = arith.addf %65, %67 : vector<8x128xf32>
    %69 = vector.extract_strided_slice %7 {offsets = [0, 2, 0], sizes = [8, 1, 384], strides = [1, 1, 1]} : vector<8x8x384xf32> to vector<8x1x384xf32>
    %70 = vector.shape_cast %69 : vector<8x1x384xf32> to vector<8x384xf32>
    %cst_17 = arith.constant dense<0.000000e+00> : vector<8x384xf32>
    %71 = tpu.matmul %68, %8, %cst_17 {dimension_numbers = #tpu.dot_dimension_numbers<[1], [0], [0], [1], [0, 0, 1, 1], [], []>} : vector<8x128xf32>, vector<128x384xf32>, vector<8x384xf32> -> vector<8x384xf32>
    %72 = vector.extract_strided_slice %70 {offsets = [0, 0], sizes = [8, 128], strides = [1, 1]} : vector<8x384xf32> to vector<8x128xf32>
    %73 = vector.extract_strided_slice %71 {offsets = [0, 0], sizes = [8, 128], strides = [1, 1]} : vector<8x384xf32> to vector<8x128xf32>
    %74 = arith.addf %72, %73 : vector<8x128xf32>
    %75 = arith.negf %74 : vector<8x128xf32>
    %76 = math.exp %75 : vector<8x128xf32>
    %cst_18 = arith.constant 1.000000e+00 : f32
    %77 = vector.broadcast %cst_18 : f32 to vector<8x128xf32>
    %78 = arith.addf %77, %76 : vector<8x128xf32>
    %79 = arith.divf %77, %78 : vector<8x128xf32>
    %80 = vector.extract_strided_slice %70 {offsets = [0, 128], sizes = [8, 128], strides = [1, 1]} : vector<8x384xf32> to vector<8x128xf32>
    %81 = vector.extract_strided_slice %71 {offsets = [0, 128], sizes = [8, 128], strides = [1, 1]} : vector<8x384xf32> to vector<8x128xf32>
    %82 = arith.addf %80, %81 : vector<8x128xf32>
    %83 = arith.negf %82 : vector<8x128xf32>
    %84 = math.exp %83 : vector<8x128xf32>
    %cst_19 = arith.constant 1.000000e+00 : f32
    %85 = vector.broadcast %cst_19 : f32 to vector<8x128xf32>
    %86 = arith.addf %85, %84 : vector<8x128xf32>
    %87 = arith.divf %85, %86 : vector<8x128xf32>
    %88 = vector.extract_strided_slice %70 {offsets = [0, 256], sizes = [8, 128], strides = [1, 1]} : vector<8x384xf32> to vector<8x128xf32>
    %89 = vector.extract_strided_slice %71 {offsets = [0, 256], sizes = [8, 128], strides = [1, 1]} : vector<8x384xf32> to vector<8x128xf32>
    %90 = arith.addf %89, %11 : vector<8x128xf32>
    %91 = arith.mulf %79, %90 : vector<8x128xf32>
    %92 = arith.addf %88, %91 : vector<8x128xf32>
    %93 = math.tanh %92 : vector<8x128xf32>
    %94 = arith.subf %68, %93 : vector<8x128xf32>
    %95 = arith.mulf %87, %94 : vector<8x128xf32>
    %96 = arith.addf %93, %95 : vector<8x128xf32>
    %97 = vector.extract_strided_slice %7 {offsets = [0, 3, 0], sizes = [8, 1, 384], strides = [1, 1, 1]} : vector<8x8x384xf32> to vector<8x1x384xf32>
    %98 = vector.shape_cast %97 : vector<8x1x384xf32> to vector<8x384xf32>
    %cst_20 = arith.constant dense<0.000000e+00> : vector<8x384xf32>
    %99 = tpu.matmul %96, %8, %cst_20 {dimension_numbers = #tpu.dot_dimension_numbers<[1], [0], [0], [1], [0, 0, 1, 1], [], []>} : vector<8x128xf32>, vector<128x384xf32>, vector<8x384xf32> -> vector<8x384xf32>
    %100 = vector.extract_strided_slice %98 {offsets = [0, 0], sizes = [8, 128], strides = [1, 1]} : vector<8x384xf32> to vector<8x128xf32>
    %101 = vector.extract_strided_slice %99 {offsets = [0, 0], sizes = [8, 128], strides = [1, 1]} : vector<8x384xf32> to vector<8x128xf32>
    %102 = arith.addf %100, %101 : vector<8x128xf32>
    %103 = arith.negf %102 : vector<8x128xf32>
    %104 = math.exp %103 : vector<8x128xf32>
    %cst_21 = arith.constant 1.000000e+00 : f32
    %105 = vector.broadcast %cst_21 : f32 to vector<8x128xf32>
    %106 = arith.addf %105, %104 : vector<8x128xf32>
    %107 = arith.divf %105, %106 : vector<8x128xf32>
    %108 = vector.extract_strided_slice %98 {offsets = [0, 128], sizes = [8, 128], strides = [1, 1]} : vector<8x384xf32> to vector<8x128xf32>
    %109 = vector.extract_strided_slice %99 {offsets = [0, 128], sizes = [8, 128], strides = [1, 1]} : vector<8x384xf32> to vector<8x128xf32>
    %110 = arith.addf %108, %109 : vector<8x128xf32>
    %111 = arith.negf %110 : vector<8x128xf32>
    %112 = math.exp %111 : vector<8x128xf32>
    %cst_22 = arith.constant 1.000000e+00 : f32
    %113 = vector.broadcast %cst_22 : f32 to vector<8x128xf32>
    %114 = arith.addf %113, %112 : vector<8x128xf32>
    %115 = arith.divf %113, %114 : vector<8x128xf32>
    %116 = vector.extract_strided_slice %98 {offsets = [0, 256], sizes = [8, 128], strides = [1, 1]} : vector<8x384xf32> to vector<8x128xf32>
    %117 = vector.extract_strided_slice %99 {offsets = [0, 256], sizes = [8, 128], strides = [1, 1]} : vector<8x384xf32> to vector<8x128xf32>
    %118 = arith.addf %117, %11 : vector<8x128xf32>
    %119 = arith.mulf %107, %118 : vector<8x128xf32>
    %120 = arith.addf %116, %119 : vector<8x128xf32>
    %121 = math.tanh %120 : vector<8x128xf32>
    %122 = arith.subf %96, %121 : vector<8x128xf32>
    %123 = arith.mulf %115, %122 : vector<8x128xf32>
    %124 = arith.addf %121, %123 : vector<8x128xf32>
    %125 = vector.extract_strided_slice %7 {offsets = [0, 4, 0], sizes = [8, 1, 384], strides = [1, 1, 1]} : vector<8x8x384xf32> to vector<8x1x384xf32>
    %126 = vector.shape_cast %125 : vector<8x1x384xf32> to vector<8x384xf32>
    %cst_23 = arith.constant dense<0.000000e+00> : vector<8x384xf32>
    %127 = tpu.matmul %124, %8, %cst_23 {dimension_numbers = #tpu.dot_dimension_numbers<[1], [0], [0], [1], [0, 0, 1, 1], [], []>} : vector<8x128xf32>, vector<128x384xf32>, vector<8x384xf32> -> vector<8x384xf32>
    %128 = vector.extract_strided_slice %126 {offsets = [0, 0], sizes = [8, 128], strides = [1, 1]} : vector<8x384xf32> to vector<8x128xf32>
    %129 = vector.extract_strided_slice %127 {offsets = [0, 0], sizes = [8, 128], strides = [1, 1]} : vector<8x384xf32> to vector<8x128xf32>
    %130 = arith.addf %128, %129 : vector<8x128xf32>
    %131 = arith.negf %130 : vector<8x128xf32>
    %132 = math.exp %131 : vector<8x128xf32>
    %cst_24 = arith.constant 1.000000e+00 : f32
    %133 = vector.broadcast %cst_24 : f32 to vector<8x128xf32>
    %134 = arith.addf %133, %132 : vector<8x128xf32>
    %135 = arith.divf %133, %134 : vector<8x128xf32>
    %136 = vector.extract_strided_slice %126 {offsets = [0, 128], sizes = [8, 128], strides = [1, 1]} : vector<8x384xf32> to vector<8x128xf32>
    %137 = vector.extract_strided_slice %127 {offsets = [0, 128], sizes = [8, 128], strides = [1, 1]} : vector<8x384xf32> to vector<8x128xf32>
    %138 = arith.addf %136, %137 : vector<8x128xf32>
    %139 = arith.negf %138 : vector<8x128xf32>
    %140 = math.exp %139 : vector<8x128xf32>
    %cst_25 = arith.constant 1.000000e+00 : f32
    %141 = vector.broadcast %cst_25 : f32 to vector<8x128xf32>
    %142 = arith.addf %141, %140 : vector<8x128xf32>
    %143 = arith.divf %141, %142 : vector<8x128xf32>
    %144 = vector.extract_strided_slice %126 {offsets = [0, 256], sizes = [8, 128], strides = [1, 1]} : vector<8x384xf32> to vector<8x128xf32>
    %145 = vector.extract_strided_slice %127 {offsets = [0, 256], sizes = [8, 128], strides = [1, 1]} : vector<8x384xf32> to vector<8x128xf32>
    %146 = arith.addf %145, %11 : vector<8x128xf32>
    %147 = arith.mulf %135, %146 : vector<8x128xf32>
    %148 = arith.addf %144, %147 : vector<8x128xf32>
    %149 = math.tanh %148 : vector<8x128xf32>
    %150 = arith.subf %124, %149 : vector<8x128xf32>
    %151 = arith.mulf %143, %150 : vector<8x128xf32>
    %152 = arith.addf %149, %151 : vector<8x128xf32>
    %153 = vector.extract_strided_slice %7 {offsets = [0, 5, 0], sizes = [8, 1, 384], strides = [1, 1, 1]} : vector<8x8x384xf32> to vector<8x1x384xf32>
    %154 = vector.shape_cast %153 : vector<8x1x384xf32> to vector<8x384xf32>
    %cst_26 = arith.constant dense<0.000000e+00> : vector<8x384xf32>
    %155 = tpu.matmul %152, %8, %cst_26 {dimension_numbers = #tpu.dot_dimension_numbers<[1], [0], [0], [1], [0, 0, 1, 1], [], []>} : vector<8x128xf32>, vector<128x384xf32>, vector<8x384xf32> -> vector<8x384xf32>
    %156 = vector.extract_strided_slice %154 {offsets = [0, 0], sizes = [8, 128], strides = [1, 1]} : vector<8x384xf32> to vector<8x128xf32>
    %157 = vector.extract_strided_slice %155 {offsets = [0, 0], sizes = [8, 128], strides = [1, 1]} : vector<8x384xf32> to vector<8x128xf32>
    %158 = arith.addf %156, %157 : vector<8x128xf32>
    %159 = arith.negf %158 : vector<8x128xf32>
    %160 = math.exp %159 : vector<8x128xf32>
    %cst_27 = arith.constant 1.000000e+00 : f32
    %161 = vector.broadcast %cst_27 : f32 to vector<8x128xf32>
    %162 = arith.addf %161, %160 : vector<8x128xf32>
    %163 = arith.divf %161, %162 : vector<8x128xf32>
    %164 = vector.extract_strided_slice %154 {offsets = [0, 128], sizes = [8, 128], strides = [1, 1]} : vector<8x384xf32> to vector<8x128xf32>
    %165 = vector.extract_strided_slice %155 {offsets = [0, 128], sizes = [8, 128], strides = [1, 1]} : vector<8x384xf32> to vector<8x128xf32>
    %166 = arith.addf %164, %165 : vector<8x128xf32>
    %167 = arith.negf %166 : vector<8x128xf32>
    %168 = math.exp %167 : vector<8x128xf32>
    %cst_28 = arith.constant 1.000000e+00 : f32
    %169 = vector.broadcast %cst_28 : f32 to vector<8x128xf32>
    %170 = arith.addf %169, %168 : vector<8x128xf32>
    %171 = arith.divf %169, %170 : vector<8x128xf32>
    %172 = vector.extract_strided_slice %154 {offsets = [0, 256], sizes = [8, 128], strides = [1, 1]} : vector<8x384xf32> to vector<8x128xf32>
    %173 = vector.extract_strided_slice %155 {offsets = [0, 256], sizes = [8, 128], strides = [1, 1]} : vector<8x384xf32> to vector<8x128xf32>
    %174 = arith.addf %173, %11 : vector<8x128xf32>
    %175 = arith.mulf %163, %174 : vector<8x128xf32>
    %176 = arith.addf %172, %175 : vector<8x128xf32>
    %177 = math.tanh %176 : vector<8x128xf32>
    %178 = arith.subf %152, %177 : vector<8x128xf32>
    %179 = arith.mulf %171, %178 : vector<8x128xf32>
    %180 = arith.addf %177, %179 : vector<8x128xf32>
    %181 = vector.extract_strided_slice %7 {offsets = [0, 6, 0], sizes = [8, 1, 384], strides = [1, 1, 1]} : vector<8x8x384xf32> to vector<8x1x384xf32>
    %182 = vector.shape_cast %181 : vector<8x1x384xf32> to vector<8x384xf32>
    %cst_29 = arith.constant dense<0.000000e+00> : vector<8x384xf32>
    %183 = tpu.matmul %180, %8, %cst_29 {dimension_numbers = #tpu.dot_dimension_numbers<[1], [0], [0], [1], [0, 0, 1, 1], [], []>} : vector<8x128xf32>, vector<128x384xf32>, vector<8x384xf32> -> vector<8x384xf32>
    %184 = vector.extract_strided_slice %182 {offsets = [0, 0], sizes = [8, 128], strides = [1, 1]} : vector<8x384xf32> to vector<8x128xf32>
    %185 = vector.extract_strided_slice %183 {offsets = [0, 0], sizes = [8, 128], strides = [1, 1]} : vector<8x384xf32> to vector<8x128xf32>
    %186 = arith.addf %184, %185 : vector<8x128xf32>
    %187 = arith.negf %186 : vector<8x128xf32>
    %188 = math.exp %187 : vector<8x128xf32>
    %cst_30 = arith.constant 1.000000e+00 : f32
    %189 = vector.broadcast %cst_30 : f32 to vector<8x128xf32>
    %190 = arith.addf %189, %188 : vector<8x128xf32>
    %191 = arith.divf %189, %190 : vector<8x128xf32>
    %192 = vector.extract_strided_slice %182 {offsets = [0, 128], sizes = [8, 128], strides = [1, 1]} : vector<8x384xf32> to vector<8x128xf32>
    %193 = vector.extract_strided_slice %183 {offsets = [0, 128], sizes = [8, 128], strides = [1, 1]} : vector<8x384xf32> to vector<8x128xf32>
    %194 = arith.addf %192, %193 : vector<8x128xf32>
    %195 = arith.negf %194 : vector<8x128xf32>
    %196 = math.exp %195 : vector<8x128xf32>
    %cst_31 = arith.constant 1.000000e+00 : f32
    %197 = vector.broadcast %cst_31 : f32 to vector<8x128xf32>
    %198 = arith.addf %197, %196 : vector<8x128xf32>
    %199 = arith.divf %197, %198 : vector<8x128xf32>
    %200 = vector.extract_strided_slice %182 {offsets = [0, 256], sizes = [8, 128], strides = [1, 1]} : vector<8x384xf32> to vector<8x128xf32>
    %201 = vector.extract_strided_slice %183 {offsets = [0, 256], sizes = [8, 128], strides = [1, 1]} : vector<8x384xf32> to vector<8x128xf32>
    %202 = arith.addf %201, %11 : vector<8x128xf32>
    %203 = arith.mulf %191, %202 : vector<8x128xf32>
    %204 = arith.addf %200, %203 : vector<8x128xf32>
    %205 = math.tanh %204 : vector<8x128xf32>
    %206 = arith.subf %180, %205 : vector<8x128xf32>
    %207 = arith.mulf %199, %206 : vector<8x128xf32>
    %208 = arith.addf %205, %207 : vector<8x128xf32>
    %209 = vector.extract_strided_slice %7 {offsets = [0, 7, 0], sizes = [8, 1, 384], strides = [1, 1, 1]} : vector<8x8x384xf32> to vector<8x1x384xf32>
    %210 = vector.shape_cast %209 : vector<8x1x384xf32> to vector<8x384xf32>
    %cst_32 = arith.constant dense<0.000000e+00> : vector<8x384xf32>
    %211 = tpu.matmul %208, %8, %cst_32 {dimension_numbers = #tpu.dot_dimension_numbers<[1], [0], [0], [1], [0, 0, 1, 1], [], []>} : vector<8x128xf32>, vector<128x384xf32>, vector<8x384xf32> -> vector<8x384xf32>
    %212 = vector.extract_strided_slice %210 {offsets = [0, 0], sizes = [8, 128], strides = [1, 1]} : vector<8x384xf32> to vector<8x128xf32>
    %213 = vector.extract_strided_slice %211 {offsets = [0, 0], sizes = [8, 128], strides = [1, 1]} : vector<8x384xf32> to vector<8x128xf32>
    %214 = arith.addf %212, %213 : vector<8x128xf32>
    %215 = arith.negf %214 : vector<8x128xf32>
    %216 = math.exp %215 : vector<8x128xf32>
    %cst_33 = arith.constant 1.000000e+00 : f32
    %217 = vector.broadcast %cst_33 : f32 to vector<8x128xf32>
    %218 = arith.addf %217, %216 : vector<8x128xf32>
    %219 = arith.divf %217, %218 : vector<8x128xf32>
    %220 = vector.extract_strided_slice %210 {offsets = [0, 128], sizes = [8, 128], strides = [1, 1]} : vector<8x384xf32> to vector<8x128xf32>
    %221 = vector.extract_strided_slice %211 {offsets = [0, 128], sizes = [8, 128], strides = [1, 1]} : vector<8x384xf32> to vector<8x128xf32>
    %222 = arith.addf %220, %221 : vector<8x128xf32>
    %223 = arith.negf %222 : vector<8x128xf32>
    %224 = math.exp %223 : vector<8x128xf32>
    %cst_34 = arith.constant 1.000000e+00 : f32
    %225 = vector.broadcast %cst_34 : f32 to vector<8x128xf32>
    %226 = arith.addf %225, %224 : vector<8x128xf32>
    %227 = arith.divf %225, %226 : vector<8x128xf32>
    %228 = vector.extract_strided_slice %210 {offsets = [0, 256], sizes = [8, 128], strides = [1, 1]} : vector<8x384xf32> to vector<8x128xf32>
    %229 = vector.extract_strided_slice %211 {offsets = [0, 256], sizes = [8, 128], strides = [1, 1]} : vector<8x384xf32> to vector<8x128xf32>
    %230 = arith.addf %229, %11 : vector<8x128xf32>
    %231 = arith.mulf %219, %230 : vector<8x128xf32>
    %232 = arith.addf %228, %231 : vector<8x128xf32>
    %233 = math.tanh %232 : vector<8x128xf32>
    %234 = arith.subf %208, %233 : vector<8x128xf32>
    %235 = arith.mulf %227, %234 : vector<8x128xf32>
    %236 = arith.addf %233, %235 : vector<8x128xf32>
    %c0_35 = arith.constant 0 : index
    %c0_36 = arith.constant 0 : index
    %237 = vector.load %arg5[%c0_35, %c0_36] : memref<128x128xf32, #tpu.memory_space<vmem>>, vector<128x128xf32>
    %cst_37 = arith.constant dense<0.000000e+00> : vector<8x128xf32>
    %238 = tpu.matmul %236, %237, %cst_37 {dimension_numbers = #tpu.dot_dimension_numbers<[1], [0], [0], [1], [0, 0, 1, 1], [], []>} : vector<8x128xf32>, vector<128x128xf32>, vector<8x128xf32> -> vector<8x128xf32>
    %c0_38 = arith.constant 0 : index
    %c0_39 = arith.constant 0 : index
    %239 = vector.load %arg6[%c0_38, %c0_39] : memref<1x128xf32, #tpu.memory_space<vmem>>, vector<1x128xf32>
    %240 = vector.broadcast %239 : vector<1x128xf32> to vector<8x128xf32>
    %241 = arith.addf %238, %240 : vector<8x128xf32>
    %cst_40 = arith.constant 0.000000e+00 : f32
    %242 = vector.broadcast %cst_40 : f32 to vector<8x128xf32>
    %243 = arith.maximumf %241, %242 : vector<8x128xf32>
    %c0_41 = arith.constant 0 : index
    %c0_42 = arith.constant 0 : index
    %244 = vector.load %arg7[%c0_41, %c0_42] : memref<128x128xf32, #tpu.memory_space<vmem>>, vector<128x128xf32>
    %cst_43 = arith.constant dense<0.000000e+00> : vector<8x128xf32>
    %245 = tpu.matmul %243, %244, %cst_43 {dimension_numbers = #tpu.dot_dimension_numbers<[1], [0], [0], [1], [0, 0, 1, 1], [], []>} : vector<8x128xf32>, vector<128x128xf32>, vector<8x128xf32> -> vector<8x128xf32>
    %c0_44 = arith.constant 0 : index
    %c0_45 = arith.constant 0 : index
    %246 = vector.load %arg8[%c0_44, %c0_45] : memref<1x128xf32, #tpu.memory_space<vmem>>, vector<1x128xf32>
    %247 = vector.broadcast %246 : vector<1x128xf32> to vector<8x128xf32>
    %248 = arith.addf %245, %247 : vector<8x128xf32>
    %cst_46 = arith.constant 0.000000e+00 : f32
    %249 = vector.broadcast %cst_46 : f32 to vector<8x128xf32>
    %250 = arith.maximumf %248, %249 : vector<8x128xf32>
    %c0_47 = arith.constant 0 : index
    %c0_48 = arith.constant 0 : index
    %251 = vector.load %arg9[%c0_47, %c0_48] : memref<128x128xf32, #tpu.memory_space<vmem>>, vector<128x128xf32>
    %cst_49 = arith.constant dense<0.000000e+00> : vector<8x128xf32>
    %252 = tpu.matmul %250, %251, %cst_49 {dimension_numbers = #tpu.dot_dimension_numbers<[1], [0], [0], [1], [0, 0, 1, 1], [], []>} : vector<8x128xf32>, vector<128x128xf32>, vector<8x128xf32> -> vector<8x128xf32>
    %c0_50 = arith.constant 0 : index
    %c0_51 = arith.constant 0 : index
    %253 = vector.load %arg10[%c0_50, %c0_51] : memref<1x128xf32, #tpu.memory_space<vmem>>, vector<1x128xf32>
    %254 = vector.broadcast %253 : vector<1x128xf32> to vector<8x128xf32>
    %255 = arith.addf %252, %254 : vector<8x128xf32>
    %c0_52 = arith.constant 0 : index
    %c0_53 = arith.constant 0 : index
    %256 = vector.load %arg11[%c0_52, %c0_53] : memref<8x128xf32, #tpu.memory_space<vmem>>, vector<8x128xf32>
    tpu.vector_store %arg11[%c0_52, %c0_53], %255 {strides = array<i32>} : memref<8x128xf32, #tpu.memory_space<vmem>>, vector<8x128xf32>,
    return
  }
}

</mosaic_0001>

<bundles_post_ra>
// kernel: tpu_custom_call.1
= control target key start
LH: loop header
LB: loop body
LE: loop exit
PB: predicated region body
PF: predicated region fallthrough
CT: control target
= control target key end

     0   :  { %16 = vsyncpa [#allocation3], 0  ;;  %s7342_s0 = inlined_call_operand.vmem [shape: f32[8,8,4], index: 0, kind: input, shape index: {}]   ;;  %s7343_s1 = inlined_call_operand.vmem [shape: f32[4,384], index: 1, kind: input, shape index: {}]   ;;  %s7344_s2 = inlined_call_operand.vmem [shape: f32[1,384], index: 2, kind: input, shape index: {}]   ;;  %s7345_s3 = inlined_call_operand.hbm [shape: f32[128,384], index: 3, kind: input, shape index: {}]   ;;  %s7346_s4 = inlined_call_operand.vmem [shape: f32[1,128], index: 4, kind: input, shape index: {}]   ;;  %s7347_s5 = inlined_call_operand.hbm [shape: f32[128,128], index: 5, kind: input, shape index: {}]   ;;  %s7348_s6 = inlined_call_operand.vmem [shape: f32[1,128], index: 6, kind: input, shape index: {}]   ;;  %s7349_s7 = inlined_call_operand.hbm [shape: f32[128,128], index: 7, kind: input, shape index: {}]   ;;  %s7350_s8 = inlined_call_operand.vmem [shape: f32[1,128], index: 8, kind: input, shape index: {}]   ;;  %s7351_s9 = inlined_call_operand.hbm [shape: f32[128,128], index: 9, kind: input, shape index: {}]   ;;  %s7352_s10 = inlined_call_operand.vmem [shape: f32[1,128], index: 10, kind: input, shape index: {}]   ;;  %s7353_s11 = inlined_call_operand.hbm [shape: f32[8,128], index: 11, kind: output, shape index: {}]  }
   0x1   :  { %17 = vsyncpa [#allocation6], 0 }
   0x2   :  { %18 = vsyncpa [#allocation9], 0 }
   0x3   :  { %19 = vsyncpa [#allocation4], 0  ;;  %s5708_s17 = smov [#allocation5]  }
   0x4   :  { %s45_s18 = sshll.u32 %s5708_s17, 4  ;;  %s46_s18 = int_to_ptr.vmem [resolvable:$true] %s45_s18 }
   0x5   :  { %s5608_s19 = scalar_lea.vmem %s46_s18, 2048  ;;  %p5613_p1 = scmp.lt.s32.totalorder %s46_s18, %s46_s18 }
   0x6   :  { %p5609_p0 = scmp.ne.s32.totalorder %s46_s18, %s5608_s19  ;;  %p5614_p2 = scmp.lt.s32.totalorder %s5608_s19, %s5608_s19 }
   0x8   :  { %p5615_p3 = por %p5614_p2, %p5613_p1 }
   0xa   :  { %p5616_p4 = pnand %p5615_p3, %p5609_p0 }
   0xc   :  { %5619 = shalt.err (!%p5616_p4)
}
   0xd   :  { %s5709_s20 = smov 128   ;;  %s5710_s21 = smov 8  }
   0xe   :  { %51 = dma.hbm_to_vmem [thread:$0]  %s7347_s5, 2048, %s46_s18, [#allocation6], %s5709_s20, %s5709_s20, %s5710_s21  }
   0xf   :  { %s5711_s24 = smov [#allocation2]  }
  0x10   :  { %s31_s25 = sshll.u32 %s5711_s24, 4  ;;  %s32_s25 = int_to_ptr.vmem [resolvable:$true] %s31_s25 }
  0x11   :  { %s5628_s26 = scalar_lea.vmem %s32_s25, 6144  ;;  %p5633_p6 = scmp.lt.s32.totalorder %s32_s25, %s32_s25 }
  0x12   :  { %p5629_p5 = scmp.ne.s32.totalorder %s32_s25, %s5628_s26  ;;  %p5634_p7 = scmp.lt.s32.totalorder %s5628_s26, %s5628_s26 }
  0x14   :  { %p5635_p8 = por %p5634_p7, %p5633_p6 }
  0x16   :  { %p5636_p9 = pnand %p5635_p8, %p5629_p5 }
  0x18   :  { %5639 = shalt.err (!%p5636_p9)
}
  0x19   :  { %s5712_s27 = smov 384   ;;  %s5713_s28 = smov 24  }
  0x1a   :  { %37 = dma.hbm_to_vmem [thread:$0]  %s7345_s3, 6144, %s32_s25, [#allocation3], %s5712_s27, %s5712_s27, %s5713_s28  }
  0x1b   :  { %s5714_s12 = smov [#allocation7]   ;;  %s5715_s14 = smov [#allocation8]  }
  0x1c   :  { %s59_s13 = sshll.u32 %s5714_s12, 4  ;;  %s73_s5 = sshll.u32 %s5715_s14, 4  ;;  %s60_s13 = int_to_ptr.vmem [resolvable:$true] %s59_s13  ;;  %s74_s5 = int_to_ptr.vmem [resolvable:$true] %s73_s5 }
  0x1d   :  { %s5648_s15 = scalar_lea.vmem %s60_s13, 2048  ;;  %p5653_p11 = scmp.lt.s32.totalorder %s60_s13, %s60_s13 }
  0x1e   :  { %p5649_p10 = scmp.ne.s32.totalorder %s60_s13, %s5648_s15  ;;  %p5654_p12 = scmp.lt.s32.totalorder %s5648_s15, %s5648_s15 }
  0x20   :  { %p5655_p13 = por %p5654_p12, %p5653_p11 }
  0x22   :  { %p5656_p0 = pnand %p5655_p13, %p5649_p10 }
  0x24   :  { %5659 = shalt.err (!%p5656_p0)
}
  0x25   :  { %65 = dma.hbm_to_vmem [thread:$0]  %s7349_s7, 2048, %s60_s13, [#allocation6], %s5709_s20, %s5709_s20, %s5710_s21  }
  0x26   :  { %s5668_s3 = scalar_lea.vmem %s74_s5, 2048  ;;  %p5673_p2 = scmp.lt.s32.totalorder %s74_s5, %s74_s5 }
  0x27   :  { %p5669_p1 = scmp.ne.s32.totalorder %s74_s5, %s5668_s3  ;;  %p5674_p3 = scmp.lt.s32.totalorder %s5668_s3, %s5668_s3 }
  0x29   :  { %p5675_p4 = por %p5674_p3, %p5673_p2 }
  0x2b   :  { %p5676_p5 = pnand %p5675_p4, %p5669_p1 }
  0x2d   :  { %5679 = shalt.err (!%p5676_p5)
}
  0x2e   :  { %79 = dma.hbm_to_vmem [thread:$0]  %s7351_s9, 2048, %s74_s5, [#allocation9], %s5709_s20, %s5709_s20, %s5710_s21  }
  0x2f   :  { %5700 = dma.done.wait [#allocation3], 6144  }
  0x30   :  { %5701 = vsyncadd [#allocation3], 4294961152 }
  0x31   :  { %5702 = dma.done.wait [#allocation6], 4096  }
  0x32   :  { %5703 = vsyncadd [#allocation6], 4294963200 }
  0x33   :  { %5704 = dma.done.wait [#allocation9], 2048  }
  0x34   :  { %5705 = vsyncadd [#allocation9], 4294965248  ;;  %v7354_v0 = vmov 0.0   ;;  %v102_v1 = vld [vmem:[%s7343_s1] sm:$0xff]  ;;  %vm149_vm0 = vcmask 1043456   ;;  %vm124_vm1 = vcmask 31744  }
  0x35   :  { %220 = vmatprep.mubr.f32.mxu0 %v7354_v0  ;;  %v94_v2 = vld [vmem:[%s7342_s0] sm:$0xff]  ;;  %v123_v3 = vcombine.high %v102_v1, %v102_v1  ;;  %v5808_v4 = vld [vmem:[#allocation2 + $0x170] sm:$0xff]  ;;  %v5811_v5 = vld [vmem:[#allocation2 + $0x168] sm:$0xff]  ;;  %vm5717_vm2 = vmmov 0   ;;  %vm788_vm3 = vcmask 1041409   ;;  %vm791_vm4 = vcmask 1042434  }
  0x36   :  { %4404 = vmatprep.mubr.msk.f32.mxu1 %vm124_vm1, %v94_v2  ;;  %v5814_v6 = vld [vmem:[#allocation2 + $0x158] sm:$0xff]  ;;  %v5818_v7 = vld [vmem:[#allocation2 + $0x150] sm:$0xff]  ;;  %v95_v8 = vld [vmem:[%s7342_s0 + $0x8] sm:$0xff]  ;;  %vm794_vm5 = vcmask 1043459   ;;  %vm797_vm6 = vcmask 1044484   ;;  %vm800_vm7 = vcmask 1045509  }
  0x37   :  { %4055 = vmatprep.subr.msk.mxu0 %vm149_vm0, %v123_v3  ;;  %v5825_v9 = vld [vmem:[#allocation2 + $0x140] sm:$0xff]  ;;  %v5828_v10 = vld [vmem:[#allocation2 + $0x138] sm:$0xff]  ;;  %v5831_v11 = vld [vmem:[#allocation2 + $0x128] sm:$0xff]  ;;  %vm803_vm8 = vcmask 1046534   ;;  %vm806_vm9 = vcmask 1047559   ;;  %s5718_s26 = smov [#allocation10]  }
  0x38   :  { %4056 = vmatpush1.msk.msra.mxu0 %vm149_vm0, %v102_v1  ;;  %v5835_v12 = vld [vmem:[#allocation2 + $0x120] sm:$0xff]  ;;  %v5842_v13 = vld [vmem:[%s7342_s0 + $0x10] sm:$0xff]  ;;  %v5847_v15 = vld [vmem:[#allocation2 + $0x108] sm:$0xff]  ;;  %s4044_s27 = sshll.u32 %s5718_s26, 4  ;;  %s4045_s27 = int_to_ptr.vmem [resolvable:$true] %s4044_s27 }
  0x39   :  { %4057 = vmatmul.mubr.msk.f32.vlgmr.msra.gmra.mxu0 %vm124_vm1, %v94_v2  ;;  %429 = vmatprep.subr.mxu0 %v5808_v4  ;;  %v5844_v14 = vld [vmem:[#allocation2 + $0x110] sm:$0xff]  ;;  %v5850_v16 = vld [vmem:[#allocation2 + $0xf8] sm:$0xff]  ;;  %v103_v17 = vld [vmem:[%s7343_s1 + $0x8] sm:$0xf]  ;;  %s5680_s28 = scalar_lea.vmem %s4045_s27, 128  ;;  %p5685_p7 = scmp.lt.s32.totalorder %s4045_s27, %s4045_s27 }
  0x3a   :  { %430 = vmatpush1.msra.mxu0 %v5811_v5  ;;  %226 = vmatprep.mubr.f32.mxu0 %v7354_v0  ;;  %v5858_v18 = vld [vmem:[#allocation2 + $0xf0] sm:$0xff]  ;;  %v5865_v19 = vld [vmem:[%s7342_s0 + $0x18] sm:$0xff]  ;;  %v5867_v20 = vld [vmem:[#allocation2 + $0xe0] sm:$0xff]  ;;  %p5681_p6 = scmp.ne.s32.totalorder %s4045_s27, %s5680_s28  ;;  %p5686_p8 = scmp.lt.s32.totalorder %s5680_s28, %s5680_s28 }
  0x3b   :  { %431 = vmatprep.subr.mxu0 %v5814_v6  ;;  %v5870_v21 = vld [vmem:[#allocation2 + $0xd8] sm:$0xff]  ;;  %4402 = vmatprep.subr.msk.mxu1 %vm149_vm0, %v103_v17  ;;  %v5874_v22 = vld [vmem:[#allocation2 + $0xc8] sm:$0xff]  ;;  %v5880_v23 = vld [vmem:[#allocation2 + $0xc0] sm:$0xff] }
  0x3c   :  { %432 = vmatpush1.msra.mxu0 %v5818_v7  ;;  %4403 = vmatpush3.msk.msra.mxu1 %vm149_vm0, %v103_v17  ;;  %v5887_v24 = vld [vmem:[%s7342_s0 + $0x20] sm:$0xff]  ;;  %v5889_v25 = vld [vmem:[#allocation2 + $0xb0] sm:$0xff]  ;;  %v5892_v26 = vld [vmem:[#allocation2 + $0xa8] sm:$0xff]  ;;  %p5687_p9 = por %p5686_p8, %p5685_p7 }
  0x3d   :  { %4058 = vmatmul.mubr.msk.f32.gmra.mxu0 %vm124_vm1, %v95_v8  ;;  %433 = vmatprep.subr.mxu0 %v5825_v9  ;;  %7503 = vst [vmem:[#allocation15_spill] sm:$0xff] %v5889_v25  ;;  %7504 = vst [vmem:[#allocation16_spill] sm:$0xff] %v5892_v26  ;;  %v5896_v27 = vld [vmem:[#allocation2 + $0x98] sm:$0xff]  ;;  %v5904_v29 = vld [vmem:[#allocation2 + $0x90] sm:$0xff] }
  0x3e   :  { %434 = vmatpush1.msra.mxu0 %v5828_v10  ;;  %232 = vmatprep.mubr.f32.mxu0 %v7354_v0  ;;  %7505 = vst [vmem:[#allocation17_spill] sm:$0xff] %v5896_v27  ;;  %v5899_v28 = vld [vmem:[#allocation2 + $0x178] sm:$0xff]  ;;  %7506 = vst [vmem:[#allocation18_spill] sm:$0xff] %v5904_v29  ;;  %v5911_v30 = vld [vmem:[%s7342_s0 + $0x28] sm:$0xff]  ;;  %p5688_p10 = pnand %p5687_p9, %p5681_p6 }
  0x3f   :  { %435 = vmatprep.subr.mxu0 %v5831_v11  ;;  %4416 = vmatprep.subr.mxu1 %v7354_v0  ;;  %v5913_v31 = vld [vmem:[#allocation2 + $0x80] sm:$0xff]  ;;  %v5916_v32 = vld [vmem:[#allocation2 + $0x78] sm:$0xff]  ;;  %v5920_v33 = vld [vmem:[#allocation2 + $0x68] sm:$0xff] }
  0x40   :  { %436 = vmatpush1.msra.mxu0 %v5835_v12  ;;  %4405 = vmatmul.mubr.msk.f32.vlgmr.msra.gmra.mxu1 %vm124_vm1, %v95_v8  ;;  %7507 = vst [vmem:[#allocation19_spill] sm:$0xff] %v5913_v31  ;;  %7508 = vst [vmem:[#allocation20_spill] sm:$0xff] %v5916_v32  ;;  %v5923_v34 = vld [vmem:[#allocation2 + $0x160] sm:$0xff]  ;;  %v100_v36 = vld [vmem:[%s7342_s0 + $0x30] sm:$0xff] }
  0x41   :  { %4059 = vmatmul.mubr.msk.f32.gmra.mxu0 %vm124_vm1, %v5842_v13  ;;  %437 = vmatprep.subr.mxu0 %v5844_v14  ;;  %7509 = vst [vmem:[#allocation21_spill] sm:$0xff] %v5920_v33  ;;  %v5928_v35 = vld [vmem:[#allocation2 + $0x60] sm:$0xff]  ;;  %v5935_v37 = vld [vmem:[#allocation2 + $0x50] sm:$0xff]  ;;  %v5938_v38 = vld [vmem:[#allocation2 + $0x48] sm:$0xff] }
  0x42   :  { %438 = vmatpush1.msra.mxu0 %v5847_v15  ;;  %238 = vmatprep.mubr.f32.mxu0 %v7354_v0  ;;  %7510 = vst [vmem:[#allocation22_spill] sm:$0xff] %v5928_v35  ;;  %7511 = vst [vmem:[#allocation23_spill] sm:$0xff] %v5935_v37  ;;  %v5942_v39 = vld [vmem:[#allocation2 + $0x38] sm:$0xff]  ;;  %v5945_v40 = vld [vmem:[#allocation2 + $0x148] sm:$0xff] }
  0x43   :  { %439 = vmatprep.subr.mxu0 %v5850_v16  ;;  %4417 = vmatpush3.msra.mxu1 %v5899_v28  ;;  %7512 = vst [vmem:[#allocation24_spill] sm:$0xff] %v5938_v38  ;;  %7513 = vst [vmem:[#allocation25_spill] sm:$0xff] %v5942_v39  ;;  %v5949_v41 = vld [vmem:[#allocation2 + $0x30] sm:$0xff]  ;;  %v101_v42 = vld [vmem:[%s7342_s0 + $0x38] sm:$0xff] }
  0x44   :  { %440 = vmatpush1.msra.mxu0 %v5858_v18  ;;  %4418 = vmatprep.subr.mxu1 %v7354_v0  ;;  %7514 = vst [vmem:[#allocation26_spill] sm:$0xff] %v5949_v41  ;;  %v5956_v43 = vld [vmem:[#allocation2 + $0x20] sm:$0xff]  ;;  %v5959_v44 = vld [vmem:[#allocation2 + $0x18] sm:$0xff]  ;;  %v5963_v45 = vld [vmem:[#allocation2 + $0x8] sm:$0xff] }
  0x45   :  { %4060 = vmatmul.mubr.msk.f32.gmra.mxu0 %vm124_vm1, %v5865_v19  ;;  %441 = vmatprep.subr.mxu0 %v5867_v20  ;;  %7515 = vst [vmem:[#allocation27_spill] sm:$0xff] %v5956_v43  ;;  %7516 = vst [vmem:[#allocation28_spill] sm:$0xff] %v5959_v44  ;;  %v5966_v46 = vld [vmem:[#allocation2 + $0x130] sm:$0xff]  ;;  %v5970_v47 = vld [vmem:[#allocation2] sm:$0xff] }
  0x46   :  { %442 = vmatpush1.msra.mxu0 %v5870_v21  ;;  %244 = vmatprep.mubr.f32.mxu0 %v7354_v0  ;;  %7517 = vst [vmem:[#allocation29_spill] sm:$0xff] %v5963_v45  ;;  %7518 = vst [vmem:[#allocation30_spill] sm:$0xff] %v5970_v47  ;;  %v5974_v48 = vld [vmem:[#allocation2 + $0x118] sm:$0xff]  ;;  %v5980_v49 = vld [vmem:[#allocation2 + $0x100] sm:$0xff] }
  0x47   :  { %443 = vmatprep.subr.mxu0 %v5874_v22  ;;  %4419 = vmatpush3.msra.mxu1 %v5923_v34  ;;  %v5985_v50 = vld [vmem:[#allocation2 + $0xe8] sm:$0xff]  ;;  %v5992_v51 = vld [vmem:[#allocation2 + $0xd0] sm:$0xff]  ;;  %v6000_v52 = vld [vmem:[#allocation2 + $0xb8] sm:$0xff] }
  0x48   :  { %444 = vmatpush1.msra.mxu0 %v5880_v23  ;;  %4420 = vmatprep.subr.mxu1 %v7354_v0  ;;  %7519 = vst [vmem:[#allocation31_spill] sm:$0xff] %v6000_v52  ;;  %v6006_v53 = vld [vmem:[#allocation2 + $0xa0] sm:$0xff]  ;;  %v6013_v54 = vld [vmem:[#allocation2 + $0x88] sm:$0xff]  ;;  %v6019_v55 = vld [vmem:[#allocation2 + $0x70] sm:$0xff] }
  0x49   :  { %4061 = vmatmul.mubr.msk.f32.gmra.mxu0 %vm124_vm1, %v5887_v24  ;;  %445 = vmatprep.subr.mxu0 %v5889_v25  ;;  %7520 = vst [vmem:[#allocation32_spill] sm:$0xff] %v6006_v53  ;;  %7521 = vst [vmem:[#allocation33_spill] sm:$0xff] %v6013_v54  ;;  %v6026_v56 = vld [vmem:[#allocation2 + $0x58] sm:$0xff]  ;;  %v6032_v57 = vld [vmem:[#allocation2 + $0x40] sm:$0xff] }
  0x4a   :  { %446 = vmatpush1.msra.mxu0 %v5892_v26  ;;  %250 = vmatprep.mubr.f32.mxu0 %v7354_v0  ;;  %7522 = vst [vmem:[#allocation34_spill] sm:$0xff] %v6019_v55  ;;  %7523 = vst [vmem:[#allocation35_spill] sm:$0xff] %v6026_v56  ;;  %v6038_v58 = vld [vmem:[#allocation2 + $0x28] sm:$0xff]  ;;  %v6044_v59 = vld [vmem:[#allocation2 + $0x10] sm:$0xff] }
  0x4b   :  { %447 = vmatprep.subr.mxu0 %v5896_v27  ;;  %4421 = vmatpush3.msra.mxu1 %v5945_v40  ;;  %7524 = vst [vmem:[#allocation36_spill] sm:$0xff] %v6032_v57  ;;  %7525 = vst [vmem:[#allocation37_spill] sm:$0xff] %v6038_v58 }
  0x4c   :  { %448 = vmatpush1.msra.mxu0 %v5904_v29  ;;  %4422 = vmatprep.subr.mxu1 %v7354_v0  ;;  %7526 = vst [vmem:[#allocation38_spill] sm:$0xff] %v6044_v59 }
  0x4d   :  { %4062 = vmatmul.mubr.msk.f32.gmra.mxu0 %vm124_vm1, %v5911_v30  ;;  %449 = vmatprep.subr.mxu0 %v5913_v31 }
  0x4e   :  { %450 = vmatpush1.msra.mxu0 %v5916_v32  ;;  %256 = vmatprep.mubr.f32.mxu0 %v7354_v0 }
  0x4f   :  { %451 = vmatprep.subr.mxu0 %v5920_v33  ;;  %4423 = vmatpush3.msra.mxu1 %v5966_v46 }
  0x50   :  { %452 = vmatpush1.msra.mxu0 %v5928_v35  ;;  %4424 = vmatprep.subr.mxu1 %v7354_v0 }
  0x51   :  { %4063 = vmatmul.mubr.msk.f32.gmra.mxu0 %vm124_vm1, %v100_v36  ;;  %453 = vmatprep.subr.mxu0 %v5935_v37 }
  0x52   :  { %454 = vmatpush1.msra.mxu0 %v5938_v38  ;;  %262 = vmatprep.mubr.f32.mxu0 %v7354_v0 }
  0x53   :  { %455 = vmatprep.subr.mxu0 %v5942_v39  ;;  %4425 = vmatpush3.msra.mxu1 %v5974_v48 }
  0x54   :  { %456 = vmatpush1.msra.mxu0 %v5949_v41  ;;  %4426 = vmatprep.subr.mxu1 %v7354_v0 }
  0x55   :  { %4064 = vmatmul.mubr.msk.f32.gmra.mxu0 %vm124_vm1, %v101_v42  ;;  %457 = vmatprep.subr.mxu0 %v5956_v43 }
  0x56   :  { %458 = vmatpush1.msra.mxu0 %v5959_v44  ;;  %493 = vmatprep.mubr.f32.mxu0 %v7354_v0 }
  0x57   :  { %459 = vmatprep.subr.mxu0 %v5963_v45  ;;  %4407 = vmatprep.mubr.msk.f32.mxu1 %vm124_vm1, %v5842_v13 }
  0x58   :  { %460 = vmatpush1.msra.mxu0 %v5970_v47  ;;  %4427 = vmatpush3.msra.mxu1 %v5980_v49 }
  0x59   :  { %494 = vmatmul.mubr.f32.vlgmr.msra.gmra.mxu0 %v7354_v0  ;;  %809 = vmatprep.subr.mxu0 %v5808_v4 }
  0x5a   :  { %4428 = vmatprep.subr.mxu1 %v7354_v0  ;;  %4408 = vmatmul.mubr.msk.f32.gmra.mxu1 %vm124_vm1, %v5865_v19 }
  0x5b   :  { %4429 = vmatpush3.msra.mxu1 %v5985_v50  ;;  %4410 = vmatprep.mubr.msk.f32.mxu1 %vm124_vm1, %v5887_v24 }
  0x5c   :  { %4430 = vmatprep.subr.mxu1 %v7354_v0  ;;  %810 = vmatpush1.msra.mxu0 %v5811_v5 }
  0x5d   :  { %4431 = vmatpush3.msra.mxu1 %v5992_v51  ;;  %811 = vmatprep.subr.mxu0 %v5814_v6 }
  0x5e   :  { %4432 = vmatprep.subr.mxu1 %v7354_v0  ;;  %4411 = vmatmul.mubr.msk.f32.gmra.mxu1 %vm124_vm1, %v5911_v30 }
  0x5f   :  { %4433 = vmatpush3.msra.mxu1 %v6000_v52  ;;  %4413 = vmatprep.mubr.msk.f32.mxu1 %vm124_vm1, %v100_v36 }
  0x60   :  { %4434 = vmatprep.subr.mxu1 %v7354_v0  ;;  %812 = vmatpush1.msra.mxu0 %v5818_v7 }
  0x61   :  { %4435 = vmatpush3.msra.mxu1 %v6006_v53  ;;  %813 = vmatprep.subr.mxu0 %v5825_v9 }
  0x62   :  { %4436 = vmatprep.subr.mxu1 %v7354_v0  ;;  %4414 = vmatmul.mubr.msk.f32.gmra.mxu1 %vm124_vm1, %v101_v42  ;;  %v6115_v42 = vld [vmem:[%s7344_s2] sm:$0x7] }
  0x63   :  { %4437 = vmatpush3.msra.mxu1 %v6013_v54  ;;  %4448 = vmatprep.mubr.msk.f32.mxu1 %vm5717_vm2, %v7354_v0 }
  0x64   :  { %4438 = vmatprep.subr.mxu1 %v7354_v0  ;;  %814 = vmatpush1.msra.mxu0 %v5828_v10 }
  0x65   :  { %4439 = vmatpush3.msra.mxu1 %v6019_v55  ;;  %815 = vmatprep.subr.mxu0 %v5831_v11 }
  0x66   :  { %4440 = vmatprep.subr.mxu1 %v7354_v0  ;;  %816 = vmatpush1.msra.mxu0 %v5835_v12 }
  0x67   :  { %4441 = vmatpush3.msra.mxu1 %v6026_v56  ;;  %817 = vmatprep.subr.mxu0 %v5844_v14 }
  0x68   :  { %4442 = vmatprep.subr.mxu1 %v7354_v0  ;;  %818 = vmatpush1.msra.mxu0 %v5847_v15 }
  0x69   :  { %4443 = vmatpush3.msra.mxu1 %v6032_v57  ;;  %819 = vmatprep.subr.mxu0 %v5850_v16 }
  0x6a   :  { %4444 = vmatprep.subr.mxu1 %v7354_v0  ;;  %820 = vmatpush1.msra.mxu0 %v5858_v18 }
  0x6b   :  { %4445 = vmatpush3.msra.mxu1 %v6038_v58  ;;  %821 = vmatprep.subr.mxu0 %v5867_v20 }
  0x6c   :  { %4446 = vmatprep.subr.mxu1 %v7354_v0  ;;  %822 = vmatpush1.msra.mxu0 %v5870_v21 }
  0x6d   :  { %4447 = vmatpush3.msra.mxu1 %v6044_v59  ;;  %823 = vmatprep.subr.mxu0 %v5874_v22 }
  0x6e   :  { %4449 = vmatmul.mubr.f32.vlgmr.msra.gmra.mxu1 %v7354_v0  ;;  %4451 = vmatprep.subr.mxu1 %v7354_v0 }
  0x6f   :  { %4452 = vmatpush3.msra.mxu1 %v5899_v28  ;;  %824 = vmatpush1.msra.mxu0 %v5880_v23 }
  0x70   :  { %4453 = vmatprep.subr.mxu1 %v7354_v0  ;;  %825 = vmatprep.subr.mxu0 %v5889_v25 }
  0x71   :  { %4454 = vmatpush3.msra.mxu1 %v5923_v34  ;;  %826 = vmatpush1.msra.mxu0 %v5892_v26 }
  0x72   :  { %4455 = vmatprep.subr.mxu1 %v7354_v0  ;;  %827 = vmatprep.subr.mxu0 %v5896_v27 }
  0x73   :  { %4456 = vmatpush3.msra.mxu1 %v5945_v40  ;;  %828 = vmatpush1.msra.mxu0 %v5904_v29 }
  0x74   :  { %4457 = vmatprep.subr.mxu1 %v7354_v0  ;;  %829 = vmatprep.subr.mxu0 %v5913_v31 }
  0x75   :  { %4458 = vmatpush3.msra.mxu1 %v5966_v46  ;;  %830 = vmatpush1.msra.mxu0 %v5916_v32 }
  0x76   :  { %4459 = vmatprep.subr.mxu1 %v7354_v0  ;;  %831 = vmatprep.subr.mxu0 %v5920_v33 }
  0x77   :  { %4460 = vmatpush3.msra.mxu1 %v5974_v48  ;;  %832 = vmatpush1.msra.mxu0 %v5928_v35 }
  0x78   :  { %4461 = vmatprep.subr.mxu1 %v7354_v0  ;;  %833 = vmatprep.subr.mxu0 %v5935_v37 }
  0x79   :  { %4462 = vmatpush3.msra.mxu1 %v5980_v49  ;;  %834 = vmatpush1.msra.mxu0 %v5938_v38 }
  0x7a   :  { %4463 = vmatprep.subr.mxu1 %v7354_v0  ;;  %835 = vmatprep.subr.mxu0 %v5942_v39 }
  0x7b   :  { %4464 = vmatpush3.msra.mxu1 %v5985_v50  ;;  %836 = vmatpush1.msra.mxu0 %v5949_v41 }
  0x7c   :  { %4465 = vmatprep.subr.mxu1 %v7354_v0  ;;  %837 = vmatprep.subr.mxu0 %v5956_v43 }
  0x7d   :  { %4466 = vmatpush3.msra.mxu1 %v5992_v51  ;;  %838 = vmatpush1.msra.mxu0 %v5959_v44 }
  0x7e   :  { %4467 = vmatprep.subr.mxu1 %v7354_v0  ;;  %839 = vmatprep.subr.mxu0 %v5963_v45 }
  0x7f   :  { %4468 = vmatpush3.msra.mxu1 %v6000_v52  ;;  %840 = vmatpush1.msra.mxu0 %v5970_v47 }
  0x80   :  { %4469 = vmatprep.subr.mxu1 %v7354_v0  ;;  %873 = vmatprep.mubr.f32.mxu0 %v7354_v0 }
  0x81   :  { %4470 = vmatpush3.msra.mxu1 %v6006_v53  ;;  %4483 = vmatprep.mubr.msk.f32.mxu1 %vm5717_vm2, %v7354_v0 }
  0x82   :  { %4471 = vmatprep.subr.mxu1 %v7354_v0  ;;  %1230 = vmatprep.subr.mxu0 %v5808_v4  ;;  %v106_v4 = vlaneseq }
  0x83   :  { %4472 = vmatpush3.msra.mxu1 %v6013_v54 }
  0x84   :  { %4473 = vmatprep.subr.mxu1 %v7354_v0  ;;  %v6108_v17 = vshrl.u32 %v106_v4, 7 }
  0x85   :  { %4474 = vmatpush3.msra.mxu1 %v6019_v55 }
  0x86   :  { %4475 = vmatprep.subr.mxu1 %v7354_v0  ;;  %v108_v30 = vsub.s32 0, %v6108_v17  ;;  %v112_v36 = vsub.s32 1, %v6108_v17 }
  0x87   :  { %4476 = vmatpush3.msra.mxu1 %v6026_v56 }
  0x88   :  { %4477 = vmatprep.subr.mxu1 %v7354_v0  ;;  %v109_v47 = vrot.slane %v6115_v42, %v108_v30  ;;  %v6119_v45 = vrot.slane %v6115_v42, %v112_v36 }
  0x89   :  { %4478 = vmatpush3.msra.mxu1 %v6032_v57 }
  0x8a   :  { %4479 = vmatprep.subr.mxu1 %v7354_v0 }
  0x8b   :  { %4480 = vmatpush3.msra.mxu1 %v6038_v58 }
  0x8c   :  { %4481 = vmatprep.subr.mxu1 %v7354_v0 }
  0x8d   :  { %4482 = vmatpush3.msra.mxu1 %v6044_v59 }
  0x8e   :  { %4486 = vmatprep.subr.mxu1 %v7354_v0 }
  0xf9   :  { %v222_v60 = vpop.f32.mrf.mxu0 }
  0xfa   :  { %v6121_v44 = vadd.f32 %v222_v60, %v109_v47 }
  0xfb   :  { %v224_v61 = vpop.f32.mrf.mxu0 }
  0xfc   :  { %7527 = vst [vmem:[#allocation39_spill] sm:$0xff] %v6121_v44  ;;  %v6124_v43 = vadd.f32 %v224_v61, %v6119_v45 }
  0xfd   :  { %v228_v62 = vpop.f32.mrf.mxu0 }
  0xfe   :  { %v6126_v57 = vadd.f32 %v228_v62, %v109_v47 }
  0xff   :  { %v230_v63 = vpop.f32.mrf.mxu0 }
 0x100   :  { %7528 = vst [vmem:[#allocation40_spill] sm:$0xff] %v6126_v57  ;;  %v6128_v41 = vpop.f32.mrf.mxu1  ;;  %v6131_v39 = vadd.f32 %v230_v63, %v6119_v45 }
 0x101   :  { %v234_v1 = vpop.f32.mrf.mxu0 }
 0x102   :  { %v6133_v56 = vadd.f32 %v234_v1, %v109_v47  ;;  %v6160_v54 = vpop.f32.mrf.mxu1 }
 0x103   :  { %v236_v2 = vpop.f32.mrf.mxu0 }
 0x104   :  { %v6136_v30 = vadd.f32 %v236_v2, %v6119_v45 }
 0x105   :  { %v240_v3 = vpop.f32.mrf.mxu0 }
 0x106   :  { %v6138_v36 = vadd.f32 %v240_v3, %v109_v47 }
 0x107   :  { %v242_v8 = vpop.f32.mrf.mxu0 }
 0x108   :  { %7529 = vst [vmem:[#allocation41_spill] sm:$0xff] %v6138_v36  ;;  %v6141_v60 = vadd.f32 %v242_v8, %v6119_v45 }
 0x109   :  { %v246_v13 = vpop.f32.mrf.mxu0 }
 0x10a   :  { %v6143_v61 = vadd.f32 %v246_v13, %v109_v47 }
 0x10b   :  { %v248_v19 = vpop.f32.mrf.mxu0 }
 0x10c   :  { %7530 = vst [vmem:[#allocation42_spill] sm:$0xff] %v6143_v61  ;;  %v6146_v62 = vadd.f32 %v248_v19, %v6119_v45 }
 0x10d   :  { %v252_v24 = vpop.f32.mrf.mxu0 }
 0x10e   :  { %7531 = vst [vmem:[#allocation43_spill] sm:$0xff] %v6146_v62  ;;  %v6148_v37 = vadd.f32 %v252_v24, %v109_v47 }
 0x10f   :  { %v254_v0 = vpop.f32.mrf.mxu0 }
 0x110   :  { %7532 = vst [vmem:[#allocation44_spill] sm:$0xff] %v6148_v37  ;;  %v6151_v63 = vadd.f32 %v254_v0, %v6119_v45 }
 0x111   :  { %v258_v59 = vpop.f32.mrf.mxu0 }
 0x112   :  { %7533 = vst [vmem:[#allocation45_spill] sm:$0xff] %v6151_v63  ;;  %v6153_v1 = vadd.f32 %v258_v59, %v109_v47 }
 0x113   :  { %v260_v4 = vpop.f32.mrf.mxu0 }
 0x114   :  { %v6156_v2 = vadd.f32 %v260_v4, %v6119_v45 }
 0x115   :  { %v264_v58 = vpop.f32.mrf.mxu0 }
 0x116   :  { %7534 = vst [vmem:[#allocation46_spill] sm:$0xff] %v6156_v2  ;;  %v6158_v3 = vadd.f32 %v264_v58, %v109_v47 }
 0x117   :  { %v266_v38 = vpop.f32.mrf.mxu0 }
 0x119   :  { %v495_v55 = vpop.f32.mrf.mxu0 }
 0x11a   :  { %v571_v8 = vrot.slane %v495_v55, 1  ;;  %v572_v35 = vrot.slane %v495_v55, 2  ;;  %v573_v13 = vrot.slane %v495_v55, 3  ;;  %v574_v33 = vrot.slane %v495_v55, 4  ;;  %v6167_v53 = vpop.f32.mrf.mxu1 }
 0x11b   :  { %v575_v19 = vrot.slane %v495_v55, 5  ;;  %v576_v24 = vrot.slane %v495_v55, 6  ;;  %v577_v32 = vrot.slane %v495_v55, 7  ;;  %v586_v0 = vadd.f32 %v495_v55, %v6121_v44  ;;  %v497_v31 = vpop.f32.mrf.mxu0 }
 0x11c   :  { %v587_v59 = vadd.f32 %v571_v8, %v6126_v57  ;;  %v588_v4 = vadd.f32 %v572_v35, %v6133_v56  ;;  %v589_v47 = vadd.f32 %v573_v13, %v6138_v36  ;;  %v590_v58 = vadd.f32 %v574_v33, %v6143_v61  ;;  %v6173_v57 = vpop.f32.mrf.mxu1 }
 0x11d   :  { %v591_v29 = vadd.f32 %v575_v19, %v6148_v37  ;;  %v592_v27 = vadd.f32 %v576_v24, %v6153_v1  ;;  %v593_v52 = vadd.f32 %v577_v32, %v6158_v3  ;;  %v4075_v26 = vmul.f32 -1.442695, %v586_v0 }
 0x11e   :  { %v4076_v25 = vmul.f32 -1.442695, %v587_v59  ;;  %v4077_v55 = vmul.f32 -1.442695, %v588_v4  ;;  %v4078_v44 = vmul.f32 -1.442695, %v589_v47  ;;  %v658_v8 = vadd.f32 %v497_v31, %v6124_v43  ;;  %v6175_v37 = vpop.f32.mrf.mxu1 }
 0x11f   :  { %4813 = vpow2.f32 %v4075_v26  ;;  %v4079_v35 = vmul.f32 -1.442695, %v590_v58  ;;  %v4080_v13 = vmul.f32 -1.442695, %v591_v29  ;;  %v4081_v33 = vmul.f32 -1.442695, %v592_v27 }
 0x120   :  { %4815 = vpow2.f32 %v4076_v25  ;;  %v4082_v61 = vmul.f32 -1.442695, %v593_v52  ;;  %v643_v36 = vrot.slane %v497_v31, 1  ;;  %v644_v19 = vrot.slane %v497_v31, 2 }
 0x121   :  { %4817 = vpow2.f32 %v4077_v55  ;;  %v645_v32 = vrot.slane %v497_v31, 3  ;;  %v646_v24 = vrot.slane %v497_v31, 4  ;;  %v647_v0 = vrot.slane %v497_v31, 5 }
 0x122   :  { %4819 = vpow2.f32 %v4078_v44  ;;  %v648_v59 = vrot.slane %v497_v31, 6  ;;  %v649_v4 = vrot.slane %v497_v31, 7  ;;  %v659_v47 = vadd.f32 %v643_v36, %v6131_v39  ;;  %v6186_v44 = vpop.f32.mrf.mxu1 }
 0x123   :  { %4821 = vpow2.f32 %v4079_v35  ;;  %v660_v26 = vadd.f32 %v644_v19, %v6136_v30  ;;  %v661_v27 = vadd.f32 %v645_v32, %v6141_v60  ;;  %v662_v25 = vadd.f32 %v646_v24, %v6146_v62 }
 0x124   :  { %v6182_v29 = vadd.f32 %v266_v38, %v6119_v45  ;;  %4823 = vpow2.f32 %v4080_v13  ;;  %v663_v52 = vadd.f32 %v647_v0, %v6151_v63  ;;  %v664_v58 = vadd.f32 %v648_v59, %v6156_v2  ;;  %v6189_v45 = vpop.f32.mrf.mxu1 }
 0x125   :  { %4825 = vpow2.f32 %v4081_v33  ;;  %v4083_v31 = vmul.f32 -1.442695, %v658_v8  ;;  %v4084_v36 = vmul.f32 -1.442695, %v659_v47  ;;  %v4085_v55 = vmul.f32 -1.442695, %v660_v26 }
 0x126   :  { %7535 = vst [vmem:[#allocation47_spill] sm:$0xff] %v6182_v29  ;;  %4827 = vpow2.f32 %v4082_v61  ;;  %v665_v35 = vadd.f32 %v649_v4, %v6182_v29  ;;  %v4086_v19 = vmul.f32 -1.442695, %v661_v27  ;;  %v4087_v32 = vmul.f32 -1.442695, %v662_v25  ;;  %v6191_v8 = vpop.f32.mrf.mxu1 }
 0x127   :  { %4829 = vpow2.f32 %v4083_v31  ;;  %v4088_v38 = vmul.f32 -1.442695, %v663_v52  ;;  %v4089_v13 = vmul.f32 -1.442695, %v664_v58 }
 0x128   :  { %4831 = vpow2.f32 %v4084_v36  ;;  %v4090_v24 = vmul.f32 -1.442695, %v665_v35 }
 0x129   :  { %4833 = vpow2.f32 %v4085_v55 }
 0x12a   :  { %4835 = vpow2.f32 %v4086_v19 }
 0x12b   :  { %4837 = vpow2.f32 %v4087_v32  ;;  %v116_v32 = vsub.s32 2, %v6108_v17 }
 0x12c   :  { %v4814_v0 = vpop.eup %4813  ;;  %4839 = vpow2.f32 %v4088_v38 }
 0x12d   :  { %v4816_v33 = vpop.eup %4815  ;;  %v618_v61 = vadd.f32 1.0, %v4814_v0  ;;  %4841 = vpow2.f32 %v4089_v13  ;;  %v6197_v13 = vld [vmem:[%s7346_s4] ss:$0 sm:$0xff] }
 0x12e   :  { %v4818_v59 = vpop.eup %4817  ;;  %v619_v4 = vadd.f32 1.0, %v4816_v33  ;;  %4843 = vpow2.f32 %v4090_v24  ;;  %v566_v52 = vpop.f32.mrf.mxu1  ;;  %7536 = vst [vmem:[#allocation48_spill] sm:$0xff] %v6197_v13 }
 0x12f   :  { %v4820_v47 = vpop.eup %4819  ;;  %v620_v26 = vadd.f32 1.0, %v4818_v59  ;;  %4845 = vrcp.f32 %v618_v61  ;;  %v714_v59 = vadd.f32 %v6197_v13, %v566_v52 }
 0x130   :  { %v4822_v27 = vpop.eup %4821  ;;  %v621_v25 = vadd.f32 1.0, %v4820_v47  ;;  %4847 = vrcp.f32 %v619_v4  ;;  %v4450_v35 = vpop.f32.mrf.mxu1  ;;  %v117_v47 = vrot.slane %v6115_v42, %v116_v32 }
 0x131   :  { %v4824_v58 = vpop.eup %4823  ;;  %v622_v31 = vadd.f32 1.0, %v4822_v27  ;;  %4849 = vrcp.f32 %v620_v26  ;;  %v716_v35 = vrot.slane %v714_v59, 1  ;;  %v718_v32 = vrot.slane %v714_v59, 3 }
 0x132   :  { %v4826_v36 = vpop.eup %4825  ;;  %v623_v55 = vadd.f32 1.0, %v4824_v58  ;;  %4851 = vrcp.f32 %v621_v25  ;;  %v6205_v52 = vadd.f32 %v6160_v54, %v117_v47  ;;  %v722_v62 = vrot.slane %v714_v59, 7 }
 0x133   :  { %v4828_v19 = vpop.eup %4827  ;;  %v624_v38 = vadd.f32 1.0, %v4826_v36  ;;  %4853 = vrcp.f32 %v622_v31 }
 0x134   :  { %v4830_v24 = vpop.eup %4829  ;;  %v625_v0 = vadd.f32 1.0, %v4828_v19  ;;  %4855 = vrcp.f32 %v623_v55  ;;  %v6202_v55 = vadd.f32 %v6128_v41, %v117_v47  ;;  %v6211_v41 = vadd.f32 %v6173_v57, %v117_v47 }
 0x135   :  { %v4832_v33 = vpop.eup %4831  ;;  %4857 = vrcp.f32 %v624_v38  ;;  %v690_v17 = vadd.f32 1.0, %v4830_v24  ;;  %v717_v38 = vrot.slane %v714_v59, 2 }
 0x136   :  { %v4834_v61 = vpop.eup %4833  ;;  %4859 = vrcp.f32 %v625_v0  ;;  %v691_v27 = vadd.f32 1.0, %v4832_v33  ;;  %v6208_v33 = vadd.f32 %v6167_v53, %v117_v47  ;;  %7538 = vst [vmem:[#allocation50_spill] sm:$0xff] %v6211_v41 }
 0x137   :  { %v4836_v4 = vpop.eup %4835  ;;  %v692_v58 = vadd.f32 1.0, %v4834_v61  ;;  %4861 = vrcp.f32 %v690_v17  ;;  %v719_v61 = vrot.slane %v714_v59, 4  ;;  %v720_v17 = vrot.slane %v714_v59, 5 }
 0x138   :  { %v4838_v26 = vpop.eup %4837  ;;  %v693_v36 = vadd.f32 1.0, %v4836_v4  ;;  %4863 = vrcp.f32 %v691_v27  ;;  %7537 = vst [vmem:[#allocation49_spill] sm:$0xff] %v6208_v33 }
 0x139   :  { %v4840_v25 = vpop.eup %4839  ;;  %v694_v19 = vadd.f32 1.0, %v4838_v26  ;;  %4865 = vrcp.f32 %v692_v58 }
 0x13a   :  { %v4842_v31 = vpop.eup %4841  ;;  %v695_v42 = vadd.f32 1.0, %v4840_v25  ;;  %4867 = vrcp.f32 %v693_v36  ;;  %v721_v25 = vrot.slane %v714_v59, 6  ;;  %v6216_v36 = vadd.f32 %v6186_v44, %v117_v47 }
 0x13b   :  { %v4844_v29 = vpop.eup %4843  ;;  %4869 = vrcp.f32 %v694_v19 }
 0x13c   :  { %v4846_v0 = vpop.eup %4845  ;;  %4871 = vrcp.f32 %v695_v42  ;;  %7539 = vst [vmem:[#allocation51_spill] sm:$0xff] %v6216_v36  ;;  %v6224_v42 = vadd.f32 %v6191_v8, %v117_v47 }
 0x13d   :  { %v4848_v24 = vpop.eup %4847  ;;  %v731_v4 = vmul.f32 %v4846_v0, %v714_v59 }
 0x13e   :  { %v4850_v13 = vpop.eup %4849  ;;  %v732_v26 = vmul.f32 %v4848_v24, %v716_v35  ;;  %7541 = vst [vmem:[#allocation53_spill] sm:$0xff] %v6224_v42 }
 0x13f   :  { %v4852_v2 = vpop.eup %4851  ;;  %v733_v54 = vmul.f32 %v4850_v13, %v717_v38  ;;  %v739_v27 = vadd.f32 %v731_v4, %v6205_v52  ;;  %v6220_v13 = vadd.f32 %v6175_v37, %v117_v47  ;;  %v696_v37 = vadd.f32 1.0, %v4842_v31 }
 0x140   :  { %v4854_v63 = vpop.eup %4853  ;;  %v734_v58 = vmul.f32 %v4852_v2, %v718_v32  ;;  %v740_v53 = vadd.f32 %v732_v26, %v6202_v55 }
 0x141   :  { %v4856_v0 = vpop.eup %4855  ;;  %4873 = vtanh.f32 %v739_v27  ;;  %v735_v57 = vmul.f32 %v4854_v63, %v719_v61  ;;  %v741_v35 = vadd.f32 %v733_v54, %v6211_v41  ;;  %7540 = vst [vmem:[#allocation52_spill] sm:$0xff] %v6220_v13  ;;  %v6228_v63 = vadd.f32 %v6189_v45, %v117_v47 }
 0x142   :  { %v4858_v24 = vpop.eup %4857  ;;  %4875 = vtanh.f32 %v740_v53  ;;  %v736_v19 = vmul.f32 %v4856_v0, %v720_v17  ;;  %v742_v38 = vadd.f32 %v734_v58, %v6208_v33  ;;  %v697_v17 = vadd.f32 1.0, %v4844_v29 }
 0x143   :  { %v4860_v2 = vpop.eup %4859  ;;  %v737_v59 = vmul.f32 %v4858_v24, %v721_v25  ;;  %v743_v44 = vadd.f32 %v735_v57, %v6216_v36  ;;  %4877 = vtanh.f32 %v741_v35  ;;  %7542 = vst [vmem:[#allocation54_spill] sm:$0xff] %v6228_v63 }
 0x144   :  { %v738_v32 = vmul.f32 %v4860_v2, %v722_v62  ;;  %v744_v61 = vadd.f32 %v736_v19, %v6220_v13  ;;  %4879 = vtanh.f32 %v742_v38  ;;  %v4862_v8 = vpop.eup %4861 }
 0x145   :  { %v745_v4 = vadd.f32 %v737_v59, %v6224_v42  ;;  %4881 = vtanh.f32 %v743_v44  ;;  %v4864_v54 = vpop.eup %4863 }
 0x146   :  { %v746_v26 = vadd.f32 %v738_v32, %v6228_v63  ;;  %4883 = vtanh.f32 %v744_v61  ;;  %v4866_v27 = vpop.eup %4865 }
 0x147   :  { %4885 = vtanh.f32 %v745_v4  ;;  %v4868_v45 = vpop.eup %4867 }
 0x148   :  { %4887 = vtanh.f32 %v746_v26  ;;  %v4870_v62 = vpop.eup %4869 }
 0x149   :  { %4889 = vrcp.f32 %v696_v37  ;;  %v4872_v47 = vpop.eup %4871 }
 0x14a   :  { %4891 = vrcp.f32 %v697_v17 }
 0x14e   :  { %v4874_v25 = vpop.eup %4873 }
 0x14f   :  { %v4876_v58 = vpop.eup %4875  ;;  %v755_v31 = vsub.f32 0.0, %v4874_v25 }
 0x150   :  { %v4878_v53 = vpop.eup %4877  ;;  %v756_v0 = vsub.f32 0.0, %v4876_v58 }
 0x151   :  { %v4880_v57 = vpop.eup %4879  ;;  %v757_v29 = vsub.f32 0.0, %v4878_v53  ;;  %v763_v35 = vmul.f32 %v4862_v8, %v755_v31 }
 0x152   :  { %v4882_v24 = vpop.eup %4881  ;;  %v758_v19 = vsub.f32 0.0, %v4880_v57  ;;  %v764_v38 = vmul.f32 %v4864_v54, %v756_v0 }
 0x153   :  { %v4884_v2 = vpop.eup %4883  ;;  %v759_v59 = vsub.f32 0.0, %v4882_v24  ;;  %v765_v44 = vmul.f32 %v4866_v27, %v757_v29  ;;  %v6235_v42 = vadd.f32 %v4874_v25, %v763_v35 }
 0x154   :  { %v4886_v32 = vpop.eup %4885  ;;  %v760_v61 = vsub.f32 0.0, %v4884_v2  ;;  %v766_v37 = vmul.f32 %v4868_v45, %v758_v19  ;;  %v6233_v4 = vadd.f32 %v4876_v58, %v764_v38 }
 0x155   :  { %v4888_v17 = vpop.eup %4887  ;;  %v761_v26 = vsub.f32 0.0, %v4886_v32  ;;  %v767_v63 = vmul.f32 %v4870_v62, %v759_v59  ;;  %v6237_v8 = vadd.f32 %v4878_v53, %v765_v44 }
 0x156   :  { %v4890_v31 = vpop.eup %4889  ;;  %v762_v54 = vsub.f32 0.0, %v4888_v17  ;;  %v768_v0 = vmul.f32 %v4872_v47, %v760_v61  ;;  %v6239_v13 = vadd.f32 %v4880_v57, %v766_v37  ;;  %v787_v27 = vrot.slane %v6233_v4, 7 }
 0x157   :  { %v4892_v29 = vpop.eup %4891  ;;  %v769_v36 = vmul.f32 %v4890_v31, %v761_v26  ;;  %v6242_v45 = vadd.f32 %v4882_v24, %v767_v63  ;;  %v790_v58 = vrot.slane %v6237_v8, 6  ;;  %v7543_v37 = vmov 0.0   ;;  %v6329_v26 = vld [vmem:[#allocation2 + $0x170] sm:$0xff] }
 0x158   :  { %v770_v19 = vmul.f32 %v4892_v29, %v762_v54  ;;  %v6245_v62 = vadd.f32 %v4884_v2, %v768_v0  ;;  %v789_v25 = vsel %vm788_vm3, %v787_v27, %v6235_v42  ;;  %v793_v53 = vrot.slane %v6239_v13, 5 }
 0x159   :  { %v6250_v47 = vadd.f32 %v4886_v32, %v769_v36  ;;  %v792_v57 = vsel %vm791_vm4, %v790_v58, %v789_v25  ;;  %v796_v35 = vrot.slane %v6242_v45, 4 }
 0x15a   :  { %v6254_v63 = vadd.f32 %v4888_v17, %v770_v19  ;;  %v795_v24 = vsel %vm794_vm5, %v793_v53, %v792_v57  ;;  %v799_v38 = vrot.slane %v6245_v62, 3  ;;  %v7567_v17 = vld [vmem:[#allocation38_spill] sm:$0xff]  ;;  %v7568_v57 = vld [vmem:[#allocation40_spill] sm:$0xff] }
 0x15b   :  { %v798_v2 = vsel %vm797_vm6, %v796_v35, %v795_v24  ;;  %v802_v59 = vrot.slane %v6250_v47, 2 }
 0x15c   :  { %v801_v36 = vsel %vm800_vm7, %v799_v38, %v798_v2  ;;  %v805_v44 = vrot.slane %v6254_v63, 1  ;;  %v7569_v38 = vld [vmem:[#allocation39_spill] sm:$0xff] }
 0x15d   :  { %v804_v32 = vsel %vm803_vm8, %v802_v59, %v801_v36  ;;  %v7570_v36 = vld [vmem:[#allocation41_spill] sm:$0xff] }
 0x15e   :  { %v807_v61 = vsel %vm806_vm9, %v805_v44, %v804_v32  ;;  %v7571_v32 = vld [vmem:[#allocation42_spill] sm:$0xff] }
 0x15f   :  { %874 = vmatmul.mubr.f32.vlgmr.msra.gmra.mxu0 %v807_v61  ;;  %4484 = vmatmul.mubr.f32.vlgmr.msra.gmra.mxu1 %v807_v61 }
 0x160   :  { %1231 = vmatpush1.msra.mxu0 %v5811_v5  ;;  %4487 = vmatpush3.msra.mxu1 %v5899_v28  ;;  %v7544_v5 = vld [vmem:[#allocation15_spill] sm:$0xff]  ;;  %v7559_v28 = vld [vmem:[#allocation25_spill] sm:$0xff] }
 0x161   :  { %1232 = vmatprep.subr.mxu0 %v5814_v6  ;;  %4488 = vmatprep.subr.mxu1 %v7543_v37  ;;  %v7545_v6 = vld [vmem:[#allocation16_spill] sm:$0xff] }
 0x162   :  { %1233 = vmatpush1.msra.mxu0 %v5818_v7  ;;  %4489 = vmatpush3.msra.mxu1 %v5923_v34  ;;  %v7546_v7 = vld [vmem:[#allocation31_spill] sm:$0xff]  ;;  %v7560_v34 = vld [vmem:[#allocation26_spill] sm:$0xff] }
 0x163   :  { %1234 = vmatprep.subr.mxu0 %v5825_v9  ;;  %4490 = vmatprep.subr.mxu1 %v7543_v37  ;;  %v7547_v9 = vld [vmem:[#allocation17_spill] sm:$0xff] }
 0x164   :  { %1235 = vmatpush1.msra.mxu0 %v5828_v10  ;;  %4491 = vmatpush3.msra.mxu1 %v5945_v40  ;;  %v7548_v10 = vld [vmem:[#allocation18_spill] sm:$0xff]  ;;  %v7561_v40 = vld [vmem:[#allocation36_spill] sm:$0xff] }
 0x165   :  { %1236 = vmatprep.subr.mxu0 %v5831_v11  ;;  %4492 = vmatprep.subr.mxu1 %v7543_v37  ;;  %v7549_v11 = vld [vmem:[#allocation32_spill] sm:$0xff] }
 0x166   :  { %1237 = vmatpush1.msra.mxu0 %v5835_v12  ;;  %4493 = vmatpush3.msra.mxu1 %v5966_v46  ;;  %v7550_v12 = vld [vmem:[#allocation19_spill] sm:$0xff] }
 0x167   :  { %1238 = vmatprep.subr.mxu0 %v5844_v14  ;;  %4494 = vmatprep.subr.mxu1 %v7543_v37  ;;  %v7551_v14 = vld [vmem:[#allocation20_spill] sm:$0xff]  ;;  %v7562_v46 = vld [vmem:[#allocation27_spill] sm:$0xff] }
 0x168   :  { %1239 = vmatpush1.msra.mxu0 %v5847_v15  ;;  %4495 = vmatpush3.msra.mxu1 %v5974_v48  ;;  %v7552_v15 = vld [vmem:[#allocation33_spill] sm:$0xff]  ;;  %v7563_v48 = vld [vmem:[#allocation28_spill] sm:$0xff] }
 0x169   :  { %1240 = vmatprep.subr.mxu0 %v5850_v16  ;;  %4496 = vmatprep.subr.mxu1 %v7543_v37  ;;  %v7553_v16 = vld [vmem:[#allocation21_spill] sm:$0xff] }
 0x16a   :  { %1241 = vmatpush1.msra.mxu0 %v5858_v18  ;;  %4497 = vmatpush3.msra.mxu1 %v5980_v49  ;;  %v7554_v18 = vld [vmem:[#allocation22_spill] sm:$0xff]  ;;  %v7564_v49 = vld [vmem:[#allocation37_spill] sm:$0xff] }
 0x16b   :  { %1242 = vmatprep.subr.mxu0 %v5867_v20  ;;  %4498 = vmatprep.subr.mxu1 %v7543_v37  ;;  %v7555_v20 = vld [vmem:[#allocation34_spill] sm:$0xff] }
 0x16c   :  { %1243 = vmatpush1.msra.mxu0 %v5870_v21  ;;  %4499 = vmatpush3.msra.mxu1 %v5985_v50  ;;  %v7556_v21 = vld [vmem:[#allocation23_spill] sm:$0xff]  ;;  %v7565_v50 = vld [vmem:[#allocation29_spill] sm:$0xff] }
 0x16d   :  { %1244 = vmatprep.subr.mxu0 %v5874_v22  ;;  %4500 = vmatprep.subr.mxu1 %v7543_v37  ;;  %v7557_v22 = vld [vmem:[#allocation24_spill] sm:$0xff] }
 0x16e   :  { %1245 = vmatpush1.msra.mxu0 %v5880_v23  ;;  %4501 = vmatpush3.msra.mxu1 %v5992_v51  ;;  %v7558_v23 = vld [vmem:[#allocation35_spill] sm:$0xff]  ;;  %v7566_v51 = vld [vmem:[#allocation30_spill] sm:$0xff] }
 0x16f   :  { %1246 = vmatprep.subr.mxu0 %v7544_v5  ;;  %4502 = vmatprep.subr.mxu1 %v7543_v37  ;;  %v7572_v5 = vld [vmem:[#allocation44_spill] sm:$0xff] }
 0x170   :  { %1247 = vmatpush1.msra.mxu0 %v7545_v6  ;;  %4503 = vmatpush3.msra.mxu1 %v7546_v7 }
 0x171   :  { %1248 = vmatprep.subr.mxu0 %v7547_v9  ;;  %4504 = vmatprep.subr.mxu1 %v7543_v37 }
 0x172   :  { %1249 = vmatpush1.msra.mxu0 %v7548_v10  ;;  %4505 = vmatpush3.msra.mxu1 %v7549_v11 }
 0x173   :  { %1250 = vmatprep.subr.mxu0 %v7550_v12  ;;  %4506 = vmatprep.subr.mxu1 %v7543_v37 }
 0x174   :  { %1251 = vmatpush1.msra.mxu0 %v7551_v14  ;;  %4507 = vmatpush3.msra.mxu1 %v7552_v15 }
 0x175   :  { %1252 = vmatprep.subr.mxu0 %v7553_v16  ;;  %4508 = vmatprep.subr.mxu1 %v7543_v37 }
 0x176   :  { %1253 = vmatpush1.msra.mxu0 %v7554_v18  ;;  %4509 = vmatpush3.msra.mxu1 %v7555_v20 }
 0x177   :  { %1254 = vmatprep.subr.mxu0 %v7556_v21  ;;  %4510 = vmatprep.subr.mxu1 %v7543_v37 }
 0x178   :  { %1255 = vmatpush1.msra.mxu0 %v7557_v22  ;;  %4511 = vmatpush3.msra.mxu1 %v7558_v23 }
 0x179   :  { %1256 = vmatprep.subr.mxu0 %v7559_v28  ;;  %4512 = vmatprep.subr.mxu1 %v7543_v37 }
 0x17a   :  { %1257 = vmatpush1.msra.mxu0 %v7560_v34  ;;  %4513 = vmatpush3.msra.mxu1 %v7561_v40 }
 0x17b   :  { %1258 = vmatprep.subr.mxu0 %v7562_v46  ;;  %4514 = vmatprep.subr.mxu1 %v7543_v37 }
 0x17c   :  { %1259 = vmatpush1.msra.mxu0 %v7563_v48  ;;  %4515 = vmatpush3.msra.mxu1 %v7564_v49 }
 0x17d   :  { %1260 = vmatprep.subr.mxu0 %v7565_v50  ;;  %4516 = vmatprep.subr.mxu1 %v7543_v37 }
 0x17e   :  { %1261 = vmatpush1.msra.mxu0 %v7566_v51  ;;  %1294 = vmatprep.mubr.f32.mxu0 %v7543_v37 }
 0x17f   :  { %4517 = vmatpush3.msra.mxu1 %v7567_v17  ;;  %4518 = vmatprep.mubr.msk.f32.mxu1 %vm5717_vm2, %v7543_v37 }
 0x180   :  { %1651 = vmatprep.subr.mxu0 %v6329_v26  ;;  %4521 = vmatprep.subr.mxu1 %v7543_v37 }
 0x21f   :  { %v875_v31 = vpop.f32.mrf.mxu0  ;;  %v6333_v54 = vpop.f32.mrf.mxu1 }
 0x220   :  { %v951_v0 = vrot.slane %v875_v31, 7  ;;  %v952_v27 = vrot.slane %v875_v31, 1  ;;  %v953_v29 = vrot.slane %v875_v31, 2  ;;  %v954_v58 = vrot.slane %v875_v31, 3 }
 0x221   :  { %v955_v19 = vrot.slane %v875_v31, 4  ;;  %v956_v25 = vrot.slane %v875_v31, 5  ;;  %v957_v53 = vrot.slane %v875_v31, 6  ;;  %v967_v35 = vadd.f32 %v875_v31, %v7568_v57  ;;  %v4485_v24 = vpop.f32.mrf.mxu1  ;;  %v877_v16 = vpop.f32.mrf.mxu0 }
 0x222   :  { %v966_v2 = vadd.f32 %v951_v0, %v7569_v38  ;;  %v968_v59 = vadd.f32 %v952_v27, %v6133_v56  ;;  %v969_v44 = vadd.f32 %v953_v29, %v7570_v36  ;;  %v970_v61 = vadd.f32 %v954_v58, %v7571_v32 }
 0x223   :  { %v971_v6 = vadd.f32 %v955_v19, %v7572_v5  ;;  %v972_v7 = vadd.f32 %v956_v25, %v6153_v1  ;;  %v973_v9 = vadd.f32 %v957_v53, %v6158_v3  ;;  %v4092_v10 = vmul.f32 -1.442695, %v967_v35 }
 0x224   :  { %v4091_v11 = vmul.f32 -1.442695, %v966_v2  ;;  %v4093_v12 = vmul.f32 -1.442695, %v968_v59  ;;  %v4094_v14 = vmul.f32 -1.442695, %v969_v44  ;;  %v1039_v40 = vadd.f32 %v877_v16, %v6131_v39 }
 0x225   :  { %4893 = vpow2.f32 %v4092_v10  ;;  %v4095_v15 = vmul.f32 -1.442695, %v970_v61  ;;  %v4096_v18 = vmul.f32 -1.442695, %v971_v6  ;;  %v4097_v20 = vmul.f32 -1.442695, %v972_v7 }
 0x226   :  { %4895 = vpow2.f32 %v4091_v11  ;;  %v4098_v21 = vmul.f32 -1.442695, %v973_v9  ;;  %v1023_v22 = vrot.slane %v877_v16, 7  ;;  %v1024_v23 = vrot.slane %v877_v16, 1  ;;  %v7573_v2 = vld [vmem:[#allocation43_spill] sm:$0xff]  ;;  %v7574_v7 = vld [vmem:[#allocation45_spill] sm:$0xff] }
 0x227   :  { %4897 = vpow2.f32 %v4093_v12  ;;  %v1025_v28 = vrot.slane %v877_v16, 2  ;;  %v4100_v50 = vmul.f32 -1.442695, %v1039_v40  ;;  %v1026_v31 = vrot.slane %v877_v16, 3 }
 0x228   :  { %4899 = vpow2.f32 %v4094_v14  ;;  %v1038_v34 = vadd.f32 %v1023_v22, %v6124_v43  ;;  %v1040_v46 = vadd.f32 %v1024_v23, %v6136_v30  ;;  %v1027_v27 = vrot.slane %v877_v16, 4 }
 0x229   :  { %4901 = vpow2.f32 %v4095_v15  ;;  %v1041_v48 = vadd.f32 %v1025_v28, %v6141_v60  ;;  %v1028_v24 = vrot.slane %v877_v16, 5  ;;  %v1042_v59 = vadd.f32 %v1026_v31, %v7573_v2  ;;  %v7576_v28 = vld [vmem:[#allocation47_spill] sm:$0xff] }
 0x22a   :  { %4903 = vpow2.f32 %v4096_v18  ;;  %v4099_v49 = vmul.f32 -1.442695, %v1038_v34  ;;  %v4101_v51 = vmul.f32 -1.442695, %v1040_v46  ;;  %v1029_v6 = vrot.slane %v877_v16, 6 }
 0x22b   :  { %4905 = vpow2.f32 %v4097_v20  ;;  %v4102_v17 = vmul.f32 -1.442695, %v1041_v48  ;;  %v1043_v9 = vadd.f32 %v1027_v27, %v7574_v7  ;;  %v7575_v20 = vld [vmem:[#allocation46_spill] sm:$0xff]  ;;  %v4103_v22 = vmul.f32 -1.442695, %v1042_v59  ;;  %v7577_v48 = vld [vmem:[#allocation48_spill] sm:$0xff] }
 0x22c   :  { %4907 = vpow2.f32 %v4098_v21  ;;  %v1044_v21 = vadd.f32 %v1028_v24, %v7575_v20  ;;  %v1045_v34 = vadd.f32 %v1029_v6, %v7576_v28 }
 0x22d   :  { %4909 = vpow2.f32 %v4099_v49  ;;  %v4104_v40 = vmul.f32 -1.442695, %v1043_v9  ;;  %v1094_v49 = vadd.f32 %v7577_v48, %v6333_v54 }
 0x22e   :  { %4911 = vpow2.f32 %v4100_v50  ;;  %v4105_v16 = vmul.f32 -1.442695, %v1044_v21  ;;  %v4106_v50 = vmul.f32 -1.442695, %v1045_v34 }
 0x22f   :  { %4913 = vpow2.f32 %v4101_v51  ;;  %v1098_v24 = vrot.slane %v1094_v49, 2 }
 0x230   :  { %4915 = vpow2.f32 %v4102_v17 }
 0x232   :  { %v4894_v0 = vpop.eup %4893 }
 0x233   :  { %v4896_v29 = vpop.eup %4895  ;;  %v999_v58 = vadd.f32 1.0, %v4894_v0 }
 0x234   :  { %v4898_v19 = vpop.eup %4897  ;;  %v998_v25 = vadd.f32 1.0, %v4896_v29  ;;  %v1096_v29 = vrot.slane %v1094_v49, 7 }
 0x235   :  { %v4900_v53 = vpop.eup %4899  ;;  %v1000_v35 = vadd.f32 1.0, %v4898_v19  ;;  %4917 = vrcp.f32 %v999_v58 }
 0x236   :  { %v4902_v44 = vpop.eup %4901  ;;  %v1001_v61 = vadd.f32 1.0, %v4900_v53  ;;  %4919 = vrcp.f32 %v998_v25  ;;  %v1097_v25 = vrot.slane %v1094_v49, 1 }
 0x237   :  { %v4904_v10 = vpop.eup %4903  ;;  %v1002_v11 = vadd.f32 1.0, %v4902_v44  ;;  %4921 = vrcp.f32 %v1000_v35 }
 0x238   :  { %v4906_v12 = vpop.eup %4905  ;;  %v1003_v14 = vadd.f32 1.0, %v4904_v10  ;;  %4923 = vrcp.f32 %v1001_v61  ;;  %v1099_v61 = vrot.slane %v1094_v49, 3  ;;  %v1100_v10 = vrot.slane %v1094_v49, 4 }
 0x239   :  { %v4908_v15 = vpop.eup %4907  ;;  %v1004_v18 = vadd.f32 1.0, %v4906_v12  ;;  %4925 = vrcp.f32 %v1002_v11 }
 0x23a   :  { %v1005_v23 = vadd.f32 1.0, %v4908_v15  ;;  %4927 = vrcp.f32 %v1003_v14  ;;  %v4910_v46 = vpop.eup %4909  ;;  %v1101_v15 = vrot.slane %v1094_v49, 5 }
 0x23b   :  { %4929 = vrcp.f32 %v1004_v18  ;;  %v4912_v51 = vpop.eup %4911  ;;  %v1070_v0 = vadd.f32 1.0, %v4910_v46 }
 0x23c   :  { %4931 = vrcp.f32 %v1005_v23  ;;  %v4914_v17 = vpop.eup %4913  ;;  %v1071_v58 = vadd.f32 1.0, %v4912_v51  ;;  %v1102_v23 = vrot.slane %v1094_v49, 6 }
 0x23d   :  { %4933 = vpow2.f32 %v4103_v22  ;;  %v4916_v31 = vpop.eup %4915  ;;  %v1072_v46 = vadd.f32 1.0, %v4914_v17 }
 0x23e   :  { %4935 = vpow2.f32 %v4104_v40 }
 0x23f   :  { %4937 = vpow2.f32 %v4105_v16 }
 0x240   :  { %4939 = vpow2.f32 %v4106_v50  ;;  %v7578_v50 = vld [vmem:[#allocation51_spill] sm:$0xff] }
 0x241   :  { %4941 = vrcp.f32 %v1070_v0 }
 0x242   :  { %v4918_v27 = vpop.eup %4917  ;;  %4943 = vrcp.f32 %v1071_v58  ;;  %v7579_v58 = vld [vmem:[#allocation52_spill] sm:$0xff] }
 0x243   :  { %v4920_v19 = vpop.eup %4919  ;;  %v1112_v53 = vmul.f32 %v4918_v27, %v1094_v49  ;;  %v1073_v27 = vadd.f32 1.0, %v4916_v31  ;;  %v7581_v49 = vld [vmem:[#allocation54_spill] sm:$0xff] }
 0x244   :  { %v4922_v35 = vpop.eup %4921  ;;  %v1111_v59 = vmul.f32 %v4920_v19, %v1096_v29 }
 0x245   :  { %v4924_v44 = vpop.eup %4923  ;;  %v1113_v54 = vmul.f32 %v4922_v35, %v1097_v25  ;;  %v1120_v6 = vadd.f32 %v1112_v53, %v6202_v55  ;;  %v7580_v53 = vld [vmem:[#allocation53_spill] sm:$0xff] }
 0x246   :  { %v4926_v9 = vpop.eup %4925  ;;  %v1114_v11 = vmul.f32 %v4924_v44, %v1098_v24  ;;  %v1119_v12 = vadd.f32 %v1111_v59, %v6205_v52 }
 0x247   :  { %v4928_v14 = vpop.eup %4927  ;;  %4945 = vtanh.f32 %v1120_v6  ;;  %v1115_v18 = vmul.f32 %v4926_v9, %v1099_v61  ;;  %v1121_v21 = vadd.f32 %v1113_v54, %v6211_v41 }
 0x248   :  { %v4930_v22 = vpop.eup %4929  ;;  %4947 = vtanh.f32 %v1119_v12  ;;  %v1116_v34 = vmul.f32 %v4928_v14, %v1100_v10  ;;  %v1122_v40 = vadd.f32 %v1114_v11, %v6208_v33 }
 0x249   :  { %v4932_v16 = vpop.eup %4931  ;;  %v1117_v48 = vmul.f32 %v4930_v22, %v1101_v15  ;;  %v1123_v51 = vadd.f32 %v1115_v18, %v7578_v50  ;;  %4949 = vtanh.f32 %v1121_v21 }
 0x24a   :  { %v4934_v0 = vpop.eup %4933  ;;  %v1118_v29 = vmul.f32 %v4932_v16, %v1102_v23  ;;  %v1124_v19 = vadd.f32 %v1116_v34, %v7579_v58  ;;  %4951 = vtanh.f32 %v1122_v40 }
 0x24b   :  { %v4936_v25 = vpop.eup %4935  ;;  %v1125_v35 = vadd.f32 %v1117_v48, %v7580_v53  ;;  %4953 = vtanh.f32 %v1123_v51  ;;  %v1074_v59 = vadd.f32 1.0, %v4934_v0 }
 0x24c   :  { %v1126_v24 = vadd.f32 %v1118_v29, %v7581_v49  ;;  %4955 = vtanh.f32 %v1124_v19  ;;  %v4938_v17 = vpop.eup %4937  ;;  %v1075_v44 = vadd.f32 1.0, %v4936_v25 }
 0x24d   :  { %4957 = vrcp.f32 %v1072_v46  ;;  %v4940_v61 = vpop.eup %4939  ;;  %v1076_v31 = vadd.f32 1.0, %v4938_v17 }
 0x24e   :  { %4959 = vrcp.f32 %v1073_v27  ;;  %v4942_v54 = vpop.eup %4941  ;;  %v1077_v6 = vadd.f32 1.0, %v4940_v61 }
 0x24f   :  { %4961 = vtanh.f32 %v1125_v35  ;;  %v4944_v9 = vpop.eup %4943 }
 0x250   :  { %4963 = vtanh.f32 %v1126_v24 }
 0x251   :  { %4965 = vrcp.f32 %v1074_v59 }
 0x252   :  { %4967 = vrcp.f32 %v1075_v44 }
 0x253   :  { %4969 = vrcp.f32 %v1076_v31 }
 0x254   :  { %v4946_v10 = vpop.eup %4945  ;;  %4971 = vrcp.f32 %v1077_v6 }
 0x255   :  { %v4948_v11 = vpop.eup %4947  ;;  %v1144_v12 = vrot.slane %v4946_v10, 1 }
 0x256   :  { %v4950_v14 = vpop.eup %4949  ;;  %v1143_v15 = vrot.slane %v4948_v11, 1 }
 0x257   :  { %v4952_v18 = vpop.eup %4951  ;;  %v1145_v21 = vrot.slane %v4950_v14, 1  ;;  %v1160_v22 = vsub.f32 %v6233_v4, %v1144_v12 }
 0x258   :  { %v4954_v23 = vpop.eup %4953  ;;  %v1146_v34 = vrot.slane %v4952_v18, 1  ;;  %v1159_v40 = vsub.f32 %v6235_v42, %v1143_v15 }
 0x259   :  { %v4956_v16 = vpop.eup %4955  ;;  %v1147_v46 = vrot.slane %v4954_v23, 1  ;;  %v1161_v48 = vsub.f32 %v6237_v8, %v1145_v21  ;;  %v1176_v51 = vrot.slane %v1160_v22, 7 }
 0x25a   :  { %v4958_v0 = vpop.eup %4957  ;;  %v1148_v27 = vrot.slane %v4956_v16, 1  ;;  %v1162_v29 = vsub.f32 %v6239_v13, %v1146_v34  ;;  %v1175_v19 = vrot.slane %v1159_v40, 7 }
 0x25b   :  { %v4960_v25 = vpop.eup %4959  ;;  %v1163_v35 = vsub.f32 %v6242_v45, %v1147_v46  ;;  %v1177_v24 = vrot.slane %v1161_v48, 7  ;;  %v1192_v59 = vmul.f32 %v4944_v9, %v1176_v51 }
 0x25c   :  { %v4962_v4 = vpop.eup %4961  ;;  %v1164_v17 = vsub.f32 %v6245_v62, %v1148_v27  ;;  %v1178_v44 = vrot.slane %v1162_v29, 7  ;;  %v1191_v42 = vmul.f32 %v4942_v54, %v1175_v19 }
 0x25d   :  { %v4964_v61 = vpop.eup %4963  ;;  %v1149_v31 = vrot.slane %v4962_v4, 1  ;;  %v1179_v6 = vrot.slane %v1163_v35, 7  ;;  %v1193_v8 = vmul.f32 %v4958_v0, %v1177_v24  ;;  %v6370_v9 = vadd.f32 %v4946_v10, %v1192_v59 }
 0x25e   :  { %v4966_v12 = vpop.eup %4965  ;;  %v1150_v15 = vrot.slane %v4964_v61, 1  ;;  %v1180_v21 = vrot.slane %v1164_v17, 7  ;;  %v1194_v22 = vmul.f32 %v4960_v25, %v1178_v44  ;;  %v6367_v13 = vadd.f32 %v4948_v11, %v1191_v42 }
 0x25f   :  { %v4968_v34 = vpop.eup %4967  ;;  %v1165_v45 = vsub.f32 %v6250_v47, %v1149_v31  ;;  %v1195_v40 = vmul.f32 %v4966_v12, %v1179_v6  ;;  %v6372_v46 = vadd.f32 %v4950_v14, %v1193_v8 }
 0x260   :  { %v1166_v62 = vsub.f32 %v6254_v63, %v1150_v15  ;;  %v1196_v54 = vmul.f32 %v4968_v34, %v1180_v21  ;;  %v6375_v48 = vadd.f32 %v4952_v18, %v1194_v22  ;;  %v1215_v51 = vrot.slane %v6367_v13, 1  ;;  %v4970_v29 = vpop.eup %4969  ;;  %v6400_v15 = vld [vmem:[#allocation2 + $0x168] sm:$0xff]  ;;  %v6410_v21 = vld [vmem:[#allocation2 + $0x150] sm:$0xff]  ;;  %v6413_v22 = vld [vmem:[#allocation2 + $0x160] sm:$0xff] }
 0x261   :  { %v1181_v0 = vrot.slane %v1165_v45, 7  ;;  %v6378_v27 = vadd.f32 %v4954_v23, %v1195_v40  ;;  %v1217_v11 = vrot.slane %v6372_v46, 7  ;;  %v4972_v63 = vpop.eup %4971  ;;  %v6416_v34 = vld [vmem:[#allocation2 + $0x140] sm:$0xff]  ;;  %v6420_v45 = vld [vmem:[#allocation2 + $0x138] sm:$0xff]  ;;  %v6423_v40 = vld [vmem:[#allocation2 + $0x148] sm:$0xff] }
 0x262   :  { %v1182_v19 = vrot.slane %v1166_v62, 7  ;;  %v6381_v47 = vadd.f32 %v4956_v16, %v1196_v54  ;;  %v1216_v10 = vsel %vm788_vm3, %v6370_v9, %v1215_v51  ;;  %v1219_v14 = vrot.slane %v6375_v48, 6  ;;  %v6426_v62 = vld [vmem:[#allocation2 + $0x128] sm:$0xff]  ;;  %v6430_v54 = vld [vmem:[#allocation2 + $0x120] sm:$0xff]  ;;  %v6433_v51 = vld [vmem:[#allocation2 + $0x130] sm:$0xff] }
 0x263   :  { %v1197_v25 = vmul.f32 %v4970_v29, %v1181_v0  ;;  %v1218_v18 = vsel %vm791_vm4, %v1217_v11, %v1216_v10  ;;  %v1221_v35 = vrot.slane %v6378_v27, 5  ;;  %7582 = vst [vmem:[#allocation15_spill] sm:$0xff] %v6430_v54  ;;  %7583 = vst [vmem:[#allocation16_spill] sm:$0xff] %v6433_v51  ;;  %v6436_v0 = vld [vmem:[#allocation2 + $0x110] sm:$0xff]  ;;  %v6440_v11 = vld [vmem:[#allocation2 + $0x108] sm:$0xff] }
 0x264   :  { %v1198_v24 = vmul.f32 %v4972_v63, %v1182_v19  ;;  %v1220_v23 = vsel %vm794_vm5, %v1219_v14, %v1218_v18  ;;  %v1223_v59 = vrot.slane %v6381_v47, 4  ;;  %7584 = vst [vmem:[#allocation31_spill] sm:$0xff] %v6436_v0  ;;  %7585 = vst [vmem:[#allocation17_spill] sm:$0xff] %v6440_v11  ;;  %v6443_v29 = vld [vmem:[#allocation2 + $0x118] sm:$0xff]  ;;  %v6450_v10 = vld [vmem:[#allocation2 + $0xf0] sm:$0xff] }
 0x265   :  { %v6390_v17 = vadd.f32 %v4962_v4, %v1197_v25  ;;  %v1222_v16 = vsel %vm797_vm6, %v1221_v35, %v1220_v23  ;;  %v6403_v4 = vld [vmem:[#allocation2 + $0x178] sm:$0xff]  ;;  %7586 = vst [vmem:[#allocation18_spill] sm:$0xff] %v6443_v29  ;;  %7588 = vst [vmem:[#allocation19_spill] sm:$0xff] %v6450_v10  ;;  %v6453_v14 = vld [vmem:[#allocation2 + $0x100] sm:$0xff] }
 0x266   :  { %v6393_v44 = vadd.f32 %v4964_v61, %v1198_v24  ;;  %v1224_v42 = vsel %vm800_vm7, %v1223_v59, %v1222_v16  ;;  %v6406_v61 = vld [vmem:[#allocation2 + $0x158] sm:$0xff]  ;;  %7589 = vst [vmem:[#allocation20_spill] sm:$0xff] %v6453_v14  ;;  %v6456_v63 = vld [vmem:[#allocation2 + $0xe0] sm:$0xff]  ;;  %v6463_v18 = vld [vmem:[#allocation2 + $0xe8] sm:$0xff] }
 0x267   :  { %v1225_v31 = vrot.slane %v6390_v17, 3  ;;  %v6446_v19 = vld [vmem:[#allocation2 + $0xf8] sm:$0xff]  ;;  %7590 = vst [vmem:[#allocation33_spill] sm:$0xff] %v6456_v63  ;;  %7592 = vst [vmem:[#allocation22_spill] sm:$0xff] %v6463_v18  ;;  %v6466_v35 = vld [vmem:[#allocation2 + $0xc8] sm:$0xff] }
 0x268   :  { %v1227_v6 = vrot.slane %v6393_v44, 2  ;;  %7587 = vst [vmem:[#allocation32_spill] sm:$0xff] %v6446_v19  ;;  %v6460_v25 = vld [vmem:[#allocation2 + $0xd8] sm:$0xff]  ;;  %7593 = vst [vmem:[#allocation34_spill] sm:$0xff] %v6466_v35  ;;  %v6470_v24 = vld [vmem:[#allocation2 + $0xc0] sm:$0xff] }
 0x269   :  { %v1226_v8 = vsel %vm803_vm8, %v1225_v31, %v1224_v42  ;;  %7591 = vst [vmem:[#allocation21_spill] sm:$0xff] %v6460_v25  ;;  %7594 = vst [vmem:[#allocation23_spill] sm:$0xff] %v6470_v24  ;;  %v6473_v23 = vld [vmem:[#allocation2 + $0xd0] sm:$0xff]  ;;  %v6480_v16 = vld [vmem:[#allocation2 + $0xa8] sm:$0xff] }
 0x26a   :  { %v1228_v12 = vsel %vm806_vm9, %v1227_v6, %v1226_v8  ;;  %7595 = vst [vmem:[#allocation24_spill] sm:$0xff] %v6473_v23  ;;  %v6476_v59 = vld [vmem:[#allocation2 + $0xb0] sm:$0xff]  ;;  %7597 = vst [vmem:[#allocation25_spill] sm:$0xff] %v6480_v16  ;;  %v6483_v42 = vld [vmem:[#allocation2 + $0xb8] sm:$0xff] }
 0x26b   :  { %1295 = vmatmul.mubr.f32.vlgmr.msra.gmra.mxu0 %v1228_v12  ;;  %4519 = vmatmul.mubr.f32.vlgmr.msra.gmra.mxu1 %v1228_v12  ;;  %7596 = vst [vmem:[#allocation35_spill] sm:$0xff] %v6476_v59  ;;  %7598 = vst [vmem:[#allocation26_spill] sm:$0xff] %v6483_v42  ;;  %v6486_v31 = vld [vmem:[#allocation2 + $0x98] sm:$0xff]  ;;  %v6490_v6 = vld [vmem:[#allocation2 + $0x90] sm:$0xff] }
 0x26c   :  { %1652 = vmatpush1.msra.mxu0 %v6400_v15  ;;  %4522 = vmatpush3.msra.mxu1 %v6403_v4  ;;  %7599 = vst [vmem:[#allocation36_spill] sm:$0xff] %v6486_v31  ;;  %7600 = vst [vmem:[#allocation27_spill] sm:$0xff] %v6490_v6  ;;  %v6493_v8 = vld [vmem:[#allocation2 + $0xa0] sm:$0xff] }
 0x26d   :  { %1653 = vmatprep.subr.mxu0 %v6406_v61  ;;  %4523 = vmatprep.subr.mxu1 %v7543_v37  ;;  %7601 = vst [vmem:[#allocation28_spill] sm:$0xff] %v6493_v8  ;;  %v6496_v12 = vld [vmem:[#allocation2 + $0x80] sm:$0xff] }
 0x26e   :  { %1654 = vmatpush1.msra.mxu0 %v6410_v21  ;;  %4524 = vmatpush3.msra.mxu1 %v6413_v22  ;;  %7602 = vst [vmem:[#allocation37_spill] sm:$0xff] %v6496_v12 }
 0x26f   :  { %1655 = vmatprep.subr.mxu0 %v6416_v34  ;;  %4525 = vmatprep.subr.mxu1 %v7543_v37 }
 0x270   :  { %1656 = vmatpush1.msra.mxu0 %v6420_v45  ;;  %4526 = vmatpush3.msra.mxu1 %v6423_v40 }
 0x271   :  { %1657 = vmatprep.subr.mxu0 %v6426_v62  ;;  %4527 = vmatprep.subr.mxu1 %v7543_v37 }
 0x272   :  { %1658 = vmatpush1.msra.mxu0 %v6430_v54  ;;  %4528 = vmatpush3.msra.mxu1 %v6433_v51 }
 0x273   :  { %1659 = vmatprep.subr.mxu0 %v6436_v0  ;;  %4529 = vmatprep.subr.mxu1 %v7543_v37 }
 0x274   :  { %1660 = vmatpush1.msra.mxu0 %v6440_v11  ;;  %4530 = vmatpush3.msra.mxu1 %v6443_v29 }
 0x275   :  { %1661 = vmatprep.subr.mxu0 %v6446_v19  ;;  %4531 = vmatprep.subr.mxu1 %v7543_v37 }
 0x276   :  { %1662 = vmatpush1.msra.mxu0 %v6450_v10  ;;  %4532 = vmatpush3.msra.mxu1 %v6453_v14 }
 0x277   :  { %1663 = vmatprep.subr.mxu0 %v6456_v63  ;;  %4533 = vmatprep.subr.mxu1 %v7543_v37 }
 0x278   :  { %1664 = vmatpush1.msra.mxu0 %v6460_v25  ;;  %4534 = vmatpush3.msra.mxu1 %v6463_v18 }
 0x279   :  { %1665 = vmatprep.subr.mxu0 %v6466_v35  ;;  %4535 = vmatprep.subr.mxu1 %v7543_v37 }
 0x27a   :  { %1666 = vmatpush1.msra.mxu0 %v6470_v24  ;;  %4536 = vmatpush3.msra.mxu1 %v6473_v23 }
 0x27b   :  { %1667 = vmatprep.subr.mxu0 %v6476_v59  ;;  %4537 = vmatprep.subr.mxu1 %v7543_v37 }
 0x27c   :  { %1668 = vmatpush1.msra.mxu0 %v6480_v16  ;;  %4538 = vmatpush3.msra.mxu1 %v6483_v42  ;;  %v6500_v42 = vld [vmem:[#allocation2 + $0x78] sm:$0xff]  ;;  %v6506_v16 = vld [vmem:[#allocation2 + $0x68] sm:$0xff] }
 0x27d   :  { %1669 = vmatprep.subr.mxu0 %v6486_v31  ;;  %4539 = vmatprep.subr.mxu1 %v7543_v37  ;;  %7603 = vst [vmem:[#allocation29_spill] sm:$0xff] %v6500_v42  ;;  %v6503_v31 = vld [vmem:[#allocation2 + $0x88] sm:$0xff]  ;;  %7605 = vst [vmem:[#allocation38_spill] sm:$0xff] %v6506_v16 }
 0x27e   :  { %1670 = vmatpush1.msra.mxu0 %v6490_v6  ;;  %4540 = vmatpush3.msra.mxu1 %v6493_v8  ;;  %7604 = vst [vmem:[#allocation30_spill] sm:$0xff] %v6503_v31  ;;  %v6510_v8 = vld [vmem:[#allocation2 + $0x60] sm:$0xff]  ;;  %v6516_v6 = vld [vmem:[#allocation2 + $0x50] sm:$0xff] }
 0x27f   :  { %1671 = vmatprep.subr.mxu0 %v6496_v12  ;;  %4541 = vmatprep.subr.mxu1 %v7543_v37  ;;  %7606 = vst [vmem:[#allocation40_spill] sm:$0xff] %v6510_v8  ;;  %v6513_v12 = vld [vmem:[#allocation2 + $0x70] sm:$0xff]  ;;  %7608 = vst [vmem:[#allocation41_spill] sm:$0xff] %v6516_v6 }
 0x280   :  { %1672 = vmatpush1.msra.mxu0 %v6500_v42  ;;  %4542 = vmatpush3.msra.mxu1 %v6503_v31  ;;  %7607 = vst [vmem:[#allocation39_spill] sm:$0xff] %v6513_v12  ;;  %v6520_v31 = vld [vmem:[#allocation2 + $0x48] sm:$0xff]  ;;  %v6526_v42 = vld [vmem:[#allocation2 + $0x38] sm:$0xff] }
 0x281   :  { %1673 = vmatprep.subr.mxu0 %v6506_v16  ;;  %4543 = vmatprep.subr.mxu1 %v7543_v37  ;;  %7609 = vst [vmem:[#allocation44_spill] sm:$0xff] %v6520_v31  ;;  %v6523_v16 = vld [vmem:[#allocation2 + $0x58] sm:$0xff]  ;;  %7611 = vst [vmem:[#allocation45_spill] sm:$0xff] %v6526_v42 }
 0x282   :  { %1674 = vmatpush1.msra.mxu0 %v6510_v8  ;;  %4544 = vmatpush3.msra.mxu1 %v6513_v12  ;;  %7610 = vst [vmem:[#allocation43_spill] sm:$0xff] %v6523_v16  ;;  %v6530_v12 = vld [vmem:[#allocation2 + $0x30] sm:$0xff]  ;;  %v6536_v8 = vld [vmem:[#allocation2 + $0x20] sm:$0xff] }
 0x283   :  { %1675 = vmatprep.subr.mxu0 %v6516_v6  ;;  %4545 = vmatprep.subr.mxu1 %v7543_v37  ;;  %7612 = vst [vmem:[#allocation48_spill] sm:$0xff] %v6530_v12  ;;  %v6533_v6 = vld [vmem:[#allocation2 + $0x40] sm:$0xff]  ;;  %7614 = vst [vmem:[#allocation56_spill] sm:$0xff] %v6536_v8 }
 0x284   :  { %1676 = vmatpush1.msra.mxu0 %v6520_v31  ;;  %4546 = vmatpush3.msra.mxu1 %v6523_v16  ;;  %7613 = vst [vmem:[#allocation55_spill] sm:$0xff] %v6533_v6  ;;  %v6540_v16 = vld [vmem:[#allocation2 + $0x18] sm:$0xff]  ;;  %v6546_v31 = vld [vmem:[#allocation2 + $0x8] sm:$0xff] }
 0x285   :  { %1677 = vmatprep.subr.mxu0 %v6526_v42  ;;  %4547 = vmatprep.subr.mxu1 %v7543_v37  ;;  %7615 = vst [vmem:[#allocation57_spill] sm:$0xff] %v6540_v16  ;;  %v6543_v42 = vld [vmem:[#allocation2 + $0x28] sm:$0xff]  ;;  %7617 = vst [vmem:[#allocation59_spill] sm:$0xff] %v6546_v31 }
 0x286   :  { %1678 = vmatpush1.msra.mxu0 %v6530_v12  ;;  %4548 = vmatpush3.msra.mxu1 %v6533_v6  ;;  %7616 = vst [vmem:[#allocation58_spill] sm:$0xff] %v6543_v42  ;;  %v6550_v6 = vld [vmem:[#allocation2] sm:$0xff] }
 0x287   :  { %1679 = vmatprep.subr.mxu0 %v6536_v8  ;;  %4549 = vmatprep.subr.mxu1 %v7543_v37  ;;  %7618 = vst [vmem:[#allocation60_spill] sm:$0xff] %v6550_v6  ;;  %v6554_v8 = vld [vmem:[#allocation2 + $0x10] sm:$0xff] }
 0x288   :  { %1680 = vmatpush1.msra.mxu0 %v6540_v16  ;;  %4550 = vmatpush3.msra.mxu1 %v6543_v42  ;;  %7619 = vst [vmem:[#allocation61_spill] sm:$0xff] %v6554_v8 }
 0x289   :  { %1681 = vmatprep.subr.mxu0 %v6546_v31  ;;  %4551 = vmatprep.subr.mxu1 %v7543_v37 }
 0x28a   :  { %1682 = vmatpush1.msra.mxu0 %v6550_v6  ;;  %1715 = vmatprep.mubr.f32.mxu0 %v7543_v37 }
 0x28b   :  { %4552 = vmatpush3.msra.mxu1 %v6554_v8  ;;  %4553 = vmatprep.mubr.msk.f32.mxu1 %vm5717_vm2, %v7543_v37 }
 0x28c   :  { %2072 = vmatprep.subr.mxu0 %v6329_v26  ;;  %4556 = vmatprep.subr.mxu1 %v7543_v37 }
 0x32b   :  { %v1296_v31 = vpop.f32.mrf.mxu0  ;;  %v6561_v42 = vpop.f32.mrf.mxu1 }
 0x32c   :  { %v1372_v16 = vrot.slane %v1296_v31, 6  ;;  %v1373_v12 = vrot.slane %v1296_v31, 7  ;;  %v1374_v59 = vrot.slane %v1296_v31, 1  ;;  %v1375_v6 = vrot.slane %v1296_v31, 2 }
 0x32d   :  { %v1376_v23 = vrot.slane %v1296_v31, 3  ;;  %v1377_v24 = vrot.slane %v1296_v31, 4  ;;  %v1378_v35 = vrot.slane %v1296_v31, 5  ;;  %v1389_v18 = vadd.f32 %v1296_v31, %v6133_v56  ;;  %v4520_v8 = vpop.f32.mrf.mxu1 }
 0x32e   :  { %v1387_v25 = vadd.f32 %v1372_v16, %v7569_v38  ;;  %v1388_v63 = vadd.f32 %v1373_v12, %v7568_v57  ;;  %v1390_v26 = vadd.f32 %v1374_v59, %v7570_v36  ;;  %v1391_v14 = vadd.f32 %v1375_v6, %v7571_v32  ;;  %v1298_v8 = vpop.f32.mrf.mxu0 }
 0x32f   :  { %v1392_v10 = vadd.f32 %v1376_v23, %v7572_v5  ;;  %v1393_v19 = vadd.f32 %v1377_v24, %v6153_v1  ;;  %v1394_v29 = vadd.f32 %v1378_v35, %v6158_v3  ;;  %v4109_v11 = vmul.f32 -1.442695, %v1389_v18 }
 0x330   :  { %v4107_v0 = vmul.f32 -1.442695, %v1387_v25  ;;  %v4108_v51 = vmul.f32 -1.442695, %v1388_v63  ;;  %v4110_v54 = vmul.f32 -1.442695, %v1390_v26 }
 0x331   :  { %4973 = vpow2.f32 %v4109_v11  ;;  %v4111_v31 = vmul.f32 -1.442695, %v1391_v14  ;;  %v4112_v16 = vmul.f32 -1.442695, %v1392_v10  ;;  %v4113_v12 = vmul.f32 -1.442695, %v1393_v19 }
 0x332   :  { %4975 = vpow2.f32 %v4107_v0  ;;  %v4114_v59 = vmul.f32 -1.442695, %v1394_v29  ;;  %v1444_v6 = vrot.slane %v1298_v8, 6  ;;  %v1445_v32 = vrot.slane %v1298_v8, 7 }
 0x333   :  { %4977 = vpow2.f32 %v4108_v51  ;;  %v1446_v23 = vrot.slane %v1298_v8, 1  ;;  %v1461_v11 = vadd.f32 %v1298_v8, %v6136_v30  ;;  %v1448_v63 = vrot.slane %v1298_v8, 3 }
 0x334   :  { %4979 = vpow2.f32 %v4110_v54  ;;  %v1459_v35 = vadd.f32 %v1444_v6, %v6124_v43  ;;  %v1460_v25 = vadd.f32 %v1445_v32, %v6131_v39  ;;  %v1447_v54 = vrot.slane %v1298_v8, 2 }
 0x335   :  { %4981 = vpow2.f32 %v4111_v31  ;;  %v1462_v0 = vadd.f32 %v1446_v23, %v6141_v60  ;;  %v4117_v19 = vmul.f32 -1.442695, %v1461_v11 }
 0x336   :  { %4983 = vpow2.f32 %v4112_v16  ;;  %v4115_v10 = vmul.f32 -1.442695, %v1459_v35  ;;  %v4116_v51 = vmul.f32 -1.442695, %v1460_v25  ;;  %v1450_v35 = vrot.slane %v1298_v8, 5 }
 0x337   :  { %4985 = vpow2.f32 %v4113_v12  ;;  %v4118_v29 = vmul.f32 -1.442695, %v1462_v0  ;;  %v1449_v12 = vrot.slane %v1298_v8, 4  ;;  %v1464_v25 = vadd.f32 %v1448_v63, %v7574_v7 }
 0x338   :  { %4987 = vpow2.f32 %v4114_v59  ;;  %v1463_v59 = vadd.f32 %v1447_v54, %v7573_v2  ;;  %v1466_v54 = vadd.f32 %v1450_v35, %v7576_v28 }
 0x339   :  { %4989 = vpow2.f32 %v4115_v10 }
 0x33a   :  { %4991 = vpow2.f32 %v4116_v51 }
 0x33b   :  { %4993 = vpow2.f32 %v4117_v19 }
 0x33c   :  { %4995 = vpow2.f32 %v4118_v29 }
 0x33e   :  { %v4974_v14 = vpop.eup %4973 }
 0x33f   :  { %v4976_v18 = vpop.eup %4975  ;;  %v1421_v24 = vadd.f32 1.0, %v4974_v14  ;;  %v1465_v14 = vadd.f32 %v1449_v12, %v7575_v20 }
 0x340   :  { %v4978_v26 = vpop.eup %4977  ;;  %v1419_v32 = vadd.f32 1.0, %v4976_v18  ;;  %v4119_v18 = vmul.f32 -1.442695, %v1463_v59 }
 0x341   :  { %v4980_v31 = vpop.eup %4979  ;;  %v1420_v16 = vadd.f32 1.0, %v4978_v26  ;;  %4997 = vrcp.f32 %v1421_v24  ;;  %v4120_v26 = vmul.f32 -1.442695, %v1464_v25  ;;  %v4121_v8 = vmul.f32 -1.442695, %v1465_v14 }
 0x342   :  { %v4982_v6 = vpop.eup %4981  ;;  %v1422_v23 = vadd.f32 1.0, %v4980_v31  ;;  %4999 = vrcp.f32 %v1419_v32  ;;  %v6582_v32 = vld [vmem:[%s7346_s4] ss:$0 sm:$0xff] }
 0x343   :  { %v4984_v11 = vpop.eup %4983  ;;  %v1423_v0 = vadd.f32 1.0, %v4982_v6  ;;  %5001 = vrcp.f32 %v1420_v16  ;;  %7620 = vst [vmem:[#allocation62_spill] sm:$0xff] %v6582_v32  ;;  %v1515_v31 = vadd.f32 %v6582_v32, %v6561_v42  ;;  %v4122_v16 = vmul.f32 -1.442695, %v1466_v54 }
 0x344   :  { %v4986_v10 = vpop.eup %4985  ;;  %v1424_v51 = vadd.f32 1.0, %v4984_v11  ;;  %5003 = vrcp.f32 %v1422_v23 }
 0x345   :  { %v4988_v19 = vpop.eup %4987  ;;  %v1425_v29 = vadd.f32 1.0, %v4986_v10  ;;  %5005 = vrcp.f32 %v1423_v0  ;;  %v1517_v25 = vrot.slane %v1515_v31, 6  ;;  %v1518_v10 = vrot.slane %v1515_v31, 7 }
 0x346   :  { %v1426_v24 = vadd.f32 1.0, %v4988_v19  ;;  %5007 = vrcp.f32 %v1424_v51  ;;  %v4990_v63 = vpop.eup %4989  ;;  %v1521_v32 = vrot.slane %v1515_v31, 3  ;;  %v1522_v28 = vrot.slane %v1515_v31, 4 }
 0x347   :  { %5009 = vrcp.f32 %v1425_v29  ;;  %v4992_v12 = vpop.eup %4991  ;;  %v1491_v23 = vadd.f32 1.0, %v4990_v63  ;;  %v1519_v29 = vrot.slane %v1515_v31, 1 }
 0x348   :  { %5011 = vrcp.f32 %v1426_v24  ;;  %v4994_v59 = vpop.eup %4993  ;;  %v1492_v11 = vadd.f32 1.0, %v4992_v12  ;;  %v1520_v24 = vrot.slane %v1515_v31, 2 }
 0x349   :  { %5013 = vpow2.f32 %v4119_v18  ;;  %v4996_v6 = vpop.eup %4995 }
 0x34a   :  { %5015 = vpow2.f32 %v4120_v26 }
 0x34b   :  { %5017 = vpow2.f32 %v4121_v8 }
 0x34c   :  { %5019 = vpow2.f32 %v4122_v16 }
 0x34d   :  { %5021 = vrcp.f32 %v1491_v23 }
 0x34e   :  { %v4998_v35 = vpop.eup %4997  ;;  %5023 = vrcp.f32 %v1492_v11  ;;  %v1494_v11 = vadd.f32 1.0, %v4996_v6 }
 0x34f   :  { %v5000_v0 = vpop.eup %4999  ;;  %v1534_v51 = vmul.f32 %v4998_v35, %v1515_v31 }
 0x350   :  { %v5002_v19 = vpop.eup %5001  ;;  %v1532_v14 = vmul.f32 %v5000_v0, %v1517_v25  ;;  %v1523_v25 = vrot.slane %v1515_v31, 5 }
 0x351   :  { %v5004_v18 = vpop.eup %5003  ;;  %v1533_v42 = vmul.f32 %v5002_v19, %v1518_v10  ;;  %v1542_v54 = vadd.f32 %v1534_v51, %v6211_v41  ;;  %v1493_v51 = vadd.f32 1.0, %v4994_v59 }
 0x352   :  { %v5006_v26 = vpop.eup %5005  ;;  %v1535_v8 = vmul.f32 %v5004_v18, %v1519_v29  ;;  %v1540_v63 = vadd.f32 %v1532_v14, %v6205_v52 }
 0x353   :  { %v5008_v16 = vpop.eup %5007  ;;  %v1541_v12 = vadd.f32 %v1533_v42, %v6202_v55  ;;  %v1536_v35 = vmul.f32 %v5006_v26, %v1520_v24  ;;  %5025 = vtanh.f32 %v1542_v54 }
 0x354   :  { %v5010_v20 = vpop.eup %5009  ;;  %5027 = vtanh.f32 %v1540_v63  ;;  %v1537_v0 = vmul.f32 %v5008_v16, %v1521_v32  ;;  %v1543_v23 = vadd.f32 %v1535_v8, %v6208_v33 }
 0x355   :  { %v5012_v10 = vpop.eup %5011  ;;  %5029 = vtanh.f32 %v1541_v12  ;;  %v1538_v19 = vmul.f32 %v5010_v20, %v1522_v28  ;;  %v1544_v29 = vadd.f32 %v1536_v35, %v7578_v50 }
 0x356   :  { %v5014_v14 = vpop.eup %5013  ;;  %v1539_v18 = vmul.f32 %v5012_v10, %v1523_v25  ;;  %v1545_v42 = vadd.f32 %v1537_v0, %v7579_v58  ;;  %5031 = vtanh.f32 %v1543_v23 }
 0x357   :  { %v5016_v24 = vpop.eup %5015  ;;  %v1546_v54 = vadd.f32 %v1538_v19, %v7580_v53  ;;  %5033 = vtanh.f32 %v1544_v29  ;;  %v1495_v31 = vadd.f32 1.0, %v5014_v14 }
 0x358   :  { %v1547_v32 = vadd.f32 %v1539_v18, %v7581_v49  ;;  %5035 = vtanh.f32 %v1545_v42  ;;  %v5018_v26 = vpop.eup %5017  ;;  %v1496_v59 = vadd.f32 1.0, %v5016_v24 }
 0x359   :  { %5037 = vrcp.f32 %v1493_v51  ;;  %v5020_v20 = vpop.eup %5019  ;;  %v1497_v28 = vadd.f32 1.0, %v5018_v26 }
 0x35a   :  { %5039 = vrcp.f32 %v1494_v11  ;;  %v5022_v6 = vpop.eup %5021  ;;  %v1498_v8 = vadd.f32 1.0, %v5020_v20 }
 0x35b   :  { %5041 = vtanh.f32 %v1546_v54  ;;  %v5024_v63 = vpop.eup %5023 }
 0x35c   :  { %5043 = vtanh.f32 %v1547_v32 }
 0x35d   :  { %5045 = vrcp.f32 %v1495_v31 }
 0x35e   :  { %5047 = vrcp.f32 %v1496_v59 }
 0x35f   :  { %5049 = vrcp.f32 %v1497_v28 }
 0x360   :  { %v5026_v16 = vpop.eup %5025  ;;  %5051 = vrcp.f32 %v1498_v8 }
 0x361   :  { %v5028_v12 = vpop.eup %5027  ;;  %v1566_v35 = vrot.slane %v5026_v16, 1 }
 0x362   :  { %v5030_v25 = vpop.eup %5029  ;;  %v1564_v0 = vrot.slane %v5028_v12, 1 }
 0x363   :  { %v5032_v23 = vpop.eup %5031  ;;  %v1565_v10 = vrot.slane %v5030_v25, 1  ;;  %v1582_v51 = vsub.f32 %v6372_v46, %v1566_v35 }
 0x364   :  { %v5034_v19 = vpop.eup %5033  ;;  %v1567_v29 = vrot.slane %v5032_v23, 1  ;;  %v1580_v14 = vsub.f32 %v6367_v13, %v1564_v0 }
 0x365   :  { %v5036_v11 = vpop.eup %5035  ;;  %v1568_v18 = vrot.slane %v5034_v19, 1  ;;  %v1581_v42 = vsub.f32 %v6370_v9, %v1565_v10  ;;  %v1598_v24 = vrot.slane %v1582_v51, 7 }
 0x366   :  { %v5038_v54 = vpop.eup %5037  ;;  %v1569_v32 = vrot.slane %v5036_v11, 1  ;;  %v1583_v31 = vsub.f32 %v6375_v48, %v1567_v29  ;;  %v1596_v26 = vrot.slane %v1580_v14, 7 }
 0x367   :  { %v5040_v59 = vpop.eup %5039  ;;  %v1584_v20 = vsub.f32 %v6378_v27, %v1568_v18  ;;  %v1597_v28 = vrot.slane %v1581_v42, 7  ;;  %v1614_v9 = vmul.f32 %v5038_v54, %v1598_v24 }
 0x368   :  { %v5042_v8 = vpop.eup %5041  ;;  %v1585_v46 = vsub.f32 %v6381_v47, %v1569_v32  ;;  %v1599_v35 = vrot.slane %v1583_v31, 7  ;;  %v1612_v49 = vmul.f32 %v5022_v6, %v1596_v26 }
 0x369   :  { %v5044_v13 = vpop.eup %5043  ;;  %v1570_v0 = vrot.slane %v5042_v8, 1  ;;  %v1600_v53 = vrot.slane %v1584_v20, 7  ;;  %v1613_v58 = vmul.f32 %v5024_v63, %v1597_v28  ;;  %v6612_v31 = vadd.f32 %v5026_v16, %v1614_v9  ;;  %v7632_v9 = vld [vmem:[#allocation34_spill] sm:$0xff] }
 0x36a   :  { %v5046_v10 = vpop.eup %5045  ;;  %v1571_v51 = vrot.slane %v5044_v13, 1  ;;  %v1601_v50 = vrot.slane %v1585_v46, 7  ;;  %v1615_v41 = vmul.f32 %v5040_v59, %v1599_v35  ;;  %v6600_v48 = vadd.f32 %v5028_v12, %v1612_v49 }
 0x36b   :  { %v5048_v29 = vpop.eup %5047  ;;  %v1586_v27 = vsub.f32 %v6390_v17, %v1570_v0  ;;  %v1616_v14 = vmul.f32 %v5046_v10, %v1600_v53  ;;  %v6603_v18 = vadd.f32 %v5030_v25, %v1613_v58  ;;  %v7633_v10 = vld [vmem:[#allocation23_spill] sm:$0xff] }
 0x36c   :  { %v1587_v47 = vsub.f32 %v6393_v44, %v1571_v51  ;;  %v1617_v6 = vmul.f32 %v5048_v29, %v1601_v50  ;;  %v6606_v42 = vadd.f32 %v5032_v23, %v1615_v41  ;;  %v1636_v63 = vrot.slane %v6600_v48, 2  ;;  %v5050_v49 = vpop.eup %5049  ;;  %v7634_v51 = vld [vmem:[#allocation24_spill] sm:$0xff]  ;;  %v7635_v29 = vld [vmem:[#allocation35_spill] sm:$0xff] }
 0x36d   :  { %v1602_v24 = vrot.slane %v1586_v27, 7  ;;  %v6609_v54 = vadd.f32 %v5034_v19, %v1616_v14  ;;  %v1637_v32 = vrot.slane %v6603_v18, 1  ;;  %v5052_v58 = vpop.eup %5051  ;;  %v7636_v27 = vld [vmem:[#allocation25_spill] sm:$0xff]  ;;  %v7637_v14 = vld [vmem:[#allocation26_spill] sm:$0xff] }
 0x36e   :  { %v1603_v12 = vrot.slane %v1587_v47, 7  ;;  %v6614_v17 = vadd.f32 %v5036_v11, %v1617_v6  ;;  %v1640_v41 = vrot.slane %v6606_v42, 7  ;;  %v7638_v47 = vld [vmem:[#allocation36_spill] sm:$0xff]  ;;  %v7639_v6 = vld [vmem:[#allocation27_spill] sm:$0xff] }
 0x36f   :  { %v1618_v53 = vmul.f32 %v5050_v49, %v1602_v24  ;;  %v1638_v44 = vsel %vm788_vm3, %v1637_v32, %v1636_v63  ;;  %v1642_v23 = vrot.slane %v6609_v54, 6  ;;  %v7640_v63 = vld [vmem:[#allocation28_spill] sm:$0xff]  ;;  %v7641_v24 = vld [vmem:[#allocation37_spill] sm:$0xff]  ;;  %v7643_v49 = vld [vmem:[#allocation30_spill] sm:$0xff] }
 0x370   :  { %v1619_v50 = vmul.f32 %v5052_v58, %v1603_v12  ;;  %v1639_v25 = vsel %vm791_vm4, %v6612_v31, %v1638_v44  ;;  %v1644_v16 = vrot.slane %v6614_v17, 5  ;;  %v7642_v32 = vld [vmem:[#allocation29_spill] sm:$0xff]  ;;  %v7644_v12 = vld [vmem:[#allocation38_spill] sm:$0xff]  ;;  %v7645_v58 = vld [vmem:[#allocation40_spill] sm:$0xff] }
 0x371   :  { %v6621_v19 = vadd.f32 %v5042_v8, %v1618_v53  ;;  %v1641_v26 = vsel %vm794_vm5, %v1640_v41, %v1639_v25  ;;  %v7630_v8 = vld [vmem:[#allocation21_spill] sm:$0xff]  ;;  %v7646_v53 = vld [vmem:[#allocation39_spill] sm:$0xff]  ;;  %v7648_v41 = vld [vmem:[#allocation44_spill] sm:$0xff] }
 0x372   :  { %v6625_v11 = vadd.f32 %v5044_v13, %v1619_v50  ;;  %v1643_v59 = vsel %vm797_vm6, %v1642_v23, %v1641_v26  ;;  %v7631_v13 = vld [vmem:[#allocation22_spill] sm:$0xff]  ;;  %v7647_v44 = vld [vmem:[#allocation41_spill] sm:$0xff]  ;;  %v7649_v50 = vld [vmem:[#allocation43_spill] sm:$0xff] }
 0x373   :  { %v1645_v20 = vsel %vm800_vm7, %v1644_v16, %v1643_v59  ;;  %v1646_v28 = vrot.slane %v6621_v19, 4  ;;  %v7650_v25 = vld [vmem:[#allocation45_spill] sm:$0xff]  ;;  %v7651_v23 = vld [vmem:[#allocation48_spill] sm:$0xff]  ;;  %v7652_v26 = vld [vmem:[#allocation55_spill] sm:$0xff] }
 0x374   :  { %v1648_v46 = vrot.slane %v6625_v11, 3  ;;  %v7653_v16 = vld [vmem:[#allocation56_spill] sm:$0xff]  ;;  %v7654_v59 = vld [vmem:[#allocation57_spill] sm:$0xff] }
 0x375   :  { %v1647_v35 = vsel %vm803_vm8, %v1646_v28, %v1645_v20  ;;  %v7655_v20 = vld [vmem:[#allocation58_spill] sm:$0xff]  ;;  %v7656_v28 = vld [vmem:[#allocation59_spill] sm:$0xff] }
 0x376   :  { %v1649_v0 = vsel %vm806_vm9, %v1648_v46, %v1647_v35  ;;  %v7657_v46 = vld [vmem:[#allocation60_spill] sm:$0xff]  ;;  %v7658_v35 = vld [vmem:[#allocation61_spill] sm:$0xff] }
 0x377   :  { %1716 = vmatmul.mubr.f32.vlgmr.msra.gmra.mxu0 %v1649_v0  ;;  %4554 = vmatmul.mubr.f32.vlgmr.msra.gmra.mxu1 %v1649_v0  ;;  %v6698_v0 = vld [vmem:[#allocation2 + $0x170] sm:$0xff] }
 0x378   :  { %2073 = vmatpush1.msra.mxu0 %v6400_v15  ;;  %4557 = vmatpush3.msra.mxu1 %v6403_v4  ;;  %v7621_v15 = vld [vmem:[#allocation15_spill] sm:$0xff]  ;;  %v7622_v4 = vld [vmem:[#allocation16_spill] sm:$0xff] }
 0x379   :  { %2074 = vmatprep.subr.mxu0 %v6406_v61  ;;  %4558 = vmatprep.subr.mxu1 %v7543_v37  ;;  %v7623_v61 = vld [vmem:[#allocation31_spill] sm:$0xff] }
 0x37a   :  { %2075 = vmatpush1.msra.mxu0 %v6410_v21  ;;  %4559 = vmatpush3.msra.mxu1 %v6413_v22  ;;  %v7624_v21 = vld [vmem:[#allocation17_spill] sm:$0xff]  ;;  %v7625_v22 = vld [vmem:[#allocation18_spill] sm:$0xff] }
 0x37b   :  { %2076 = vmatprep.subr.mxu0 %v6416_v34  ;;  %4560 = vmatprep.subr.mxu1 %v7543_v37  ;;  %v7626_v34 = vld [vmem:[#allocation32_spill] sm:$0xff] }
 0x37c   :  { %2077 = vmatpush1.msra.mxu0 %v6420_v45  ;;  %4561 = vmatpush3.msra.mxu1 %v6423_v40  ;;  %v7627_v45 = vld [vmem:[#allocation19_spill] sm:$0xff]  ;;  %v7628_v40 = vld [vmem:[#allocation20_spill] sm:$0xff] }
 0x37d   :  { %2078 = vmatprep.subr.mxu0 %v6426_v62  ;;  %4562 = vmatprep.subr.mxu1 %v7543_v37  ;;  %v7629_v62 = vld [vmem:[#allocation33_spill] sm:$0xff] }
 0x37e   :  { %2079 = vmatpush1.msra.mxu0 %v7621_v15  ;;  %4563 = vmatpush3.msra.mxu1 %v7622_v4 }
 0x37f   :  { %2080 = vmatprep.subr.mxu0 %v7623_v61  ;;  %4564 = vmatprep.subr.mxu1 %v7543_v37 }
 0x380   :  { %2081 = vmatpush1.msra.mxu0 %v7624_v21  ;;  %4565 = vmatpush3.msra.mxu1 %v7625_v22 }
 0x381   :  { %2082 = vmatprep.subr.mxu0 %v7626_v34  ;;  %4566 = vmatprep.subr.mxu1 %v7543_v37 }
 0x382   :  { %2083 = vmatpush1.msra.mxu0 %v7627_v45  ;;  %4567 = vmatpush3.msra.mxu1 %v7628_v40 }
 0x383   :  { %2084 = vmatprep.subr.mxu0 %v7629_v62  ;;  %4568 = vmatprep.subr.mxu1 %v7543_v37 }
 0x384   :  { %2085 = vmatpush1.msra.mxu0 %v7630_v8  ;;  %4569 = vmatpush3.msra.mxu1 %v7631_v13 }
 0x385   :  { %2086 = vmatprep.subr.mxu0 %v7632_v9  ;;  %4570 = vmatprep.subr.mxu1 %v7543_v37 }
 0x386   :  { %2087 = vmatpush1.msra.mxu0 %v7633_v10  ;;  %4571 = vmatpush3.msra.mxu1 %v7634_v51 }
 0x387   :  { %2088 = vmatprep.subr.mxu0 %v7635_v29  ;;  %4572 = vmatprep.subr.mxu1 %v7543_v37  ;;  %v7659_v29 = vld [vmem:[#allocation42_spill] sm:$0xff] }
 0x388   :  { %2089 = vmatpush1.msra.mxu0 %v7636_v27  ;;  %4573 = vmatpush3.msra.mxu1 %v7637_v14 }
 0x389   :  { %2090 = vmatprep.subr.mxu0 %v7638_v47  ;;  %4574 = vmatprep.subr.mxu1 %v7543_v37 }
 0x38a   :  { %2091 = vmatpush1.msra.mxu0 %v7639_v6  ;;  %4575 = vmatpush3.msra.mxu1 %v7640_v63 }
 0x38b   :  { %2092 = vmatprep.subr.mxu0 %v7641_v24  ;;  %4576 = vmatprep.subr.mxu1 %v7543_v37 }
 0x38c   :  { %2093 = vmatpush1.msra.mxu0 %v7642_v32  ;;  %4577 = vmatpush3.msra.mxu1 %v7643_v49 }
 0x38d   :  { %2094 = vmatprep.subr.mxu0 %v7644_v12  ;;  %4578 = vmatprep.subr.mxu1 %v7543_v37 }
 0x38e   :  { %2095 = vmatpush1.msra.mxu0 %v7645_v58  ;;  %4579 = vmatpush3.msra.mxu1 %v7646_v53 }
 0x38f   :  { %2096 = vmatprep.subr.mxu0 %v7647_v44  ;;  %4580 = vmatprep.subr.mxu1 %v7543_v37 }
 0x390   :  { %2097 = vmatpush1.msra.mxu0 %v7648_v41  ;;  %4581 = vmatpush3.msra.mxu1 %v7649_v50 }
 0x391   :  { %2098 = vmatprep.subr.mxu0 %v7650_v25  ;;  %4582 = vmatprep.subr.mxu1 %v7543_v37 }
 0x392   :  { %2099 = vmatpush1.msra.mxu0 %v7651_v23  ;;  %4583 = vmatpush3.msra.mxu1 %v7652_v26 }
 0x393   :  { %2100 = vmatprep.subr.mxu0 %v7653_v16  ;;  %4584 = vmatprep.subr.mxu1 %v7543_v37 }
 0x394   :  { %2101 = vmatpush1.msra.mxu0 %v7654_v59  ;;  %4585 = vmatpush3.msra.mxu1 %v7655_v20 }
 0x395   :  { %2102 = vmatprep.subr.mxu0 %v7656_v28  ;;  %4586 = vmatprep.subr.mxu1 %v7543_v37 }
 0x396   :  { %2103 = vmatpush1.msra.mxu0 %v7657_v46  ;;  %2136 = vmatprep.mubr.f32.mxu0 %v7543_v37 }
 0x397   :  { %4587 = vmatpush3.msra.mxu1 %v7658_v35  ;;  %4588 = vmatprep.mubr.msk.f32.mxu1 %vm5717_vm2, %v7543_v37 }
 0x398   :  { %2493 = vmatprep.subr.mxu0 %v6698_v0  ;;  %4591 = vmatprep.subr.mxu1 %v7543_v37 }
 0x437   :  { %v1717_v15 = vpop.f32.mrf.mxu0  ;;  %v6702_v4 = vpop.f32.mrf.mxu1 }
 0x438   :  { %v1793_v61 = vrot.slane %v1717_v15, 5  ;;  %v1794_v21 = vrot.slane %v1717_v15, 6  ;;  %v1795_v22 = vrot.slane %v1717_v15, 7  ;;  %v1796_v34 = vrot.slane %v1717_v15, 1 }
 0x439   :  { %v1797_v45 = vrot.slane %v1717_v15, 2  ;;  %v1798_v40 = vrot.slane %v1717_v15, 3  ;;  %v1799_v62 = vrot.slane %v1717_v15, 4  ;;  %v1811_v8 = vadd.f32 %v1717_v15, %v7570_v36  ;;  %v4555_v13 = vpop.f32.mrf.mxu1  ;;  %v1719_v58 = vpop.f32.mrf.mxu0 }
 0x43a   :  { %v1808_v9 = vadd.f32 %v1793_v61, %v7569_v38  ;;  %v1809_v10 = vadd.f32 %v1794_v21, %v7568_v57  ;;  %v1810_v51 = vadd.f32 %v1795_v22, %v6133_v56  ;;  %v1812_v27 = vadd.f32 %v1796_v34, %v7659_v29 }
 0x43b   :  { %v1813_v14 = vadd.f32 %v1797_v45, %v7572_v5  ;;  %v1814_v47 = vadd.f32 %v1798_v40, %v6153_v1  ;;  %v1815_v6 = vadd.f32 %v1799_v62, %v6158_v3  ;;  %v4126_v63 = vmul.f32 -1.442695, %v1811_v8 }
 0x43c   :  { %v4123_v24 = vmul.f32 -1.442695, %v1808_v9  ;;  %v4124_v32 = vmul.f32 -1.442695, %v1809_v10  ;;  %v4125_v49 = vmul.f32 -1.442695, %v1810_v51  ;;  %v1883_v20 = vadd.f32 %v1719_v58, %v6141_v60 }
 0x43d   :  { %5053 = vpow2.f32 %v4126_v63  ;;  %v4127_v12 = vmul.f32 -1.442695, %v1812_v27  ;;  %v4128_v53 = vmul.f32 -1.442695, %v1813_v14  ;;  %v4129_v44 = vmul.f32 -1.442695, %v1814_v47 }
 0x43e   :  { %5055 = vpow2.f32 %v4123_v24  ;;  %v4130_v41 = vmul.f32 -1.442695, %v1815_v6  ;;  %v1865_v50 = vrot.slane %v1719_v58, 5  ;;  %v1866_v25 = vrot.slane %v1719_v58, 6 }
 0x43f   :  { %5057 = vpow2.f32 %v4124_v32  ;;  %v1867_v23 = vrot.slane %v1719_v58, 7  ;;  %v4134_v15 = vmul.f32 -1.442695, %v1883_v20  ;;  %v1868_v61 = vrot.slane %v1719_v58, 1 }
 0x440   :  { %5059 = vpow2.f32 %v4125_v49  ;;  %v1880_v26 = vadd.f32 %v1865_v50, %v6124_v43  ;;  %v1881_v16 = vadd.f32 %v1866_v25, %v6131_v39  ;;  %v1869_v22 = vrot.slane %v1719_v58, 2  ;;  %v7661_v25 = vld [vmem:[#allocation47_spill] sm:$0xff] }
 0x441   :  { %5061 = vpow2.f32 %v4127_v12  ;;  %v1882_v59 = vadd.f32 %v1867_v23, %v6136_v30  ;;  %v1870_v9 = vrot.slane %v1719_v58, 3  ;;  %v1884_v10 = vadd.f32 %v1868_v61, %v7573_v2 }
 0x442   :  { %5063 = vpow2.f32 %v4128_v53  ;;  %v4131_v28 = vmul.f32 -1.442695, %v1880_v26  ;;  %v4132_v46 = vmul.f32 -1.442695, %v1881_v16  ;;  %v1871_v14 = vrot.slane %v1719_v58, 4  ;;  %v7660_v53 = vld [vmem:[#allocation46_spill] sm:$0xff] }
 0x443   :  { %5065 = vpow2.f32 %v4129_v44  ;;  %v4133_v35 = vmul.f32 -1.442695, %v1882_v59  ;;  %v1885_v47 = vadd.f32 %v1869_v22, %v7574_v7  ;;  %v1886_v44 = vadd.f32 %v1870_v9, %v7660_v53  ;;  %v7662_v59 = vld [vmem:[#allocation62_spill] sm:$0xff] }
 0x444   :  { %5067 = vpow2.f32 %v4130_v41  ;;  %v4135_v41 = vmul.f32 -1.442695, %v1884_v10  ;;  %v1887_v23 = vadd.f32 %v1871_v14, %v7661_v25  ;;  %v1936_v20 = vadd.f32 %v7662_v59, %v6702_v4 }
 0x445   :  { %5069 = vpow2.f32 %v4131_v28  ;;  %v4136_v26 = vmul.f32 -1.442695, %v1885_v47  ;;  %v4137_v58 = vmul.f32 -1.442695, %v1886_v44 }
 0x446   :  { %5071 = vpow2.f32 %v4132_v46  ;;  %v4138_v28 = vmul.f32 -1.442695, %v1887_v23  ;;  %v1938_v22 = vrot.slane %v1936_v20, 5  ;;  %v1942_v47 = vrot.slane %v1936_v20, 2  ;;  %v7663_v23 = vld [vmem:[#allocation50_spill] sm:$0xff] }
 0x447   :  { %5073 = vpow2.f32 %v4133_v35 }
 0x448   :  { %5075 = vpow2.f32 %v4134_v15 }
 0x44a   :  { %v5054_v21 = vpop.eup %5053 }
 0x44b   :  { %v5056_v34 = vpop.eup %5055  ;;  %v1843_v45 = vadd.f32 1.0, %v5054_v21 }
 0x44c   :  { %v5058_v40 = vpop.eup %5057  ;;  %v1840_v62 = vadd.f32 1.0, %v5056_v34 }
 0x44d   :  { %v5060_v8 = vpop.eup %5059  ;;  %v1841_v13 = vadd.f32 1.0, %v5058_v40  ;;  %5077 = vrcp.f32 %v1843_v45  ;;  %v1939_v40 = vrot.slane %v1936_v20, 6 }
 0x44e   :  { %v5062_v51 = vpop.eup %5061  ;;  %v1842_v27 = vadd.f32 1.0, %v5060_v8  ;;  %5079 = vrcp.f32 %v1840_v62 }
 0x44f   :  { %v5064_v6 = vpop.eup %5063  ;;  %v1844_v63 = vadd.f32 1.0, %v5062_v51  ;;  %5081 = vrcp.f32 %v1841_v13  ;;  %v1940_v13 = vrot.slane %v1936_v20, 7  ;;  %v1941_v51 = vrot.slane %v1936_v20, 1 }
 0x450   :  { %v5066_v24 = vpop.eup %5065  ;;  %v1845_v32 = vadd.f32 1.0, %v5064_v6  ;;  %5083 = vrcp.f32 %v1842_v27 }
 0x451   :  { %v5068_v49 = vpop.eup %5067  ;;  %v1846_v12 = vadd.f32 1.0, %v5066_v24  ;;  %5085 = vrcp.f32 %v1844_v63 }
 0x452   :  { %v1847_v50 = vadd.f32 1.0, %v5068_v49  ;;  %5087 = vrcp.f32 %v1845_v32  ;;  %v5070_v16 = vpop.eup %5069  ;;  %v1943_v49 = vrot.slane %v1936_v20, 3 }
 0x453   :  { %5089 = vrcp.f32 %v1846_v12  ;;  %v5072_v46 = vpop.eup %5071  ;;  %v1912_v61 = vadd.f32 1.0, %v5070_v16 }
 0x454   :  { %5091 = vrcp.f32 %v1847_v50  ;;  %v5074_v35 = vpop.eup %5073  ;;  %v1913_v34 = vadd.f32 1.0, %v5072_v46 }
 0x455   :  { %5093 = vpow2.f32 %v4135_v41  ;;  %v5076_v15 = vpop.eup %5075  ;;  %v1944_v41 = vrot.slane %v1936_v20, 4  ;;  %v1914_v16 = vadd.f32 1.0, %v5074_v35 }
 0x456   :  { %5095 = vpow2.f32 %v4136_v26 }
 0x457   :  { %5097 = vpow2.f32 %v4137_v58 }
 0x458   :  { %5099 = vpow2.f32 %v4138_v28  ;;  %v7664_v28 = vld [vmem:[#allocation51_spill] sm:$0xff] }
 0x459   :  { %5101 = vrcp.f32 %v1912_v61 }
 0x45a   :  { %v5078_v21 = vpop.eup %5077  ;;  %5103 = vrcp.f32 %v1913_v34  ;;  %v7665_v34 = vld [vmem:[#allocation52_spill] sm:$0xff] }
 0x45b   :  { %v5080_v45 = vpop.eup %5079  ;;  %v1956_v62 = vmul.f32 %v5078_v21, %v1936_v20  ;;  %v1915_v21 = vadd.f32 1.0, %v5076_v15  ;;  %v7667_v20 = vld [vmem:[#allocation54_spill] sm:$0xff] }
 0x45c   :  { %v5082_v8 = vpop.eup %5081  ;;  %v1953_v9 = vmul.f32 %v5080_v45, %v1938_v22 }
 0x45d   :  { %v5084_v10 = vpop.eup %5083  ;;  %v1954_v4 = vmul.f32 %v5082_v8, %v1939_v40  ;;  %v1964_v27 = vadd.f32 %v1956_v62, %v6208_v33  ;;  %v7666_v62 = vld [vmem:[#allocation53_spill] sm:$0xff] }
 0x45e   :  { %v5086_v14 = vpop.eup %5085  ;;  %v1955_v6 = vmul.f32 %v5084_v10, %v1940_v13  ;;  %v1961_v63 = vadd.f32 %v1953_v9, %v6205_v52 }
 0x45f   :  { %v5088_v24 = vpop.eup %5087  ;;  %v1962_v32 = vadd.f32 %v1954_v4, %v6202_v55  ;;  %v1957_v12 = vmul.f32 %v5086_v14, %v1941_v51  ;;  %5105 = vtanh.f32 %v1964_v27 }
 0x460   :  { %v5090_v44 = vpop.eup %5089  ;;  %5107 = vtanh.f32 %v1961_v63  ;;  %v1958_v50 = vmul.f32 %v5088_v24, %v1942_v47  ;;  %v1963_v26 = vadd.f32 %v1955_v6, %v7663_v23 }
 0x461   :  { %v5092_v58 = vpop.eup %5091  ;;  %5109 = vtanh.f32 %v1962_v32  ;;  %v1959_v59 = vmul.f32 %v5090_v44, %v1943_v49  ;;  %v1965_v46 = vadd.f32 %v1957_v12, %v7664_v28 }
 0x462   :  { %v5094_v61 = vpop.eup %5093  ;;  %v1960_v22 = vmul.f32 %v5092_v58, %v1944_v41  ;;  %v1966_v45 = vadd.f32 %v1958_v50, %v7665_v34  ;;  %5111 = vtanh.f32 %v1963_v26 }
 0x463   :  { %v5096_v40 = vpop.eup %5095  ;;  %v1967_v8 = vadd.f32 %v1959_v59, %v7666_v62  ;;  %5113 = vtanh.f32 %v1965_v46  ;;  %v1916_v9 = vadd.f32 1.0, %v5094_v61 }
 0x464   :  { %v1968_v13 = vadd.f32 %v1960_v22, %v7667_v20  ;;  %5115 = vtanh.f32 %v1966_v45  ;;  %v5098_v10 = vpop.eup %5097  ;;  %v1917_v35 = vadd.f32 1.0, %v5096_v40 }
 0x465   :  { %5117 = vrcp.f32 %v1914_v16  ;;  %v5100_v51 = vpop.eup %5099  ;;  %v1918_v15 = vadd.f32 1.0, %v5098_v10 }
 0x466   :  { %5119 = vrcp.f32 %v1915_v21  ;;  %v5102_v4 = vpop.eup %5101  ;;  %v1919_v27 = vadd.f32 1.0, %v5100_v51 }
 0x467   :  { %5121 = vtanh.f32 %v1967_v8  ;;  %v5104_v14 = vpop.eup %5103 }
 0x468   :  { %5123 = vtanh.f32 %v1968_v13 }
 0x469   :  { %5125 = vrcp.f32 %v1916_v9 }
 0x46a   :  { %5127 = vrcp.f32 %v1917_v35 }
 0x46b   :  { %5129 = vrcp.f32 %v1918_v15 }
 0x46c   :  { %v5106_v47 = vpop.eup %5105  ;;  %5131 = vrcp.f32 %v1919_v27 }
 0x46d   :  { %v5108_v6 = vpop.eup %5107  ;;  %v1988_v63 = vrot.slane %v5106_v47, 1 }
 0x46e   :  { %v5110_v24 = vpop.eup %5109  ;;  %v1985_v32 = vrot.slane %v5108_v6, 1 }
 0x46f   :  { %v5112_v49 = vpop.eup %5111  ;;  %v1986_v12 = vrot.slane %v5110_v24, 1  ;;  %v2004_v44 = vsub.f32 %v6606_v42, %v1988_v63 }
 0x470   :  { %v5114_v41 = vpop.eup %5113  ;;  %v1987_v50 = vrot.slane %v5112_v49, 1  ;;  %v2001_v26 = vsub.f32 %v6600_v48, %v1985_v32 }
 0x471   :  { %v5116_v58 = vpop.eup %5115  ;;  %v1989_v16 = vrot.slane %v5114_v41, 1  ;;  %v2002_v59 = vsub.f32 %v6603_v18, %v1986_v12  ;;  %v2020_v13 = vrot.slane %v2004_v44, 7 }
 0x472   :  { %v5118_v46 = vpop.eup %5117  ;;  %v1990_v61 = vrot.slane %v5116_v58, 1  ;;  %v2003_v21 = vsub.f32 %v6612_v31, %v1987_v50  ;;  %v2017_v22 = vrot.slane %v2001_v26, 7 }
 0x473   :  { %v5120_v45 = vpop.eup %5119  ;;  %v2005_v40 = vsub.f32 %v6609_v54, %v1989_v16  ;;  %v2018_v8 = vrot.slane %v2002_v59, 7 }
 0x474   :  { %v5122_v9 = vpop.eup %5121  ;;  %v2006_v42 = vsub.f32 %v6614_v17, %v1990_v61  ;;  %v2019_v10 = vrot.slane %v2003_v21, 7  ;;  %v2033_v35 = vmul.f32 %v5102_v4, %v2017_v22  ;;  %v2036_v26 = vmul.f32 %v5120_v45, %v2020_v13 }
 0x475   :  { %v5124_v48 = vpop.eup %5123  ;;  %v1991_v51 = vrot.slane %v5122_v9, 1  ;;  %v2021_v15 = vrot.slane %v2005_v40, 7  ;;  %v2034_v27 = vmul.f32 %v5104_v14, %v2018_v8 }
 0x476   :  { %v5126_v18 = vpop.eup %5125  ;;  %v1992_v63 = vrot.slane %v5124_v48, 1  ;;  %v2022_v32 = vrot.slane %v2006_v42, 7  ;;  %v2035_v12 = vmul.f32 %v5118_v46, %v2019_v10  ;;  %v6736_v31 = vadd.f32 %v5108_v6, %v2033_v35 }
 0x477   :  { %v5128_v50 = vpop.eup %5127  ;;  %v2007_v54 = vsub.f32 %v6621_v19, %v1991_v51  ;;  %v2037_v44 = vmul.f32 %v5126_v18, %v2021_v15  ;;  %v6739_v16 = vadd.f32 %v5110_v24, %v2034_v27  ;;  %v6751_v8 = vadd.f32 %v5106_v47, %v2036_v26  ;;  %v6789_v26 = vld [vmem:[#allocation2 + $0x138] sm:$0xff] }
 0x478   :  { %v2008_v17 = vsub.f32 %v6625_v11, %v1992_v63  ;;  %v2038_v4 = vmul.f32 %v5128_v50, %v2022_v32  ;;  %v6742_v59 = vadd.f32 %v5112_v49, %v2035_v12  ;;  %v2057_v14 = vrot.slane %v6736_v31, 3  ;;  %v5130_v46 = vpop.eup %5129  ;;  %v6769_v63 = vld [vmem:[#allocation2 + $0x168] sm:$0xff]  ;;  %v6775_v32 = vld [vmem:[#allocation2 + $0x158] sm:$0xff]  ;;  %v6779_v12 = vld [vmem:[#allocation2 + $0x150] sm:$0xff] }
 0x479   :  { %v2023_v61 = vrot.slane %v2007_v54, 7  ;;  %v6745_v21 = vadd.f32 %v5114_v41, %v2037_v44  ;;  %v2058_v6 = vrot.slane %v6739_v16, 2  ;;  %v5132_v24 = vpop.eup %5131  ;;  %v6782_v50 = vld [vmem:[#allocation2 + $0x160] sm:$0xff]  ;;  %v6792_v44 = vld [vmem:[#allocation2 + $0x148] sm:$0xff] }
 0x47a   :  { %v2024_v22 = vrot.slane %v2008_v17, 7  ;;  %v6748_v40 = vadd.f32 %v5116_v58, %v2038_v4  ;;  %v2060_v19 = vrot.slane %v6742_v59, 1  ;;  %v6785_v54 = vld [vmem:[#allocation2 + $0x140] sm:$0xff]  ;;  %v6795_v17 = vld [vmem:[#allocation2 + $0x128] sm:$0xff] }
 0x47b   :  { %v2039_v45 = vmul.f32 %v5130_v46, %v2023_v61  ;;  %v2059_v11 = vsel %vm788_vm3, %v2058_v6, %v2057_v14  ;;  %v2063_v41 = vrot.slane %v6745_v21, 7  ;;  %v6799_v4 = vld [vmem:[#allocation2 + $0x120] sm:$0xff]  ;;  %v6802_v14 = vld [vmem:[#allocation2 + $0x130] sm:$0xff]  ;;  %v6809_v6 = vld [vmem:[#allocation2 + $0x108] sm:$0xff] }
 0x47c   :  { %v2040_v49 = vmul.f32 %v5132_v24, %v2024_v22  ;;  %v2061_v13 = vsel %vm791_vm4, %v2060_v19, %v2059_v11  ;;  %v2065_v58 = vrot.slane %v6748_v40, 6  ;;  %7668 = vst [vmem:[#allocation15_spill] sm:$0xff] %v6799_v4  ;;  %7669 = vst [vmem:[#allocation16_spill] sm:$0xff] %v6802_v14  ;;  %v6805_v61 = vld [vmem:[#allocation2 + $0x110] sm:$0xff]  ;;  %v6812_v46 = vld [vmem:[#allocation2 + $0x118] sm:$0xff] }
 0x47d   :  { %v6756_v42 = vadd.f32 %v5122_v9, %v2039_v45  ;;  %v2062_v10 = vsel %vm794_vm5, %v6751_v8, %v2061_v13  ;;  %7670 = vst [vmem:[#allocation31_spill] sm:$0xff] %v6805_v61  ;;  %7671 = vst [vmem:[#allocation17_spill] sm:$0xff] %v6809_v6  ;;  %v6815_v22 = vld [vmem:[#allocation2 + $0xf8] sm:$0xff]  ;;  %v6819_v19 = vld [vmem:[#allocation2 + $0xf0] sm:$0xff] }
 0x47e   :  { %v6761_v35 = vadd.f32 %v5124_v48, %v2040_v49  ;;  %v2064_v51 = vsel %vm797_vm6, %v2063_v41, %v2062_v10  ;;  %v6772_v48 = vld [vmem:[#allocation2 + $0x178] sm:$0xff]  ;;  %7672 = vst [vmem:[#allocation18_spill] sm:$0xff] %v6812_v46  ;;  %7673 = vst [vmem:[#allocation32_spill] sm:$0xff] %v6815_v22  ;;  %v6822_v24 = vld [vmem:[#allocation2 + $0x100] sm:$0xff] }
 0x47f   :  { %v2066_v47 = vsel %vm800_vm7, %v2065_v58, %v2064_v51  ;;  %v2067_v15 = vrot.slane %v6756_v42, 5  ;;  %7674 = vst [vmem:[#allocation19_spill] sm:$0xff] %v6819_v19  ;;  %7675 = vst [vmem:[#allocation20_spill] sm:$0xff] %v6822_v24  ;;  %v6825_v45 = vld [vmem:[#allocation2 + $0xe0] sm:$0xff]  ;;  %v6829_v11 = vld [vmem:[#allocation2 + $0xd8] sm:$0xff] }
 0x480   :  { %v2069_v27 = vrot.slane %v6761_v35, 4  ;;  %7676 = vst [vmem:[#allocation33_spill] sm:$0xff] %v6825_v45  ;;  %7677 = vst [vmem:[#allocation21_spill] sm:$0xff] %v6829_v11  ;;  %v6832_v49 = vld [vmem:[#allocation2 + $0xe8] sm:$0xff]  ;;  %v6839_v41 = vld [vmem:[#allocation2 + $0xc0] sm:$0xff] }
 0x481   :  { %v2068_v18 = vsel %vm803_vm8, %v2067_v15, %v2066_v47  ;;  %7678 = vst [vmem:[#allocation22_spill] sm:$0xff] %v6832_v49  ;;  %v6835_v13 = vld [vmem:[#allocation2 + $0xc8] sm:$0xff]  ;;  %7680 = vst [vmem:[#allocation23_spill] sm:$0xff] %v6839_v41  ;;  %v6842_v10 = vld [vmem:[#allocation2 + $0xd0] sm:$0xff] }
 0x482   :  { %v2070_v9 = vsel %vm806_vm9, %v2069_v27, %v2068_v18  ;;  %7679 = vst [vmem:[#allocation34_spill] sm:$0xff] %v6835_v13  ;;  %7681 = vst [vmem:[#allocation24_spill] sm:$0xff] %v6842_v10  ;;  %v6845_v58 = vld [vmem:[#allocation2 + $0xb0] sm:$0xff]  ;;  %v6849_v51 = vld [vmem:[#allocation2 + $0xa8] sm:$0xff] }
 0x483   :  { %2137 = vmatmul.mubr.f32.vlgmr.msra.gmra.mxu0 %v2070_v9  ;;  %4589 = vmatmul.mubr.f32.vlgmr.msra.gmra.mxu1 %v2070_v9  ;;  %7682 = vst [vmem:[#allocation35_spill] sm:$0xff] %v6845_v58  ;;  %7683 = vst [vmem:[#allocation25_spill] sm:$0xff] %v6849_v51  ;;  %v6852_v47 = vld [vmem:[#allocation2 + $0xb8] sm:$0xff]  ;;  %v6859_v27 = vld [vmem:[#allocation2 + $0x90] sm:$0xff] }
 0x484   :  { %2494 = vmatpush1.msra.mxu0 %v6769_v63  ;;  %4592 = vmatpush3.msra.mxu1 %v6772_v48  ;;  %7684 = vst [vmem:[#allocation26_spill] sm:$0xff] %v6852_v47  ;;  %v6855_v15 = vld [vmem:[#allocation2 + $0x98] sm:$0xff]  ;;  %7686 = vst [vmem:[#allocation27_spill] sm:$0xff] %v6859_v27  ;;  %v6862_v18 = vld [vmem:[#allocation2 + $0xa0] sm:$0xff] }
 0x485   :  { %2495 = vmatprep.subr.mxu0 %v6775_v32  ;;  %4593 = vmatprep.subr.mxu1 %v7543_v37  ;;  %7685 = vst [vmem:[#allocation36_spill] sm:$0xff] %v6855_v15  ;;  %7687 = vst [vmem:[#allocation28_spill] sm:$0xff] %v6862_v18  ;;  %v6865_v9 = vld [vmem:[#allocation2 + $0x80] sm:$0xff] }
 0x486   :  { %2496 = vmatpush1.msra.mxu0 %v6779_v12  ;;  %4594 = vmatpush3.msra.mxu1 %v6782_v50  ;;  %7688 = vst [vmem:[#allocation37_spill] sm:$0xff] %v6865_v9 }
 0x487   :  { %2497 = vmatprep.subr.mxu0 %v6785_v54  ;;  %4595 = vmatprep.subr.mxu1 %v7543_v37 }
 0x488   :  { %2498 = vmatpush1.msra.mxu0 %v6789_v26  ;;  %4596 = vmatpush3.msra.mxu1 %v6792_v44 }
 0x489   :  { %2499 = vmatprep.subr.mxu0 %v6795_v17  ;;  %4597 = vmatprep.subr.mxu1 %v7543_v37 }
 0x48a   :  { %2500 = vmatpush1.msra.mxu0 %v6799_v4  ;;  %4598 = vmatpush3.msra.mxu1 %v6802_v14 }
 0x48b   :  { %2501 = vmatprep.subr.mxu0 %v6805_v61  ;;  %4599 = vmatprep.subr.mxu1 %v7543_v37 }
 0x48c   :  { %2502 = vmatpush1.msra.mxu0 %v6809_v6  ;;  %4600 = vmatpush3.msra.mxu1 %v6812_v46 }
 0x48d   :  { %2503 = vmatprep.subr.mxu0 %v6815_v22  ;;  %4601 = vmatprep.subr.mxu1 %v7543_v37 }
 0x48e   :  { %2504 = vmatpush1.msra.mxu0 %v6819_v19  ;;  %4602 = vmatpush3.msra.mxu1 %v6822_v24 }
 0x48f   :  { %2505 = vmatprep.subr.mxu0 %v6825_v45  ;;  %4603 = vmatprep.subr.mxu1 %v7543_v37 }
 0x490   :  { %2506 = vmatpush1.msra.mxu0 %v6829_v11  ;;  %4604 = vmatpush3.msra.mxu1 %v6832_v49 }
 0x491   :  { %2507 = vmatprep.subr.mxu0 %v6835_v13  ;;  %4605 = vmatprep.subr.mxu1 %v7543_v37 }
 0x492   :  { %2508 = vmatpush1.msra.mxu0 %v6839_v41  ;;  %4606 = vmatpush3.msra.mxu1 %v6842_v10 }
 0x493   :  { %2509 = vmatprep.subr.mxu0 %v6845_v58  ;;  %4607 = vmatprep.subr.mxu1 %v7543_v37 }
 0x494   :  { %2510 = vmatpush1.msra.mxu0 %v6849_v51  ;;  %4608 = vmatpush3.msra.mxu1 %v6852_v47  ;;  %v6869_v47 = vld [vmem:[#allocation2 + $0x78] sm:$0xff]  ;;  %v6875_v51 = vld [vmem:[#allocation2 + $0x68] sm:$0xff] }
 0x495   :  { %2511 = vmatprep.subr.mxu0 %v6855_v15  ;;  %4609 = vmatprep.subr.mxu1 %v7543_v37  ;;  %7689 = vst [vmem:[#allocation29_spill] sm:$0xff] %v6869_v47  ;;  %v6872_v15 = vld [vmem:[#allocation2 + $0x88] sm:$0xff]  ;;  %7691 = vst [vmem:[#allocation38_spill] sm:$0xff] %v6875_v51 }
 0x496   :  { %2512 = vmatpush1.msra.mxu0 %v6859_v27  ;;  %4610 = vmatpush3.msra.mxu1 %v6862_v18  ;;  %7690 = vst [vmem:[#allocation30_spill] sm:$0xff] %v6872_v15  ;;  %v6879_v18 = vld [vmem:[#allocation2 + $0x60] sm:$0xff]  ;;  %v6885_v27 = vld [vmem:[#allocation2 + $0x50] sm:$0xff] }
 0x497   :  { %2513 = vmatprep.subr.mxu0 %v6865_v9  ;;  %4611 = vmatprep.subr.mxu1 %v7543_v37  ;;  %7692 = vst [vmem:[#allocation40_spill] sm:$0xff] %v6879_v18  ;;  %v6882_v9 = vld [vmem:[#allocation2 + $0x70] sm:$0xff]  ;;  %7694 = vst [vmem:[#allocation41_spill] sm:$0xff] %v6885_v27 }
 0x498   :  { %2514 = vmatpush1.msra.mxu0 %v6869_v47  ;;  %4612 = vmatpush3.msra.mxu1 %v6872_v15  ;;  %7693 = vst [vmem:[#allocation39_spill] sm:$0xff] %v6882_v9  ;;  %v6889_v15 = vld [vmem:[#allocation2 + $0x48] sm:$0xff]  ;;  %v6895_v47 = vld [vmem:[#allocation2 + $0x38] sm:$0xff] }
 0x499   :  { %2515 = vmatprep.subr.mxu0 %v6875_v51  ;;  %4613 = vmatprep.subr.mxu1 %v7543_v37  ;;  %7695 = vst [vmem:[#allocation44_spill] sm:$0xff] %v6889_v15  ;;  %v6892_v51 = vld [vmem:[#allocation2 + $0x58] sm:$0xff]  ;;  %7697 = vst [vmem:[#allocation45_spill] sm:$0xff] %v6895_v47 }
 0x49a   :  { %2516 = vmatpush1.msra.mxu0 %v6879_v18  ;;  %4614 = vmatpush3.msra.mxu1 %v6882_v9  ;;  %7696 = vst [vmem:[#allocation43_spill] sm:$0xff] %v6892_v51  ;;  %v6899_v9 = vld [vmem:[#allocation2 + $0x30] sm:$0xff]  ;;  %v6905_v18 = vld [vmem:[#allocation2 + $0x20] sm:$0xff] }
 0x49b   :  { %2517 = vmatprep.subr.mxu0 %v6885_v27  ;;  %4615 = vmatprep.subr.mxu1 %v7543_v37  ;;  %7698 = vst [vmem:[#allocation48_spill] sm:$0xff] %v6899_v9  ;;  %v6902_v27 = vld [vmem:[#allocation2 + $0x40] sm:$0xff]  ;;  %7700 = vst [vmem:[#allocation56_spill] sm:$0xff] %v6905_v18 }
 0x49c   :  { %2518 = vmatpush1.msra.mxu0 %v6889_v15  ;;  %4616 = vmatpush3.msra.mxu1 %v6892_v51  ;;  %7699 = vst [vmem:[#allocation55_spill] sm:$0xff] %v6902_v27  ;;  %v6909_v51 = vld [vmem:[#allocation2 + $0x18] sm:$0xff]  ;;  %v6915_v15 = vld [vmem:[#allocation2 + $0x8] sm:$0xff] }
 0x49d   :  { %2519 = vmatprep.subr.mxu0 %v6895_v47  ;;  %4617 = vmatprep.subr.mxu1 %v7543_v37  ;;  %7701 = vst [vmem:[#allocation57_spill] sm:$0xff] %v6909_v51  ;;  %v6912_v47 = vld [vmem:[#allocation2 + $0x28] sm:$0xff]  ;;  %7703 = vst [vmem:[#allocation59_spill] sm:$0xff] %v6915_v15 }
 0x49e   :  { %2520 = vmatpush1.msra.mxu0 %v6899_v9  ;;  %4618 = vmatpush3.msra.mxu1 %v6902_v27  ;;  %7702 = vst [vmem:[#allocation58_spill] sm:$0xff] %v6912_v47  ;;  %v6919_v27 = vld [vmem:[#allocation2] sm:$0xff] }
 0x49f   :  { %2521 = vmatprep.subr.mxu0 %v6905_v18  ;;  %4619 = vmatprep.subr.mxu1 %v7543_v37  ;;  %7704 = vst [vmem:[#allocation60_spill] sm:$0xff] %v6919_v27  ;;  %v6923_v18 = vld [vmem:[#allocation2 + $0x10] sm:$0xff] }
 0x4a0   :  { %2522 = vmatpush1.msra.mxu0 %v6909_v51  ;;  %4620 = vmatpush3.msra.mxu1 %v6912_v47  ;;  %7705 = vst [vmem:[#allocation61_spill] sm:$0xff] %v6923_v18 }
 0x4a1   :  { %2523 = vmatprep.subr.mxu0 %v6915_v15  ;;  %4621 = vmatprep.subr.mxu1 %v7543_v37 }
 0x4a2   :  { %2524 = vmatpush1.msra.mxu0 %v6919_v27  ;;  %2557 = vmatprep.mubr.f32.mxu0 %v7543_v37 }
 0x4a3   :  { %4622 = vmatpush3.msra.mxu1 %v6923_v18  ;;  %4623 = vmatprep.mubr.msk.f32.mxu1 %vm5717_vm2, %v7543_v37 }
 0x4a4   :  { %2914 = vmatprep.subr.mxu0 %v6698_v0  ;;  %4626 = vmatprep.subr.mxu1 %v7543_v37 }
 0x543   :  { %v2138_v15 = vpop.f32.mrf.mxu0  ;;  %v6930_v47 = vpop.f32.mrf.mxu1 }
 0x544   :  { %v2214_v51 = vrot.slane %v2138_v15, 4  ;;  %v2215_v9 = vrot.slane %v2138_v15, 5  ;;  %v2216_v58 = vrot.slane %v2138_v15, 6  ;;  %v2217_v27 = vrot.slane %v2138_v15, 7 }
 0x545   :  { %v2218_v10 = vrot.slane %v2138_v15, 1  ;;  %v2219_v41 = vrot.slane %v2138_v15, 2  ;;  %v2220_v13 = vrot.slane %v2138_v15, 3  ;;  %v2233_v49 = vadd.f32 %v2138_v15, %v7659_v29  ;;  %v4590_v18 = vpop.f32.mrf.mxu1 }
 0x546   :  { %v2229_v11 = vadd.f32 %v2214_v51, %v7569_v38  ;;  %v2230_v45 = vadd.f32 %v2215_v9, %v7568_v57  ;;  %v2231_v0 = vadd.f32 %v2216_v58, %v6133_v56  ;;  %v2232_v24 = vadd.f32 %v2217_v27, %v7570_v36  ;;  %v2140_v18 = vpop.f32.mrf.mxu0 }
 0x547   :  { %v2234_v19 = vadd.f32 %v2218_v10, %v7572_v5  ;;  %v2235_v22 = vadd.f32 %v2219_v41, %v6153_v1  ;;  %v2236_v46 = vadd.f32 %v2220_v13, %v6158_v3  ;;  %v4143_v6 = vmul.f32 -1.442695, %v2233_v49 }
 0x548   :  { %v4139_v61 = vmul.f32 -1.442695, %v2229_v11  ;;  %v4140_v14 = vmul.f32 -1.442695, %v2230_v45  ;;  %v4141_v4 = vmul.f32 -1.442695, %v2231_v0 }
 0x549   :  { %v4142_v15 = vmul.f32 -1.442695, %v2232_v24  ;;  %5133 = vpow2.f32 %v4143_v6  ;;  %v4144_v51 = vmul.f32 -1.442695, %v2234_v19  ;;  %v4145_v9 = vmul.f32 -1.442695, %v2235_v22 }
 0x54a   :  { %5135 = vpow2.f32 %v4139_v61  ;;  %v4146_v58 = vmul.f32 -1.442695, %v2236_v46  ;;  %v2286_v27 = vrot.slane %v2140_v18, 4  ;;  %v2287_v29 = vrot.slane %v2140_v18, 5 }
 0x54b   :  { %5137 = vpow2.f32 %v4140_v14  ;;  %v2288_v10 = vrot.slane %v2140_v18, 6  ;;  %v2289_v41 = vrot.slane %v2140_v18, 7  ;;  %v2290_v24 = vrot.slane %v2140_v18, 1 }
 0x54c   :  { %5139 = vpow2.f32 %v4141_v4  ;;  %v2301_v49 = vadd.f32 %v2286_v27, %v6124_v43  ;;  %v2302_v45 = vadd.f32 %v2287_v29, %v6131_v39 }
 0x54d   :  { %5141 = vpow2.f32 %v4142_v15  ;;  %v2303_v6 = vadd.f32 %v2288_v10, %v6136_v30  ;;  %v2304_v61 = vadd.f32 %v2289_v41, %v6141_v60  ;;  %v2292_v41 = vrot.slane %v2140_v18, 3 }
 0x54e   :  { %5143 = vpow2.f32 %v4144_v51  ;;  %v4147_v14 = vmul.f32 -1.442695, %v2301_v49  ;;  %v4148_v22 = vmul.f32 -1.442695, %v2302_v45  ;;  %v2306_v49 = vadd.f32 %v2290_v24, %v7574_v7 }
 0x54f   :  { %5145 = vpow2.f32 %v4145_v9  ;;  %v4149_v46 = vmul.f32 -1.442695, %v2303_v6  ;;  %v4150_v4 = vmul.f32 -1.442695, %v2304_v61  ;;  %v2291_v9 = vrot.slane %v2140_v18, 2 }
 0x550   :  { %5147 = vpow2.f32 %v4146_v58  ;;  %v2305_v58 = vadd.f32 %v2140_v18, %v7573_v2 }
 0x551   :  { %5149 = vpow2.f32 %v4147_v14 }
 0x552   :  { %5151 = vpow2.f32 %v4148_v22 }
 0x553   :  { %5153 = vpow2.f32 %v4149_v46 }
 0x554   :  { %5155 = vpow2.f32 %v4150_v4  ;;  %v2307_v4 = vadd.f32 %v2291_v9, %v7660_v53 }
 0x556   :  { %v5134_v19 = vpop.eup %5133  ;;  %v4153_v18 = vmul.f32 -1.442695, %v2307_v4 }
 0x557   :  { %v5136_v11 = vpop.eup %5135  ;;  %v2265_v13 = vadd.f32 1.0, %v5134_v19  ;;  %v4151_v19 = vmul.f32 -1.442695, %v2305_v58 }
 0x558   :  { %v5138_v0 = vpop.eup %5137  ;;  %v2261_v15 = vadd.f32 1.0, %v5136_v11 }
 0x559   :  { %v5140_v29 = vpop.eup %5139  ;;  %v2262_v51 = vadd.f32 1.0, %v5138_v0  ;;  %5157 = vrcp.f32 %v2265_v13  ;;  %v2308_v13 = vadd.f32 %v2292_v41, %v7661_v25  ;;  %v4152_v0 = vmul.f32 -1.442695, %v2306_v49 }
 0x55a   :  { %v5142_v27 = vpop.eup %5141  ;;  %v2263_v10 = vadd.f32 1.0, %v5140_v29  ;;  %5159 = vrcp.f32 %v2261_v15  ;;  %v6951_v15 = vld [vmem:[%s7346_s4] ss:$0 sm:$0xff] }
 0x55b   :  { %v5144_v45 = vpop.eup %5143  ;;  %v2264_v6 = vadd.f32 1.0, %v5142_v27  ;;  %5161 = vrcp.f32 %v2262_v51  ;;  %7706 = vst [vmem:[#allocation62_spill] sm:$0xff] %v6951_v15  ;;  %v2357_v29 = vadd.f32 %v6951_v15, %v6930_v47  ;;  %v4154_v51 = vmul.f32 -1.442695, %v2308_v13 }
 0x55c   :  { %v5146_v61 = vpop.eup %5145  ;;  %v2266_v14 = vadd.f32 1.0, %v5144_v45  ;;  %5163 = vrcp.f32 %v2263_v10 }
 0x55d   :  { %v5148_v22 = vpop.eup %5147  ;;  %v2267_v46 = vadd.f32 1.0, %v5146_v61  ;;  %5165 = vrcp.f32 %v2264_v6  ;;  %v2359_v49 = vrot.slane %v2357_v29, 4  ;;  %v2360_v61 = vrot.slane %v2357_v29, 5 }
 0x55e   :  { %v2268_v11 = vadd.f32 1.0, %v5148_v22  ;;  %5167 = vrcp.f32 %v2266_v14  ;;  %v5150_v24 = vpop.eup %5149  ;;  %v2363_v15 = vrot.slane %v2357_v29, 1 }
 0x55f   :  { %5169 = vrcp.f32 %v2267_v46  ;;  %v5152_v9 = vpop.eup %5151  ;;  %v2333_v10 = vadd.f32 1.0, %v5150_v24  ;;  %v2361_v46 = vrot.slane %v2357_v29, 6 }
 0x560   :  { %5171 = vrcp.f32 %v2268_v11  ;;  %v5154_v58 = vpop.eup %5153  ;;  %v2334_v45 = vadd.f32 1.0, %v5152_v9  ;;  %v2362_v11 = vrot.slane %v2357_v29, 7 }
 0x561   :  { %5173 = vpow2.f32 %v4151_v19  ;;  %v5156_v27 = vpop.eup %5155 }
 0x562   :  { %5175 = vpow2.f32 %v4152_v0 }
 0x563   :  { %5177 = vpow2.f32 %v4153_v18 }
 0x564   :  { %5179 = vpow2.f32 %v4154_v51 }
 0x565   :  { %5181 = vrcp.f32 %v2333_v10 }
 0x566   :  { %v5158_v41 = vpop.eup %5157  ;;  %5183 = vrcp.f32 %v2334_v45  ;;  %v2336_v45 = vadd.f32 1.0, %v5156_v27 }
 0x567   :  { %v5160_v6 = vpop.eup %5159  ;;  %v2378_v14 = vmul.f32 %v5158_v41, %v2357_v29  ;;  %v2364_v41 = vrot.slane %v2357_v29, 2 }
 0x568   :  { %v5162_v22 = vpop.eup %5161  ;;  %v2374_v4 = vmul.f32 %v5160_v6, %v2359_v49  ;;  %v2365_v49 = vrot.slane %v2357_v29, 3 }
 0x569   :  { %v5164_v19 = vpop.eup %5163  ;;  %v2375_v47 = vmul.f32 %v5162_v22, %v2360_v61  ;;  %v2386_v13 = vadd.f32 %v2378_v14, %v7664_v28  ;;  %v2335_v14 = vadd.f32 1.0, %v5154_v58 }
 0x56a   :  { %v5166_v0 = vpop.eup %5165  ;;  %v2376_v18 = vmul.f32 %v5164_v19, %v2361_v46  ;;  %v2382_v24 = vadd.f32 %v2374_v4, %v6205_v52 }
 0x56b   :  { %v5168_v51 = vpop.eup %5167  ;;  %v2377_v9 = vmul.f32 %v5166_v0, %v2362_v11  ;;  %v2383_v25 = vadd.f32 %v2375_v47, %v6202_v55  ;;  %5185 = vtanh.f32 %v2386_v13 }
 0x56c   :  { %v5170_v53 = vpop.eup %5169  ;;  %5187 = vtanh.f32 %v2382_v24  ;;  %v2379_v6 = vmul.f32 %v5168_v51, %v2363_v15  ;;  %v2384_v10 = vadd.f32 %v2376_v18, %v7663_v23 }
 0x56d   :  { %v5172_v61 = vpop.eup %5171  ;;  %5189 = vtanh.f32 %v2383_v25  ;;  %v2380_v22 = vmul.f32 %v5170_v53, %v2364_v41  ;;  %v2385_v46 = vadd.f32 %v2377_v9, %v6208_v33 }
 0x56e   :  { %v5174_v4 = vpop.eup %5173  ;;  %v2381_v19 = vmul.f32 %v5172_v61, %v2365_v49  ;;  %v2387_v11 = vadd.f32 %v2379_v6, %v7665_v34  ;;  %5191 = vtanh.f32 %v2384_v10 }
 0x56f   :  { %v5176_v47 = vpop.eup %5175  ;;  %v2388_v13 = vadd.f32 %v2380_v22, %v7666_v62  ;;  %5193 = vtanh.f32 %v2385_v46  ;;  %v2337_v29 = vadd.f32 1.0, %v5174_v4 }
 0x570   :  { %v2389_v15 = vadd.f32 %v2381_v19, %v7667_v20  ;;  %5195 = vtanh.f32 %v2387_v11  ;;  %v5178_v25 = vpop.eup %5177  ;;  %v2338_v58 = vadd.f32 1.0, %v5176_v47 }
 0x571   :  { %5197 = vrcp.f32 %v2335_v14  ;;  %v5180_v53 = vpop.eup %5179  ;;  %v2339_v27 = vadd.f32 1.0, %v5178_v25 }
 0x572   :  { %5199 = vrcp.f32 %v2336_v45  ;;  %v5182_v0 = vpop.eup %5181  ;;  %v2340_v18 = vadd.f32 1.0, %v5180_v53 }
 0x573   :  { %5201 = vtanh.f32 %v2388_v13  ;;  %v5184_v24 = vpop.eup %5183 }
 0x574   :  { %5203 = vtanh.f32 %v2389_v15 }
 0x575   :  { %5205 = vrcp.f32 %v2337_v29 }
 0x576   :  { %5207 = vrcp.f32 %v2338_v58 }
 0x577   :  { %5209 = vrcp.f32 %v2339_v27 }
 0x578   :  { %v5186_v51 = vpop.eup %5185  ;;  %5211 = vrcp.f32 %v2340_v18 }
 0x579   :  { %v5188_v9 = vpop.eup %5187  ;;  %v2410_v41 = vrot.slane %v5186_v51, 1 }
 0x57a   :  { %v5190_v49 = vpop.eup %5189  ;;  %v2406_v6 = vrot.slane %v5188_v9, 1 }
 0x57b   :  { %v5192_v10 = vpop.eup %5191  ;;  %v2407_v61 = vrot.slane %v5190_v49, 1  ;;  %v2426_v14 = vsub.f32 %v6745_v21, %v2410_v41 }
 0x57c   :  { %v5194_v22 = vpop.eup %5193  ;;  %v2408_v46 = vrot.slane %v5192_v10, 1  ;;  %v2422_v4 = vsub.f32 %v6736_v31, %v2406_v6 }
 0x57d   :  { %v5196_v45 = vpop.eup %5195  ;;  %v2409_v19 = vrot.slane %v5194_v22, 1  ;;  %v2423_v11 = vsub.f32 %v6739_v16, %v2407_v61  ;;  %v2442_v27 = vrot.slane %v2426_v14, 7 }
 0x57e   :  { %v5198_v47 = vpop.eup %5197  ;;  %v2411_v13 = vrot.slane %v5196_v45, 1  ;;  %v2424_v15 = vsub.f32 %v6742_v59, %v2408_v46  ;;  %v2438_v29 = vrot.slane %v2422_v4, 7 }
 0x57f   :  { %v5200_v25 = vpop.eup %5199  ;;  %v2425_v58 = vsub.f32 %v6751_v8, %v2409_v19  ;;  %v2439_v53 = vrot.slane %v2423_v11, 7 }
 0x580   :  { %v5202_v18 = vpop.eup %5201  ;;  %v2427_v21 = vsub.f32 %v6748_v40, %v2411_v13  ;;  %v2440_v41 = vrot.slane %v2424_v15, 7  ;;  %v2454_v20 = vmul.f32 %v5182_v0, %v2438_v29 }
 0x581   :  { %v5204_v31 = vpop.eup %5203  ;;  %v2412_v6 = vrot.slane %v5202_v18, 1  ;;  %v2441_v62 = vrot.slane %v2425_v58, 7  ;;  %v2455_v28 = vmul.f32 %v5184_v24, %v2439_v53 }
 0x582   :  { %v5206_v16 = vpop.eup %5205  ;;  %v2413_v61 = vrot.slane %v5204_v31, 1  ;;  %v2443_v33 = vrot.slane %v2427_v21, 7  ;;  %v2456_v23 = vmul.f32 %v5198_v47, %v2440_v41  ;;  %v6969_v59 = vadd.f32 %v5188_v9, %v2454_v20 }
 0x583   :  { %v5208_v46 = vpop.eup %5207  ;;  %v2428_v8 = vsub.f32 %v6756_v42, %v2412_v6  ;;  %v2457_v4 = vmul.f32 %v5200_v25, %v2441_v62  ;;  %v2458_v14 = vmul.f32 %v5206_v16, %v2442_v27  ;;  %v6972_v19 = vadd.f32 %v5190_v49, %v2455_v28  ;;  %v7717_v6 = vld [vmem:[#allocation22_spill] sm:$0xff] }
 0x584   :  { %v2429_v40 = vsub.f32 %v6761_v35, %v2413_v61  ;;  %v2459_v0 = vmul.f32 %v5208_v46, %v2443_v33  ;;  %v6975_v11 = vadd.f32 %v5192_v10, %v2456_v23  ;;  %v2478_v24 = vrot.slane %v6969_v59, 4  ;;  %v5210_v9 = vpop.eup %5209  ;;  %v7718_v16 = vld [vmem:[#allocation34_spill] sm:$0xff]  ;;  %v7719_v61 = vld [vmem:[#allocation23_spill] sm:$0xff]  ;;  %v7720_v46 = vld [vmem:[#allocation24_spill] sm:$0xff] }
 0x585   :  { %v2444_v13 = vrot.slane %v2428_v8, 7  ;;  %v6978_v15 = vadd.f32 %v5194_v22, %v2457_v4  ;;  %v2479_v20 = vrot.slane %v6972_v19, 3  ;;  %v5212_v28 = vpop.eup %5211  ;;  %v6986_v49 = vadd.f32 %v5186_v51, %v2458_v14  ;;  %v7721_v8 = vld [vmem:[#allocation35_spill] sm:$0xff]  ;;  %v7722_v4 = vld [vmem:[#allocation25_spill] sm:$0xff]  ;;  %v7723_v14 = vld [vmem:[#allocation26_spill] sm:$0xff] }
 0x586   :  { %v2445_v47 = vrot.slane %v2429_v40, 7  ;;  %v6981_v29 = vadd.f32 %v5196_v45, %v2459_v0  ;;  %v2481_v62 = vrot.slane %v6975_v11, 2  ;;  %v7724_v40 = vld [vmem:[#allocation36_spill] sm:$0xff]  ;;  %v7725_v0 = vld [vmem:[#allocation27_spill] sm:$0xff] }
 0x587   :  { %v2460_v42 = vmul.f32 %v5210_v9, %v2444_v13  ;;  %v2480_v35 = vsel %vm788_vm3, %v2479_v20, %v2478_v24  ;;  %v2483_v33 = vrot.slane %v6978_v15, 1  ;;  %v7726_v24 = vld [vmem:[#allocation28_spill] sm:$0xff]  ;;  %v7727_v13 = vld [vmem:[#allocation37_spill] sm:$0xff]  ;;  %v7729_v9 = vld [vmem:[#allocation30_spill] sm:$0xff] }
 0x588   :  { %v2461_v23 = vmul.f32 %v5212_v28, %v2445_v47  ;;  %v2482_v10 = vsel %vm791_vm4, %v2481_v62, %v2480_v35  ;;  %v2486_v45 = vrot.slane %v6981_v29, 7  ;;  %v7728_v20 = vld [vmem:[#allocation29_spill] sm:$0xff]  ;;  %v7730_v47 = vld [vmem:[#allocation38_spill] sm:$0xff]  ;;  %v7731_v62 = vld [vmem:[#allocation40_spill] sm:$0xff] }
 0x589   :  { %v6989_v22 = vadd.f32 %v5202_v18, %v2460_v42  ;;  %v2484_v25 = vsel %vm794_vm5, %v2483_v33, %v2482_v10  ;;  %v7732_v28 = vld [vmem:[#allocation39_spill] sm:$0xff]  ;;  %v7733_v42 = vld [vmem:[#allocation41_spill] sm:$0xff]  ;;  %v7734_v35 = vld [vmem:[#allocation44_spill] sm:$0xff] }
 0x58a   :  { %v6993_v58 = vadd.f32 %v5204_v31, %v2461_v23  ;;  %v2485_v53 = vsel %vm797_vm6, %v6986_v49, %v2484_v25  ;;  %v7716_v31 = vld [vmem:[#allocation21_spill] sm:$0xff]  ;;  %v7735_v33 = vld [vmem:[#allocation43_spill] sm:$0xff]  ;;  %v7737_v10 = vld [vmem:[#allocation48_spill] sm:$0xff] }
 0x58b   :  { %v2487_v27 = vsel %vm800_vm7, %v2486_v45, %v2485_v53  ;;  %v2488_v21 = vrot.slane %v6989_v22, 6  ;;  %v7736_v23 = vld [vmem:[#allocation45_spill] sm:$0xff]  ;;  %v7738_v25 = vld [vmem:[#allocation55_spill] sm:$0xff]  ;;  %v7739_v45 = vld [vmem:[#allocation56_spill] sm:$0xff] }
 0x58c   :  { %v2490_v51 = vrot.slane %v6993_v58, 5  ;;  %v7740_v53 = vld [vmem:[#allocation57_spill] sm:$0xff] }
 0x58d   :  { %v2489_v41 = vsel %vm803_vm8, %v2488_v21, %v2487_v27  ;;  %v7741_v27 = vld [vmem:[#allocation58_spill] sm:$0xff]  ;;  %v7742_v21 = vld [vmem:[#allocation59_spill] sm:$0xff] }
 0x58e   :  { %v2491_v18 = vsel %vm806_vm9, %v2490_v51, %v2489_v41  ;;  %v7743_v51 = vld [vmem:[#allocation60_spill] sm:$0xff]  ;;  %v7744_v41 = vld [vmem:[#allocation61_spill] sm:$0xff] }
 0x58f   :  { %2558 = vmatmul.mubr.f32.vlgmr.msra.gmra.mxu0 %v2491_v18  ;;  %4624 = vmatmul.mubr.f32.vlgmr.msra.gmra.mxu1 %v2491_v18  ;;  %v5551_v18 = vld [vmem:[#allocation2 + $0x170] sm:$0xff] }
 0x590   :  { %2915 = vmatpush1.msra.mxu0 %v6769_v63  ;;  %4627 = vmatpush3.msra.mxu1 %v6772_v48  ;;  %v7707_v63 = vld [vmem:[#allocation15_spill] sm:$0xff]  ;;  %v7708_v48 = vld [vmem:[#allocation16_spill] sm:$0xff] }
 0x591   :  { %2916 = vmatprep.subr.mxu0 %v6775_v32  ;;  %4628 = vmatprep.subr.mxu1 %v7543_v37  ;;  %v7709_v32 = vld [vmem:[#allocation31_spill] sm:$0xff] }
 0x592   :  { %2917 = vmatpush1.msra.mxu0 %v6779_v12  ;;  %4629 = vmatpush3.msra.mxu1 %v6782_v50  ;;  %v7710_v12 = vld [vmem:[#allocation17_spill] sm:$0xff]  ;;  %v7711_v50 = vld [vmem:[#allocation18_spill] sm:$0xff] }
 0x593   :  { %2918 = vmatprep.subr.mxu0 %v6785_v54  ;;  %4630 = vmatprep.subr.mxu1 %v7543_v37  ;;  %v7712_v54 = vld [vmem:[#allocation32_spill] sm:$0xff] }
 0x594   :  { %2919 = vmatpush1.msra.mxu0 %v6789_v26  ;;  %4631 = vmatpush3.msra.mxu1 %v6792_v44  ;;  %v7713_v26 = vld [vmem:[#allocation19_spill] sm:$0xff]  ;;  %v7714_v44 = vld [vmem:[#allocation20_spill] sm:$0xff] }
 0x595   :  { %2920 = vmatprep.subr.mxu0 %v6795_v17  ;;  %4632 = vmatprep.subr.mxu1 %v7543_v37  ;;  %v7715_v17 = vld [vmem:[#allocation33_spill] sm:$0xff] }
 0x596   :  { %2921 = vmatpush1.msra.mxu0 %v7707_v63  ;;  %4633 = vmatpush3.msra.mxu1 %v7708_v48 }
 0x597   :  { %2922 = vmatprep.subr.mxu0 %v7709_v32  ;;  %4634 = vmatprep.subr.mxu1 %v7543_v37 }
 0x598   :  { %2923 = vmatpush1.msra.mxu0 %v7710_v12  ;;  %4635 = vmatpush3.msra.mxu1 %v7711_v50 }
 0x599   :  { %2924 = vmatprep.subr.mxu0 %v7712_v54  ;;  %4636 = vmatprep.subr.mxu1 %v7543_v37 }
 0x59a   :  { %2925 = vmatpush1.msra.mxu0 %v7713_v26  ;;  %4637 = vmatpush3.msra.mxu1 %v7714_v44 }
 0x59b   :  { %2926 = vmatprep.subr.mxu0 %v7715_v17  ;;  %4638 = vmatprep.subr.mxu1 %v7543_v37 }
 0x59c   :  { %2927 = vmatpush1.msra.mxu0 %v7716_v31  ;;  %4639 = vmatpush3.msra.mxu1 %v7717_v6 }
 0x59d   :  { %2928 = vmatprep.subr.mxu0 %v7718_v16  ;;  %4640 = vmatprep.subr.mxu1 %v7543_v37 }
 0x59e   :  { %2929 = vmatpush1.msra.mxu0 %v7719_v61  ;;  %4641 = vmatpush3.msra.mxu1 %v7720_v46 }
 0x59f   :  { %2930 = vmatprep.subr.mxu0 %v7721_v8  ;;  %4642 = vmatprep.subr.mxu1 %v7543_v37 }
 0x5a0   :  { %2931 = vmatpush1.msra.mxu0 %v7722_v4  ;;  %4643 = vmatpush3.msra.mxu1 %v7723_v14  ;;  %v7745_v4 = vld [vmem:[#allocation42_spill] sm:$0xff] }
 0x5a1   :  { %2932 = vmatprep.subr.mxu0 %v7724_v40  ;;  %4644 = vmatprep.subr.mxu1 %v7543_v37 }
 0x5a2   :  { %2933 = vmatpush1.msra.mxu0 %v7725_v0  ;;  %4645 = vmatpush3.msra.mxu1 %v7726_v24 }
 0x5a3   :  { %2934 = vmatprep.subr.mxu0 %v7727_v13  ;;  %4646 = vmatprep.subr.mxu1 %v7543_v37 }
 0x5a4   :  { %2935 = vmatpush1.msra.mxu0 %v7728_v20  ;;  %4647 = vmatpush3.msra.mxu1 %v7729_v9 }
 0x5a5   :  { %2936 = vmatprep.subr.mxu0 %v7730_v47  ;;  %4648 = vmatprep.subr.mxu1 %v7543_v37 }
 0x5a6   :  { %2937 = vmatpush1.msra.mxu0 %v7731_v62  ;;  %4649 = vmatpush3.msra.mxu1 %v7732_v28 }
 0x5a7   :  { %2938 = vmatprep.subr.mxu0 %v7733_v42  ;;  %4650 = vmatprep.subr.mxu1 %v7543_v37 }
 0x5a8   :  { %2939 = vmatpush1.msra.mxu0 %v7734_v35  ;;  %4651 = vmatpush3.msra.mxu1 %v7735_v33 }
 0x5a9   :  { %2940 = vmatprep.subr.mxu0 %v7736_v23  ;;  %4652 = vmatprep.subr.mxu1 %v7543_v37 }
 0x5aa   :  { %2941 = vmatpush1.msra.mxu0 %v7737_v10  ;;  %4653 = vmatpush3.msra.mxu1 %v7738_v25 }
 0x5ab   :  { %2942 = vmatprep.subr.mxu0 %v7739_v45  ;;  %4654 = vmatprep.subr.mxu1 %v7543_v37 }
 0x5ac   :  { %2943 = vmatpush1.msra.mxu0 %v7740_v53  ;;  %4655 = vmatpush3.msra.mxu1 %v7741_v27 }
 0x5ad   :  { %2944 = vmatprep.subr.mxu0 %v7742_v21  ;;  %4656 = vmatprep.subr.mxu1 %v7543_v37 }
 0x5ae   :  { %2945 = vmatpush1.msra.mxu0 %v7743_v51  ;;  %2978 = vmatprep.mubr.f32.mxu0 %v7543_v37 }
 0x5af   :  { %4657 = vmatpush3.msra.mxu1 %v7744_v41  ;;  %4658 = vmatprep.mubr.msk.f32.mxu1 %vm5717_vm2, %v7543_v37 }
 0x5b0   :  { %3335 = vmatprep.subr.mxu0 %v5551_v18  ;;  %4661 = vmatprep.subr.mxu1 %v7543_v37 }
 0x64f   :  { %v2559_v63 = vpop.f32.mrf.mxu0  ;;  %v7068_v48 = vpop.f32.mrf.mxu1 }
 0x650   :  { %v2635_v32 = vrot.slane %v2559_v63, 3  ;;  %v2636_v12 = vrot.slane %v2559_v63, 4  ;;  %v2637_v50 = vrot.slane %v2559_v63, 5  ;;  %v2638_v54 = vrot.slane %v2559_v63, 6 }
 0x651   :  { %v2639_v26 = vrot.slane %v2559_v63, 7  ;;  %v2640_v44 = vrot.slane %v2559_v63, 1  ;;  %v2641_v17 = vrot.slane %v2559_v63, 2  ;;  %v2655_v31 = vadd.f32 %v2559_v63, %v7572_v5  ;;  %v4625_v6 = vpop.f32.mrf.mxu1  ;;  %v2561_v62 = vpop.f32.mrf.mxu0 }
 0x652   :  { %v2650_v16 = vadd.f32 %v2635_v32, %v7569_v38  ;;  %v2651_v61 = vadd.f32 %v2636_v12, %v7568_v57  ;;  %v2652_v46 = vadd.f32 %v2637_v50, %v6133_v56  ;;  %v2653_v8 = vadd.f32 %v2638_v54, %v7570_v36 }
 0x653   :  { %v2654_v14 = vadd.f32 %v2639_v26, %v7745_v4  ;;  %v2656_v40 = vadd.f32 %v2640_v44, %v6153_v1  ;;  %v2657_v0 = vadd.f32 %v2641_v17, %v6158_v3  ;;  %v4160_v24 = vmul.f32 -1.442695, %v2655_v31 }
 0x654   :  { %v4155_v13 = vmul.f32 -1.442695, %v2650_v16  ;;  %v4156_v20 = vmul.f32 -1.442695, %v2651_v61  ;;  %v4157_v9 = vmul.f32 -1.442695, %v2652_v46 }
 0x655   :  { %v4158_v47 = vmul.f32 -1.442695, %v2653_v8  ;;  %5213 = vpow2.f32 %v4160_v24  ;;  %v4159_v28 = vmul.f32 -1.442695, %v2654_v14  ;;  %v4161_v42 = vmul.f32 -1.442695, %v2656_v40 }
 0x656   :  { %5215 = vpow2.f32 %v4155_v13  ;;  %v4162_v35 = vmul.f32 -1.442695, %v2657_v0  ;;  %v2707_v33 = vrot.slane %v2561_v62, 3  ;;  %v2708_v23 = vrot.slane %v2561_v62, 4 }
 0x657   :  { %5217 = vpow2.f32 %v4156_v20  ;;  %v2709_v10 = vrot.slane %v2561_v62, 5  ;;  %v2710_v41 = vrot.slane %v2561_v62, 6  ;;  %v2711_v63 = vrot.slane %v2561_v62, 7 }
 0x658   :  { %5219 = vpow2.f32 %v4157_v9  ;;  %v2722_v25 = vadd.f32 %v2707_v33, %v6124_v43  ;;  %v2723_v45 = vadd.f32 %v2708_v23, %v6131_v39  ;;  %v2712_v17 = vrot.slane %v2561_v62, 1  ;;  %v7746_v9 = vld [vmem:[#allocation46_spill] sm:$0xff] }
 0x659   :  { %5221 = vpow2.f32 %v4158_v47  ;;  %v2724_v53 = vadd.f32 %v2709_v10, %v6136_v30  ;;  %v2725_v31 = vadd.f32 %v2710_v41, %v6141_v60  ;;  %v2713_v61 = vrot.slane %v2561_v62, 2 }
 0x65a   :  { %5223 = vpow2.f32 %v4159_v28  ;;  %v4163_v27 = vmul.f32 -1.442695, %v2722_v25  ;;  %v4164_v21 = vmul.f32 -1.442695, %v2723_v45  ;;  %v2726_v46 = vadd.f32 %v2711_v63, %v7573_v2 }
 0x65b   :  { %5225 = vpow2.f32 %v4161_v42  ;;  %v4165_v51 = vmul.f32 -1.442695, %v2724_v53  ;;  %v2727_v40 = vadd.f32 %v2561_v62, %v7574_v7  ;;  %v2728_v47 = vadd.f32 %v2712_v17, %v7746_v9  ;;  %v7748_v62 = vld [vmem:[#allocation62_spill] sm:$0xff] }
 0x65c   :  { %5227 = vpow2.f32 %v4162_v35  ;;  %v4166_v28 = vmul.f32 -1.442695, %v2725_v31  ;;  %v7747_v35 = vld [vmem:[#allocation47_spill] sm:$0xff]  ;;  %v4167_v23 = vmul.f32 -1.442695, %v2726_v46  ;;  %v2778_v45 = vadd.f32 %v7748_v62, %v7068_v48 }
 0x65d   :  { %5229 = vpow2.f32 %v4163_v27  ;;  %v2729_v33 = vadd.f32 %v2713_v61, %v7747_v35  ;;  %v4168_v10 = vmul.f32 -1.442695, %v2727_v40  ;;  %v4169_v25 = vmul.f32 -1.442695, %v2728_v47 }
 0x65e   :  { %5231 = vpow2.f32 %v4164_v21  ;;  %v2783_v31 = vrot.slane %v2778_v45, 6  ;;  %v2784_v61 = vrot.slane %v2778_v45, 7 }
 0x65f   :  { %5233 = vpow2.f32 %v4165_v51  ;;  %v4170_v53 = vmul.f32 -1.442695, %v2729_v33 }
 0x662   :  { %v5214_v18 = vpop.eup %5213 }
 0x663   :  { %v5216_v32 = vpop.eup %5215  ;;  %v2687_v12 = vadd.f32 1.0, %v5214_v18  ;;  %v2780_v18 = vrot.slane %v2778_v45, 3 }
 0x664   :  { %v5218_v50 = vpop.eup %5217  ;;  %v2682_v54 = vadd.f32 1.0, %v5216_v32 }
 0x665   :  { %v5220_v26 = vpop.eup %5219  ;;  %v2683_v44 = vadd.f32 1.0, %v5218_v50  ;;  %5235 = vrcp.f32 %v2687_v12  ;;  %v2781_v12 = vrot.slane %v2778_v45, 4 }
 0x666   :  { %v5222_v6 = vpop.eup %5221  ;;  %v2684_v16 = vadd.f32 1.0, %v5220_v26  ;;  %5237 = vrcp.f32 %v2682_v54  ;;  %v2782_v26 = vrot.slane %v2778_v45, 5 }
 0x667   :  { %v5224_v8 = vpop.eup %5223  ;;  %v2685_v14 = vadd.f32 1.0, %v5222_v6  ;;  %5239 = vrcp.f32 %v2683_v44 }
 0x668   :  { %v5226_v0 = vpop.eup %5225  ;;  %v2686_v24 = vadd.f32 1.0, %v5224_v8  ;;  %5241 = vrcp.f32 %v2684_v16 }
 0x669   :  { %v5228_v13 = vpop.eup %5227  ;;  %v2688_v20 = vadd.f32 1.0, %v5226_v0  ;;  %5243 = vrcp.f32 %v2685_v14 }
 0x66a   :  { %v2689_v42 = vadd.f32 1.0, %v5228_v13  ;;  %5245 = vrcp.f32 %v2686_v24  ;;  %v5230_v27 = vpop.eup %5229  ;;  %v2785_v24 = vrot.slane %v2778_v45, 1 }
 0x66b   :  { %5247 = vrcp.f32 %v2688_v20  ;;  %v5232_v21 = vpop.eup %5231  ;;  %v2754_v63 = vadd.f32 1.0, %v5230_v27  ;;  %v2786_v20 = vrot.slane %v2778_v45, 2 }
 0x66c   :  { %5249 = vrcp.f32 %v2689_v42  ;;  %v5234_v51 = vpop.eup %5233 }
 0x66d   :  { %5251 = vpow2.f32 %v4166_v28  ;;  %v7749_v28 = vld [vmem:[#allocation50_spill] sm:$0xff]  ;;  %v2756_v27 = vadd.f32 1.0, %v5234_v51 }
 0x66e   :  { %5253 = vpow2.f32 %v4167_v23  ;;  %v2755_v23 = vadd.f32 1.0, %v5232_v21 }
 0x66f   :  { %5255 = vpow2.f32 %v4168_v10 }
 0x670   :  { %5257 = vpow2.f32 %v4169_v25  ;;  %v7750_v25 = vld [vmem:[#allocation49_spill] sm:$0xff] }
 0x671   :  { %5259 = vpow2.f32 %v4170_v53 }
 0x672   :  { %v5236_v41 = vpop.eup %5235  ;;  %5261 = vrcp.f32 %v2754_v63 }
 0x673   :  { %v5238_v32 = vpop.eup %5237  ;;  %v2800_v50 = vmul.f32 %v5236_v41, %v2778_v45 }
 0x674   :  { %v5240_v54 = vpop.eup %5239  ;;  %v2795_v44 = vmul.f32 %v5238_v32, %v2780_v18  ;;  %v7751_v18 = vld [vmem:[#allocation51_spill] sm:$0xff] }
 0x675   :  { %v5242_v17 = vpop.eup %5241  ;;  %v2796_v48 = vmul.f32 %v5240_v54, %v2781_v12  ;;  %v2808_v6 = vadd.f32 %v2800_v50, %v7665_v34  ;;  %v7752_v12 = vld [vmem:[#allocation53_spill] sm:$0xff]  ;;  %v7753_v54 = vld [vmem:[#allocation54_spill] sm:$0xff] }
 0x676   :  { %v5244_v16 = vpop.eup %5243  ;;  %v2797_v46 = vmul.f32 %v5242_v17, %v2782_v26  ;;  %v2803_v8 = vadd.f32 %v2795_v44, %v6205_v52 }
 0x677   :  { %v5246_v14 = vpop.eup %5245  ;;  %v2798_v40 = vmul.f32 %v5244_v16, %v2783_v31  ;;  %v2804_v0 = vadd.f32 %v2796_v48, %v6202_v55  ;;  %5263 = vtanh.f32 %v2808_v6 }
 0x678   :  { %v5248_v13 = vpop.eup %5247  ;;  %5265 = vtanh.f32 %v2803_v8  ;;  %v2799_v47 = vmul.f32 %v5246_v14, %v2784_v61  ;;  %v2805_v42 = vadd.f32 %v2797_v46, %v7749_v28 }
 0x679   :  { %v5250_v33 = vpop.eup %5249  ;;  %5267 = vtanh.f32 %v2804_v0  ;;  %v2801_v10 = vmul.f32 %v5248_v13, %v2785_v24  ;;  %v2806_v62 = vadd.f32 %v2798_v40, %v7750_v25 }
 0x67a   :  { %v5252_v53 = vpop.eup %5251  ;;  %v2802_v41 = vmul.f32 %v5250_v33, %v2786_v20  ;;  %v2807_v63 = vadd.f32 %v2799_v47, %v7751_v18  ;;  %5269 = vtanh.f32 %v2805_v42 }
 0x67b   :  { %v5254_v32 = vpop.eup %5253  ;;  %v2809_v50 = vadd.f32 %v2801_v10, %v7752_v12  ;;  %5271 = vtanh.f32 %v2806_v62  ;;  %v2757_v44 = vadd.f32 1.0, %v5252_v53 }
 0x67c   :  { %v5256_v45 = vpop.eup %5255  ;;  %v2810_v26 = vadd.f32 %v2802_v41, %v7753_v54  ;;  %5273 = vtanh.f32 %v2807_v63  ;;  %v2758_v17 = vadd.f32 1.0, %v5254_v32 }
 0x67d   :  { %5275 = vrcp.f32 %v2755_v23  ;;  %v5258_v21 = vpop.eup %5257  ;;  %v2759_v48 = vadd.f32 1.0, %v5256_v45 }
 0x67e   :  { %5277 = vrcp.f32 %v2756_v27  ;;  %v5260_v31 = vpop.eup %5259  ;;  %v2760_v51 = vadd.f32 1.0, %v5258_v21 }
 0x67f   :  { %5279 = vtanh.f32 %v2809_v50  ;;  %v2761_v6 = vadd.f32 1.0, %v5260_v31  ;;  %v5262_v16 = vpop.eup %5261 }
 0x680   :  { %5281 = vtanh.f32 %v2810_v26 }
 0x681   :  { %5283 = vrcp.f32 %v2757_v44 }
 0x682   :  { %5285 = vrcp.f32 %v2758_v17 }
 0x683   :  { %5287 = vrcp.f32 %v2759_v48 }
 0x684   :  { %v5264_v61 = vpop.eup %5263  ;;  %5289 = vrcp.f32 %v2760_v51 }
 0x685   :  { %v5266_v46 = vpop.eup %5265  ;;  %v2832_v8 = vrot.slane %v5264_v61, 1  ;;  %5291 = vrcp.f32 %v2761_v6 }
 0x686   :  { %v5268_v14 = vpop.eup %5267  ;;  %v2827_v40 = vrot.slane %v5266_v46, 1 }
 0x687   :  { %v5270_v0 = vpop.eup %5269  ;;  %v2828_v24 = vrot.slane %v5268_v14, 1  ;;  %v2848_v10 = vsub.f32 %v6981_v29, %v2832_v8 }
 0x688   :  { %v5272_v13 = vpop.eup %5271  ;;  %v2829_v20 = vrot.slane %v5270_v0, 1  ;;  %v2843_v47 = vsub.f32 %v6969_v59, %v2827_v40 }
 0x689   :  { %v5274_v42 = vpop.eup %5273  ;;  %v2830_v33 = vrot.slane %v5272_v13, 1  ;;  %v2844_v23 = vsub.f32 %v6972_v19, %v2828_v24  ;;  %v2864_v19 = vrot.slane %v2848_v10, 7 }
 0x68a   :  { %v5276_v62 = vpop.eup %5275  ;;  %v2831_v53 = vrot.slane %v5274_v42, 1  ;;  %v2845_v27 = vsub.f32 %v6975_v11, %v2829_v20  ;;  %v2859_v41 = vrot.slane %v2843_v47, 7 }
 0x68b   :  { %v5278_v63 = vpop.eup %5277  ;;  %v2846_v32 = vsub.f32 %v6978_v15, %v2830_v33  ;;  %v2860_v50 = vrot.slane %v2844_v23, 7 }
 0x68c   :  { %v5280_v45 = vpop.eup %5279  ;;  %v2847_v26 = vsub.f32 %v6986_v49, %v2831_v53  ;;  %v2861_v44 = vrot.slane %v2845_v27, 7  ;;  %v2875_v59 = vmul.f32 %v5262_v16, %v2859_v41 }
 0x68d   :  { %v5282_v21 = vpop.eup %5281  ;;  %v2833_v17 = vrot.slane %v5280_v45, 1  ;;  %v2862_v31 = vrot.slane %v2846_v32, 7  ;;  %v2876_v48 = vmul.f32 %v5276_v62, %v2860_v50 }
 0x68e   :  { %v5284_v29 = vpop.eup %5283  ;;  %v2834_v51 = vrot.slane %v5282_v21, 1  ;;  %v2863_v6 = vrot.slane %v2847_v26, 7  ;;  %v2877_v8 = vmul.f32 %v5278_v63, %v2861_v44  ;;  %v7102_v11 = vadd.f32 %v5266_v46, %v2875_v59 }
 0x68f   :  { %v5286_v40 = vpop.eup %5285  ;;  %v2849_v15 = vsub.f32 %v6989_v22, %v2833_v17  ;;  %v2878_v24 = vmul.f32 %v5284_v29, %v2862_v31  ;;  %v7105_v20 = vadd.f32 %v5268_v14, %v2876_v48 }
 0x690   :  { %v5288_v49 = vpop.eup %5287  ;;  %v2850_v16 = vsub.f32 %v6993_v58, %v2834_v51  ;;  %v2879_v47 = vmul.f32 %v5286_v40, %v2863_v6  ;;  %v7108_v33 = vadd.f32 %v5270_v0, %v2877_v8  ;;  %v2899_v23 = vrot.slane %v7102_v11, 5  ;;  %v5553_v6 = vld [vmem:[#allocation2 + $0x178] sm:$0xff]  ;;  %v5555_v8 = vld [vmem:[#allocation2 + $0x150] sm:$0xff]  ;;  %v5556_v40 = vld [vmem:[#allocation2 + $0x160] sm:$0xff] }
 0x691   :  { %v2865_v10 = vrot.slane %v2849_v15, 7  ;;  %v2880_v62 = vmul.f32 %v5288_v49, %v2864_v19  ;;  %v7111_v53 = vadd.f32 %v5272_v13, %v2878_v24  ;;  %v2900_v46 = vrot.slane %v7105_v20, 4  ;;  %v5290_v27 = vpop.eup %5289  ;;  %v5557_v15 = vld [vmem:[#allocation2 + $0x140] sm:$0xff]  ;;  %v5558_v24 = vld [vmem:[#allocation2 + $0x138] sm:$0xff]  ;;  %v5559_v49 = vld [vmem:[#allocation2 + $0x148] sm:$0xff] }
 0x692   :  { %v2866_v41 = vrot.slane %v2850_v16, 7  ;;  %v7114_v22 = vadd.f32 %v5274_v42, %v2879_v47  ;;  %v2902_v14 = vrot.slane %v7108_v33, 3  ;;  %v5292_v63 = vpop.eup %5291  ;;  %v5560_v16 = vld [vmem:[#allocation2 + $0x128] sm:$0xff]  ;;  %v5561_v47 = vld [vmem:[#allocation2 + $0x120] sm:$0xff] }
 0x693   :  { %v2881_v32 = vmul.f32 %v5290_v27, %v2865_v10  ;;  %v2901_v58 = vsel %vm788_vm3, %v2900_v46, %v2899_v23  ;;  %v2904_v0 = vrot.slane %v7111_v53, 2  ;;  %v7121_v44 = vadd.f32 %v5264_v61, %v2880_v62  ;;  %v5562_v23 = vld [vmem:[#allocation2 + $0x130] sm:$0xff]  ;;  %v5564_v62 = vld [vmem:[#allocation2 + $0x108] sm:$0xff]  ;;  %v5565_v46 = vld [vmem:[#allocation2 + $0x118] sm:$0xff] }
 0x694   :  { %v2882_v50 = vmul.f32 %v5292_v63, %v2866_v41  ;;  %v2903_v26 = vsel %vm791_vm4, %v2902_v14, %v2901_v58  ;;  %v2906_v13 = vrot.slane %v7114_v22, 1  ;;  %v5563_v10 = vld [vmem:[#allocation2 + $0x110] sm:$0xff]  ;;  %v5566_v27 = vld [vmem:[#allocation2 + $0xf8] sm:$0xff]  ;;  %v5568_v14 = vld [vmem:[#allocation2 + $0x100] sm:$0xff] }
 0x695   :  { %v7123_v59 = vadd.f32 %v5280_v45, %v2881_v32  ;;  %v2905_v42 = vsel %vm794_vm5, %v2904_v0, %v2903_v26  ;;  %v5552_v45 = vld [vmem:[#allocation2 + $0x168] sm:$0xff]  ;;  %v5567_v41 = vld [vmem:[#allocation2 + $0xf0] sm:$0xff]  ;;  %v5569_v63 = vld [vmem:[#allocation2 + $0xe0] sm:$0xff] }
 0x696   :  { %v7126_v17 = vadd.f32 %v5282_v21, %v2882_v50  ;;  %v2907_v31 = vsel %vm797_vm6, %v2906_v13, %v2905_v42  ;;  %v5554_v21 = vld [vmem:[#allocation2 + $0x158] sm:$0xff]  ;;  %v5571_v58 = vld [vmem:[#allocation2 + $0xe8] sm:$0xff]  ;;  %v5573_v50 = vld [vmem:[#allocation2 + $0xc0] sm:$0xff] }
 0x697   :  { %v2908_v19 = vsel %vm800_vm7, %v7121_v44, %v2907_v31  ;;  %v2909_v48 = vrot.slane %v7123_v59, 7  ;;  %v5570_v32 = vld [vmem:[#allocation2 + $0xd8] sm:$0xff]  ;;  %v5572_v0 = vld [vmem:[#allocation2 + $0xc8] sm:$0xff]  ;;  %v5574_v26 = vld [vmem:[#allocation2 + $0xd0] sm:$0xff] }
 0x698   :  { %v2911_v29 = vrot.slane %v7126_v17, 6  ;;  %v5575_v13 = vld [vmem:[#allocation2 + $0xb0] sm:$0xff]  ;;  %v5576_v42 = vld [vmem:[#allocation2 + $0xa8] sm:$0xff]  ;;  %v5577_v31 = vld [vmem:[#allocation2 + $0xb8] sm:$0xff] }
 0x699   :  { %v2910_v51 = vsel %vm803_vm8, %v2909_v48, %v2908_v19  ;;  %v5578_v19 = vld [vmem:[#allocation2 + $0x98] sm:$0xff]  ;;  %v5579_v48 = vld [vmem:[#allocation2 + $0x90] sm:$0xff] }
 0x69a   :  { %v2912_v61 = vsel %vm806_vm9, %v2911_v29, %v2910_v51  ;;  %v5580_v29 = vld [vmem:[#allocation2 + $0xa0] sm:$0xff] }
 0x69b   :  { %2979 = vmatmul.mubr.f32.vlgmr.msra.gmra.mxu0 %v2912_v61  ;;  %4659 = vmatmul.mubr.f32.vlgmr.msra.gmra.mxu1 %v2912_v61  ;;  %v5581_v51 = vld [vmem:[#allocation2 + $0x80] sm:$0xff]  ;;  %v5582_v61 = vld [vmem:[#allocation2 + $0x78] sm:$0xff] }
 0x69c   :  { %3336 = vmatpush1.msra.mxu0 %v5552_v45  ;;  %4662 = vmatpush3.msra.mxu1 %v5553_v6  ;;  %v5583_v45 = vld [vmem:[#allocation2 + $0x88] sm:$0xff] }
 0x69d   :  { %3337 = vmatprep.subr.mxu0 %v5554_v21  ;;  %4663 = vmatprep.subr.mxu1 %v7543_v37  ;;  %v5584_v6 = vld [vmem:[#allocation2 + $0x68] sm:$0xff]  ;;  %v5585_v21 = vld [vmem:[#allocation2 + $0x60] sm:$0xff] }
 0x69e   :  { %3338 = vmatpush1.msra.mxu0 %v5555_v8  ;;  %4664 = vmatpush3.msra.mxu1 %v5556_v40  ;;  %v5586_v8 = vld [vmem:[#allocation2 + $0x70] sm:$0xff] }
 0x69f   :  { %3339 = vmatprep.subr.mxu0 %v5557_v15  ;;  %4665 = vmatprep.subr.mxu1 %v7543_v37  ;;  %v5587_v40 = vld [vmem:[#allocation2 + $0x50] sm:$0xff]  ;;  %v5588_v15 = vld [vmem:[#allocation2 + $0x48] sm:$0xff] }
 0x6a0   :  { %3340 = vmatpush1.msra.mxu0 %v5558_v24  ;;  %4666 = vmatpush3.msra.mxu1 %v5559_v49  ;;  %v5589_v24 = vld [vmem:[#allocation2 + $0x58] sm:$0xff] }
 0x6a1   :  { %3341 = vmatprep.subr.mxu0 %v5560_v16  ;;  %4667 = vmatprep.subr.mxu1 %v7543_v37  ;;  %v5590_v49 = vld [vmem:[#allocation2 + $0x38] sm:$0xff]  ;;  %v5591_v16 = vld [vmem:[#allocation2 + $0x30] sm:$0xff] }
 0x6a2   :  { %3342 = vmatpush1.msra.mxu0 %v5561_v47  ;;  %4668 = vmatpush3.msra.mxu1 %v5562_v23  ;;  %v5592_v47 = vld [vmem:[#allocation2 + $0x40] sm:$0xff] }
 0x6a3   :  { %3343 = vmatprep.subr.mxu0 %v5563_v10  ;;  %4669 = vmatprep.subr.mxu1 %v7543_v37  ;;  %v5593_v23 = vld [vmem:[#allocation2 + $0x20] sm:$0xff]  ;;  %v5594_v10 = vld [vmem:[#allocation2 + $0x18] sm:$0xff] }
 0x6a4   :  { %3344 = vmatpush1.msra.mxu0 %v5564_v62  ;;  %4670 = vmatpush3.msra.mxu1 %v5565_v46  ;;  %v5595_v62 = vld [vmem:[#allocation2 + $0x28] sm:$0xff] }
 0x6a5   :  { %3345 = vmatprep.subr.mxu0 %v5566_v27  ;;  %4671 = vmatprep.subr.mxu1 %v7543_v37  ;;  %v5596_v46 = vld [vmem:[#allocation2 + $0x8] sm:$0xff]  ;;  %v5597_v27 = vld [vmem:[#allocation2] sm:$0xff] }
 0x6a6   :  { %3346 = vmatpush1.msra.mxu0 %v5567_v41  ;;  %4672 = vmatpush3.msra.mxu1 %v5568_v14  ;;  %v5598_v41 = vld [vmem:[#allocation2 + $0x10] sm:$0xff] }
 0x6a7   :  { %3347 = vmatprep.subr.mxu0 %v5569_v63  ;;  %4673 = vmatprep.subr.mxu1 %v7543_v37 }
 0x6a8   :  { %3348 = vmatpush1.msra.mxu0 %v5570_v32  ;;  %4674 = vmatpush3.msra.mxu1 %v5571_v58 }
 0x6a9   :  { %3349 = vmatprep.subr.mxu0 %v5572_v0  ;;  %4675 = vmatprep.subr.mxu1 %v7543_v37 }
 0x6aa   :  { %3350 = vmatpush1.msra.mxu0 %v5573_v50  ;;  %4676 = vmatpush3.msra.mxu1 %v5574_v26 }
 0x6ab   :  { %3351 = vmatprep.subr.mxu0 %v5575_v13  ;;  %4677 = vmatprep.subr.mxu1 %v7543_v37 }
 0x6ac   :  { %3352 = vmatpush1.msra.mxu0 %v5576_v42  ;;  %4678 = vmatpush3.msra.mxu1 %v5577_v31 }
 0x6ad   :  { %3353 = vmatprep.subr.mxu0 %v5578_v19  ;;  %4679 = vmatprep.subr.mxu1 %v7543_v37 }
 0x6ae   :  { %3354 = vmatpush1.msra.mxu0 %v5579_v48  ;;  %4680 = vmatpush3.msra.mxu1 %v5580_v29 }
 0x6af   :  { %3355 = vmatprep.subr.mxu0 %v5581_v51  ;;  %4681 = vmatprep.subr.mxu1 %v7543_v37 }
 0x6b0   :  { %3356 = vmatpush1.msra.mxu0 %v5582_v61  ;;  %4682 = vmatpush3.msra.mxu1 %v5583_v45 }
 0x6b1   :  { %3357 = vmatprep.subr.mxu0 %v5584_v6  ;;  %4683 = vmatprep.subr.mxu1 %v7543_v37 }
 0x6b2   :  { %3358 = vmatpush1.msra.mxu0 %v5585_v21  ;;  %4684 = vmatpush3.msra.mxu1 %v5586_v8 }
 0x6b3   :  { %3359 = vmatprep.subr.mxu0 %v5587_v40  ;;  %4685 = vmatprep.subr.mxu1 %v7543_v37 }
 0x6b4   :  { %3360 = vmatpush1.msra.mxu0 %v5588_v15  ;;  %4686 = vmatpush3.msra.mxu1 %v5589_v24 }
 0x6b5   :  { %3361 = vmatprep.subr.mxu0 %v5590_v49  ;;  %4687 = vmatprep.subr.mxu1 %v7543_v37 }
 0x6b6   :  { %3362 = vmatpush1.msra.mxu0 %v5591_v16  ;;  %4688 = vmatpush3.msra.mxu1 %v5592_v47 }
 0x6b7   :  { %3363 = vmatprep.subr.mxu0 %v5593_v23  ;;  %4689 = vmatprep.subr.mxu1 %v7543_v37 }
 0x6b8   :  { %3364 = vmatpush1.msra.mxu0 %v5594_v10  ;;  %4690 = vmatpush3.msra.mxu1 %v5595_v62 }
 0x6b9   :  { %3365 = vmatprep.subr.mxu0 %v5596_v46  ;;  %4691 = vmatprep.subr.mxu1 %v7543_v37 }
 0x6ba   :  { %3366 = vmatpush1.msra.mxu0 %v5597_v27  ;;  %3399 = vmatprep.mubr.f32.mxu0 %v7543_v37 }
 0x6bb   :  { %4692 = vmatpush3.msra.mxu1 %v5598_v41  ;;  %4693 = vmatprep.mubr.msk.f32.mxu1 %vm5717_vm2, %v7543_v37 }
 0x6bc   :  { %4696 = vmatprep.subr.mxu0 %v7543_v37  ;;  %4731 = vmatprep.subr.mxu1 %v7543_v37 }
 0x75b   :  { %v2980_v14 = vpop.f32.mrf.mxu0  ;;  %v7155_v63 = vpop.f32.mrf.mxu1 }
 0x75c   :  { %v3056_v32 = vrot.slane %v2980_v14, 2  ;;  %v3057_v58 = vrot.slane %v2980_v14, 3  ;;  %v3058_v0 = vrot.slane %v2980_v14, 4  ;;  %v3059_v50 = vrot.slane %v2980_v14, 5 }
 0x75d   :  { %v3060_v26 = vrot.slane %v2980_v14, 6  ;;  %v3061_v13 = vrot.slane %v2980_v14, 7  ;;  %v3062_v42 = vrot.slane %v2980_v14, 1  ;;  %v3077_v31 = vadd.f32 %v2980_v14, %v6153_v1  ;;  %v4660_v19 = vpop.f32.mrf.mxu1  ;;  %v2982_v16 = vpop.f32.mrf.mxu0 }
 0x75e   :  { %v3071_v48 = vadd.f32 %v3056_v32, %v7569_v38  ;;  %v3072_v29 = vadd.f32 %v3057_v58, %v7568_v57  ;;  %v3073_v51 = vadd.f32 %v3058_v0, %v6133_v56  ;;  %v3074_v61 = vadd.f32 %v3059_v50, %v7570_v36 }
 0x75f   :  { %v3075_v45 = vadd.f32 %v3060_v26, %v7745_v4  ;;  %v3076_v6 = vadd.f32 %v3061_v13, %v7572_v5  ;;  %v4177_v21 = vmul.f32 -1.442695, %v3077_v31  ;;  %v3078_v8 = vadd.f32 %v3062_v42, %v6158_v3 }
 0x760   :  { %v4171_v40 = vmul.f32 -1.442695, %v3071_v48  ;;  %v4172_v15 = vmul.f32 -1.442695, %v3072_v29  ;;  %v4173_v24 = vmul.f32 -1.442695, %v3073_v51 }
 0x761   :  { %v4174_v49 = vmul.f32 -1.442695, %v3074_v61  ;;  %5293 = vpow2.f32 %v4177_v21  ;;  %v4175_v47 = vmul.f32 -1.442695, %v3075_v45  ;;  %v4176_v23 = vmul.f32 -1.442695, %v3076_v6 }
 0x762   :  { %5295 = vpow2.f32 %v4171_v40  ;;  %v4178_v10 = vmul.f32 -1.442695, %v3078_v8  ;;  %v3128_v62 = vrot.slane %v2982_v16, 2  ;;  %v3129_v46 = vrot.slane %v2982_v16, 3 }
 0x763   :  { %5297 = vpow2.f32 %v4172_v15  ;;  %v3130_v27 = vrot.slane %v2982_v16, 4  ;;  %v3131_v26 = vrot.slane %v2982_v16, 5  ;;  %v3132_v42 = vrot.slane %v2982_v16, 6 }
 0x764   :  { %5299 = vpow2.f32 %v4173_v24  ;;  %v3143_v41 = vadd.f32 %v3128_v62, %v6124_v43  ;;  %v3144_v14 = vadd.f32 %v3129_v46, %v6131_v39  ;;  %v3133_v51 = vrot.slane %v2982_v16, 7 }
 0x765   :  { %5301 = vpow2.f32 %v4174_v49  ;;  %v3145_v32 = vadd.f32 %v3130_v27, %v6136_v30  ;;  %v3146_v6 = vadd.f32 %v3131_v26, %v6141_v60  ;;  %v3134_v40 = vrot.slane %v2982_v16, 1  ;;  %v7176_v26 = vld [vmem:[%s7346_s4] ss:$0 sm:$0xff] }
 0x766   :  { %5303 = vpow2.f32 %v4175_v47  ;;  %v4179_v58 = vmul.f32 -1.442695, %v3143_v41  ;;  %v4180_v0 = vmul.f32 -1.442695, %v3144_v14  ;;  %v3147_v15 = vadd.f32 %v3132_v42, %v7573_v2 }
 0x767   :  { %5305 = vpow2.f32 %v4176_v23  ;;  %v4181_v50 = vmul.f32 -1.442695, %v3145_v32  ;;  %v3149_v27 = vadd.f32 %v2982_v16, %v7746_v9  ;;  %v4182_v41 = vmul.f32 -1.442695, %v3146_v6 }
 0x768   :  { %5307 = vpow2.f32 %v4178_v10  ;;  %v3148_v10 = vadd.f32 %v3133_v51, %v7574_v7  ;;  %v3150_v32 = vadd.f32 %v3134_v40, %v7747_v35 }
 0x769   :  { %5309 = vpow2.f32 %v4179_v58  ;;  %v4183_v58 = vmul.f32 -1.442695, %v3147_v15 }
 0x76a   :  { %5311 = vpow2.f32 %v4180_v0  ;;  %v4184_v0 = vmul.f32 -1.442695, %v3148_v10  ;;  %v4186_v16 = vmul.f32 -1.442695, %v3150_v32 }
 0x76b   :  { %5313 = vpow2.f32 %v4181_v50  ;;  %v4185_v50 = vmul.f32 -1.442695, %v3149_v27 }
 0x76e   :  { %v5294_v13 = vpop.eup %5293 }
 0x76f   :  { %v5296_v31 = vpop.eup %5295  ;;  %v3109_v19 = vadd.f32 1.0, %v5294_v13  ;;  %v3199_v13 = vadd.f32 %v7176_v26, %v7155_v63 }
 0x770   :  { %v5298_v48 = vpop.eup %5297  ;;  %v3103_v29 = vadd.f32 1.0, %v5296_v31 }
 0x771   :  { %v5300_v61 = vpop.eup %5299  ;;  %v3104_v45 = vadd.f32 1.0, %v5298_v48  ;;  %5315 = vrcp.f32 %v3109_v19  ;;  %v3206_v27 = vrot.slane %v3199_v13, 7 }
 0x772   :  { %v5302_v21 = vpop.eup %5301  ;;  %v3105_v8 = vadd.f32 1.0, %v5300_v61  ;;  %5317 = vrcp.f32 %v3103_v29  ;;  %v3201_v29 = vrot.slane %v3199_v13, 2 }
 0x773   :  { %v5304_v24 = vpop.eup %5303  ;;  %v3106_v49 = vadd.f32 1.0, %v5302_v21  ;;  %5319 = vrcp.f32 %v3104_v45  ;;  %v3202_v45 = vrot.slane %v3199_v13, 3 }
 0x774   :  { %v5306_v47 = vpop.eup %5305  ;;  %v3107_v23 = vadd.f32 1.0, %v5304_v24  ;;  %5321 = vrcp.f32 %v3105_v8  ;;  %v3203_v8 = vrot.slane %v3199_v13, 4  ;;  %v3204_v24 = vrot.slane %v3199_v13, 5 }
 0x775   :  { %v5308_v62 = vpop.eup %5307  ;;  %v3108_v46 = vadd.f32 1.0, %v5306_v47  ;;  %5323 = vrcp.f32 %v3106_v49 }
 0x776   :  { %v3110_v14 = vadd.f32 1.0, %v5308_v62  ;;  %5325 = vrcp.f32 %v3107_v23  ;;  %v5310_v42 = vpop.eup %5309  ;;  %v3205_v23 = vrot.slane %v3199_v13, 6 }
 0x777   :  { %5327 = vrcp.f32 %v3108_v46  ;;  %v5312_v31 = vpop.eup %5311  ;;  %v3175_v51 = vadd.f32 1.0, %v5310_v42 }
 0x778   :  { %5329 = vrcp.f32 %v3110_v14  ;;  %v5314_v19 = vpop.eup %5313  ;;  %v3176_v42 = vadd.f32 1.0, %v5312_v31 }
 0x779   :  { %5331 = vpow2.f32 %v4182_v41 }
 0x77a   :  { %5333 = vpow2.f32 %v4183_v58  ;;  %v3207_v58 = vrot.slane %v3199_v13, 1 }
 0x77b   :  { %5335 = vpow2.f32 %v4184_v0 }
 0x77c   :  { %5337 = vpow2.f32 %v4185_v50 }
 0x77d   :  { %5339 = vpow2.f32 %v4186_v16 }
 0x77e   :  { %v5316_v48 = vpop.eup %5315  ;;  %5341 = vrcp.f32 %v3175_v51  ;;  %v3177_v51 = vadd.f32 1.0, %v5314_v19 }
 0x77f   :  { %v5318_v61 = vpop.eup %5317  ;;  %v3222_v6 = vmul.f32 %v5316_v48, %v3199_v13 }
 0x780   :  { %v5320_v21 = vpop.eup %5319  ;;  %v3216_v40 = vmul.f32 %v5318_v61, %v3201_v29 }
 0x781   :  { %v5322_v15 = vpop.eup %5321  ;;  %v3217_v63 = vmul.f32 %v5320_v21, %v3202_v45  ;;  %v3230_v49 = vadd.f32 %v3222_v6, %v7752_v12 }
 0x782   :  { %v5324_v47 = vpop.eup %5323  ;;  %v3218_v10 = vmul.f32 %v5322_v15, %v3203_v8  ;;  %v3224_v62 = vadd.f32 %v3216_v40, %v6205_v52 }
 0x783   :  { %v5326_v46 = vpop.eup %5325  ;;  %v3219_v41 = vmul.f32 %v5324_v47, %v3204_v24  ;;  %v3225_v14 = vadd.f32 %v3217_v63, %v6202_v55  ;;  %5343 = vtanh.f32 %v3230_v49 }
 0x784   :  { %v5328_v32 = vpop.eup %5327  ;;  %5345 = vtanh.f32 %v3224_v62  ;;  %v3220_v0 = vmul.f32 %v5326_v46, %v3205_v23  ;;  %v3226_v50 = vadd.f32 %v3218_v10, %v7749_v28 }
 0x785   :  { %v5330_v16 = vpop.eup %5329  ;;  %5347 = vtanh.f32 %v3225_v14  ;;  %v3221_v48 = vmul.f32 %v5328_v32, %v3206_v27  ;;  %v3227_v29 = vadd.f32 %v3219_v41, %v7750_v25 }
 0x786   :  { %v5332_v61 = vpop.eup %5331  ;;  %v3223_v45 = vmul.f32 %v5330_v16, %v3207_v58  ;;  %v3228_v6 = vadd.f32 %v3220_v0, %v7751_v18  ;;  %5349 = vtanh.f32 %v3226_v50 }
 0x787   :  { %v5334_v21 = vpop.eup %5333  ;;  %v3229_v8 = vadd.f32 %v3221_v48, %v7665_v34  ;;  %5351 = vtanh.f32 %v3227_v29  ;;  %v3178_v15 = vadd.f32 1.0, %v5332_v61 }
 0x788   :  { %v3231_v13 = vadd.f32 %v3223_v45, %v7753_v54  ;;  %5353 = vtanh.f32 %v3228_v6  ;;  %v5336_v40 = vpop.eup %5335  ;;  %v3179_v24 = vadd.f32 1.0, %v5334_v21 }
 0x789   :  { %5355 = vrcp.f32 %v3176_v42  ;;  %v5338_v31 = vpop.eup %5337  ;;  %v3180_v19 = vadd.f32 1.0, %v5336_v40 }
 0x78a   :  { %5357 = vrcp.f32 %v3177_v51  ;;  %v5340_v63 = vpop.eup %5339  ;;  %v3181_v49 = vadd.f32 1.0, %v5338_v31 }
 0x78b   :  { %5359 = vtanh.f32 %v3229_v8  ;;  %v3182_v47 = vadd.f32 1.0, %v5340_v63  ;;  %v5342_v23 = vpop.eup %5341 }
 0x78c   :  { %5361 = vtanh.f32 %v3231_v13 }
 0x78d   :  { %5363 = vrcp.f32 %v3178_v15 }
 0x78e   :  { %5365 = vrcp.f32 %v3179_v24 }
 0x78f   :  { %5367 = vrcp.f32 %v3180_v19 }
 0x790   :  { %v7188_v10 = vpop.eup %5343  ;;  %5369 = vrcp.f32 %v3181_v49 }
 0x791   :  { %v5346_v62 = vpop.eup %5345  ;;  %5371 = vrcp.f32 %v3182_v47  ;;  %v3254_v32 = vrot.slane %v7188_v10, 1 }
 0x792   :  { %v5348_v46 = vpop.eup %5347  ;;  %v3248_v27 = vrot.slane %v5346_v62, 1 }
 0x793   :  { %v5350_v41 = vpop.eup %5349  ;;  %v3249_v14 = vrot.slane %v5348_v46, 1  ;;  %v3270_v8 = vsub.f32 %v7123_v59, %v3254_v32 }
 0x794   :  { %v5352_v58 = vpop.eup %5351  ;;  %v3250_v0 = vrot.slane %v5350_v41, 1  ;;  %v3264_v50 = vsub.f32 %v7102_v11, %v3248_v27 }
 0x795   :  { %v5354_v16 = vpop.eup %5353  ;;  %v3251_v42 = vrot.slane %v5352_v58, 1  ;;  %v3265_v48 = vsub.f32 %v7105_v20, %v3249_v14  ;;  %v3286_v59 = vrot.slane %v3270_v8, 7 }
 0x796   :  { %v5356_v29 = vpop.eup %5355  ;;  %v3252_v61 = vrot.slane %v5354_v16, 1  ;;  %v3266_v51 = vsub.f32 %v7108_v33, %v3250_v0  ;;  %v3280_v45 = vrot.slane %v3264_v50, 7 }
 0x797   :  { %v5358_v6 = vpop.eup %5357  ;;  %v3267_v21 = vsub.f32 %v7111_v53, %v3251_v42  ;;  %v3281_v13 = vrot.slane %v3265_v48, 7 }
 0x798   :  { %v5360_v40 = vpop.eup %5359  ;;  %v3268_v15 = vsub.f32 %v7114_v22, %v3252_v61  ;;  %v3282_v31 = vrot.slane %v3266_v51, 7  ;;  %v3296_v11 = vmul.f32 %v5342_v23, %v3280_v45 }
 0x799   :  { %v5362_v24 = vpop.eup %5361  ;;  %v3253_v63 = vrot.slane %v5360_v40, 1  ;;  %v3283_v19 = vrot.slane %v3267_v21, 7  ;;  %v3297_v20 = vmul.f32 %v5356_v29, %v3281_v13 }
 0x79a   :  { %v5364_v49 = vpop.eup %5363  ;;  %v3255_v47 = vrot.slane %v5362_v24, 1  ;;  %v3284_v27 = vrot.slane %v3268_v15, 7  ;;  %v3298_v33 = vmul.f32 %v5358_v6, %v3282_v31  ;;  %v7197_v14 = vadd.f32 %v5346_v62, %v3296_v11 }
 0x79b   :  { %v5366_v0 = vpop.eup %5365  ;;  %v3269_v53 = vsub.f32 %v7121_v44, %v3253_v63  ;;  %v3299_v32 = vmul.f32 %v5364_v49, %v3283_v19  ;;  %v7200_v50 = vadd.f32 %v5348_v46, %v3297_v20 }
 0x79c   :  { %v3271_v22 = vsub.f32 %v7126_v17, %v3255_v47  ;;  %v3300_v23 = vmul.f32 %v5366_v0, %v3284_v27  ;;  %v7203_v42 = vadd.f32 %v5350_v41, %v3298_v33  ;;  %v3320_v48 = vrot.slane %v7197_v14, 6  ;;  %v5368_v29 = vpop.eup %5367  ;;  %v3746_v0 = vld [vmem:[#allocation5 + $0x68] sm:$0xff] }
 0x79d   :  { %v3285_v61 = vrot.slane %v3269_v53, 7  ;;  %v7206_v51 = vadd.f32 %v5352_v58, %v3299_v32  ;;  %v3321_v62 = vrot.slane %v7200_v50, 5  ;;  %v5370_v45 = vpop.eup %5369  ;;  %v3745_v53 = vld [vmem:[#allocation5 + $0x60] sm:$0xff]  ;;  %v3743_v32 = vld [vmem:[#allocation5 + $0x50] sm:$0xff] }
 0x79e   :  { %v3287_v6 = vrot.slane %v3271_v22, 7  ;;  %v7209_v44 = vadd.f32 %v5354_v16, %v3300_v23  ;;  %v3323_v46 = vrot.slane %v7203_v42, 4  ;;  %v5372_v21 = vpop.eup %5371  ;;  %v3302_v13 = vmul.f32 %v5370_v45, %v3286_v59  ;;  %v3744_v59 = vld [vmem:[#allocation5 + $0x58] sm:$0xff]  ;;  %v3742_v22 = vld [vmem:[#allocation5 + $0x48] sm:$0xff]  ;;  %v3741_v23 = vld [vmem:[#allocation5 + $0x40] sm:$0xff] }
 0x79f   :  { %v3301_v8 = vmul.f32 %v5368_v29, %v3285_v61  ;;  %v3322_v17 = vsel %vm788_vm3, %v3321_v62, %v3320_v48  ;;  %v3325_v41 = vrot.slane %v7206_v51, 3  ;;  %v3740_v48 = vld [vmem:[#allocation5 + $0x38] sm:$0xff]  ;;  %v3739_v29 = vld [vmem:[#allocation5 + $0x30] sm:$0xff]  ;;  %v3738_v61 = vld [vmem:[#allocation5 + $0x28] sm:$0xff] }
 0x7a0   :  { %v3303_v15 = vmul.f32 %v5372_v21, %v3287_v6  ;;  %v3324_v31 = vsel %vm791_vm4, %v3323_v46, %v3322_v17  ;;  %v3327_v58 = vrot.slane %v7209_v44, 2  ;;  %v7224_v49 = vadd.f32 %v7188_v10, %v3302_v13  ;;  %v3747_v10 = vld [vmem:[#allocation5 + $0x70] sm:$0xff]  ;;  %v3737_v62 = vld [vmem:[#allocation5 + $0x20] sm:$0xff]  ;;  %v3736_v45 = vld [vmem:[#allocation5 + $0x18] sm:$0xff] }
 0x7a1   :  { %v7216_v11 = vadd.f32 %v5360_v40, %v3301_v8  ;;  %v3326_v63 = vsel %vm794_vm5, %v3325_v41, %v3324_v31  ;;  %v3735_v6 = vld [vmem:[#allocation5 + $0x10] sm:$0xff]  ;;  %v3734_v46 = vld [vmem:[#allocation5 + $0x8] sm:$0xff]  ;;  %v3733_v21 = vld [vmem:[#allocation5] sm:$0xff] }
 0x7a2   :  { %v7219_v16 = vadd.f32 %v5362_v24, %v3303_v15  ;;  %v3328_v19 = vsel %vm797_vm6, %v3327_v58, %v3326_v63  ;;  %v3748_v24 = vld [vmem:[#allocation5 + $0x78] sm:$0xff]  ;;  %v3864_v17 = vld [vmem:[#allocation7 + $0x70] sm:$0xff]  ;;  %v3863_v41 = vld [vmem:[#allocation7 + $0x68] sm:$0xff] }
 0x7a3   :  { %v3329_v20 = vrot.slane %v7216_v11, 1  ;;  %v3865_v8 = vld [vmem:[#allocation7 + $0x78] sm:$0xff]  ;;  %v3862_v13 = vld [vmem:[#allocation7 + $0x60] sm:$0xff]  ;;  %v3860_v31 = vld [vmem:[#allocation7 + $0x50] sm:$0xff] }
 0x7a4   :  { %v3332_v27 = vrot.slane %v7219_v16, 7  ;;  %v3861_v15 = vld [vmem:[#allocation7 + $0x58] sm:$0xff]  ;;  %v3859_v58 = vld [vmem:[#allocation7 + $0x48] sm:$0xff]  ;;  %v3858_v63 = vld [vmem:[#allocation7 + $0x40] sm:$0xff] }
 0x7a5   :  { %v3330_v47 = vsel %vm800_vm7, %v3329_v20, %v3328_v19  ;;  %v3857_v19 = vld [vmem:[#allocation7 + $0x38] sm:$0xff]  ;;  %v3856_v20 = vld [vmem:[#allocation7 + $0x30] sm:$0xff] }
 0x7a6   :  { %v3331_v33 = vsel %vm803_vm8, %v7224_v49, %v3330_v47  ;;  %v3855_v47 = vld [vmem:[#allocation7 + $0x28] sm:$0xff] }
 0x7a7   :  { %v3333_v40 = vsel %vm806_vm9, %v3332_v27, %v3331_v33  ;;  %v3854_v27 = vld [vmem:[#allocation7 + $0x20] sm:$0xff]  ;;  %v3853_v33 = vld [vmem:[#allocation7 + $0x18] sm:$0xff] }
 0x7a8   :  { %3400 = vmatmul.mubr.f32.vlgmr.msra.gmra.mxu0 %v3333_v40  ;;  %4694 = vmatmul.mubr.f32.vlgmr.msra.gmra.mxu1 %v3333_v40 }
 0x7a9   :  { %4728 = vmatprep.mubr.msk.f32.mxu0 %vm5717_vm2, %v7543_v37  ;;  %4763 = vmatprep.mubr.msk.f32.mxu1 %vm5717_vm2, %v7543_v37 }
 0x7aa   :  { %4697 = vmatpush3.msra.mxu0 %v3748_v24  ;;  %4732 = vmatpush3.msra.mxu1 %v3865_v8 }
 0x7ab   :  { %4698 = vmatprep.subr.mxu0 %v7543_v37  ;;  %4733 = vmatprep.subr.mxu1 %v7543_v37 }
 0x7ac   :  { %4699 = vmatpush3.msra.mxu0 %v3747_v10  ;;  %4734 = vmatpush3.msra.mxu1 %v3864_v17 }
 0x7ad   :  { %4700 = vmatprep.subr.mxu0 %v7543_v37  ;;  %4735 = vmatprep.subr.mxu1 %v7543_v37 }
 0x7ae   :  { %4701 = vmatpush3.msra.mxu0 %v3746_v0  ;;  %4736 = vmatpush3.msra.mxu1 %v3863_v41 }
 0x7af   :  { %4702 = vmatprep.subr.mxu0 %v7543_v37  ;;  %4737 = vmatprep.subr.mxu1 %v7543_v37 }
 0x7b0   :  { %4703 = vmatpush3.msra.mxu0 %v3745_v53  ;;  %4738 = vmatpush3.msra.mxu1 %v3862_v13 }
 0x7b1   :  { %4704 = vmatprep.subr.mxu0 %v7543_v37  ;;  %4739 = vmatprep.subr.mxu1 %v7543_v37 }
 0x7b2   :  { %4705 = vmatpush3.msra.mxu0 %v3744_v59  ;;  %4740 = vmatpush3.msra.mxu1 %v3861_v15 }
 0x7b3   :  { %4706 = vmatprep.subr.mxu0 %v7543_v37  ;;  %4741 = vmatprep.subr.mxu1 %v7543_v37 }
 0x7b4   :  { %4707 = vmatpush3.msra.mxu0 %v3743_v32  ;;  %4742 = vmatpush3.msra.mxu1 %v3860_v31 }
 0x7b5   :  { %4708 = vmatprep.subr.mxu0 %v7543_v37  ;;  %4743 = vmatprep.subr.mxu1 %v7543_v37 }
 0x7b6   :  { %4709 = vmatpush3.msra.mxu0 %v3742_v22  ;;  %4744 = vmatpush3.msra.mxu1 %v3859_v58 }
 0x7b7   :  { %4710 = vmatprep.subr.mxu0 %v7543_v37  ;;  %4745 = vmatprep.subr.mxu1 %v7543_v37 }
 0x7b8   :  { %4711 = vmatpush3.msra.mxu0 %v3741_v23  ;;  %4746 = vmatpush3.msra.mxu1 %v3858_v63 }
 0x7b9   :  { %4712 = vmatprep.subr.mxu0 %v7543_v37  ;;  %4747 = vmatprep.subr.mxu1 %v7543_v37 }
 0x7ba   :  { %4713 = vmatpush3.msra.mxu0 %v3740_v48  ;;  %4748 = vmatpush3.msra.mxu1 %v3857_v19 }
 0x7bb   :  { %4714 = vmatprep.subr.mxu0 %v7543_v37  ;;  %4749 = vmatprep.subr.mxu1 %v7543_v37 }
 0x7bc   :  { %4715 = vmatpush3.msra.mxu0 %v3739_v29  ;;  %4750 = vmatpush3.msra.mxu1 %v3856_v20 }
 0x7bd   :  { %4716 = vmatprep.subr.mxu0 %v7543_v37  ;;  %4751 = vmatprep.subr.mxu1 %v7543_v37 }
 0x7be   :  { %4717 = vmatpush3.msra.mxu0 %v3738_v61  ;;  %4752 = vmatpush3.msra.mxu1 %v3855_v47 }
 0x7bf   :  { %4718 = vmatprep.subr.mxu0 %v7543_v37  ;;  %4753 = vmatprep.subr.mxu1 %v7543_v37 }
 0x7c0   :  { %4719 = vmatpush3.msra.mxu0 %v3737_v62  ;;  %4754 = vmatpush3.msra.mxu1 %v3854_v27 }
 0x7c1   :  { %4720 = vmatprep.subr.mxu0 %v7543_v37  ;;  %4755 = vmatprep.subr.mxu1 %v7543_v37 }
 0x7c2   :  { %4721 = vmatpush3.msra.mxu0 %v3736_v45  ;;  %4756 = vmatpush3.msra.mxu1 %v3853_v33 }
 0x7c3   :  { %4722 = vmatprep.subr.mxu0 %v7543_v37  ;;  %4757 = vmatprep.subr.mxu1 %v7543_v37 }
 0x7c4   :  { %4723 = vmatpush3.msra.mxu0 %v3735_v6 }
 0x7c5   :  { %4724 = vmatprep.subr.mxu0 %v7543_v37 }
 0x7c6   :  { %4725 = vmatpush3.msra.mxu0 %v3734_v46 }
 0x7c7   :  { %4726 = vmatprep.subr.mxu0 %v7543_v37 }
 0x7c8   :  { %4727 = vmatpush3.msra.mxu0 %v3733_v21 }
 0x7c9   :  { %4766 = vmatprep.subr.mxu0 %v7543_v37 }
 0x868   :  { %v3401_v40 = vpop.f32.mrf.mxu0  ;;  %v7264_v24 = vpop.f32.mrf.mxu1 }
 0x869   :  { %v3477_v10 = vrot.slane %v3401_v40, 1  ;;  %v3478_v0 = vrot.slane %v3401_v40, 2  ;;  %v3479_v53 = vrot.slane %v3401_v40, 3  ;;  %v3480_v59 = vrot.slane %v3401_v40, 4 }
 0x86a   :  { %v3481_v32 = vrot.slane %v3401_v40, 5  ;;  %v3482_v22 = vrot.slane %v3401_v40, 6  ;;  %v3483_v23 = vrot.slane %v3401_v40, 7  ;;  %v3499_v48 = vadd.f32 %v3401_v40, %v6158_v3  ;;  %v4695_v29 = vpop.f32.mrf.mxu1  ;;  %v3403_v31 = vpop.f32.mrf.mxu0 }
 0x86b   :  { %v3492_v61 = vadd.f32 %v3477_v10, %v7569_v38  ;;  %v3493_v62 = vadd.f32 %v3478_v0, %v7568_v57  ;;  %v3494_v45 = vadd.f32 %v3479_v53, %v6133_v56  ;;  %v3495_v6 = vadd.f32 %v3480_v59, %v7570_v36 }
 0x86c   :  { %v3496_v46 = vadd.f32 %v3481_v32, %v7745_v4  ;;  %v3497_v21 = vadd.f32 %v3482_v22, %v7572_v5  ;;  %v3498_v8 = vadd.f32 %v3483_v23, %v6153_v1  ;;  %v4194_v17 = vmul.f32 -1.442695, %v3499_v48 }
 0x86d   :  { %v4187_v41 = vmul.f32 -1.442695, %v3492_v61  ;;  %v4188_v13 = vmul.f32 -1.442695, %v3493_v62  ;;  %v4189_v15 = vmul.f32 -1.442695, %v3494_v45 }
 0x86e   :  { %v4190_v3 = vmul.f32 -1.442695, %v3495_v6  ;;  %5373 = vpow2.f32 %v4194_v17  ;;  %v4191_v38 = vmul.f32 -1.442695, %v3496_v46  ;;  %v4192_v57 = vmul.f32 -1.442695, %v3497_v21 }
 0x86f   :  { %5375 = vpow2.f32 %v4187_v41  ;;  %v4193_v56 = vmul.f32 -1.442695, %v3498_v8  ;;  %v3549_v36 = vrot.slane %v3403_v31, 1  ;;  %v3550_v58 = vrot.slane %v3403_v31, 2 }
 0x870   :  { %5377 = vpow2.f32 %v4188_v13  ;;  %v3551_v4 = vrot.slane %v3403_v31, 3  ;;  %v3552_v27 = vrot.slane %v3403_v31, 4  ;;  %v3553_v40 = vrot.slane %v3403_v31, 5 }
 0x871   :  { %5379 = vpow2.f32 %v4189_v15  ;;  %v3564_v1 = vadd.f32 %v3549_v36, %v6124_v43  ;;  %v3565_v5 = vadd.f32 %v3550_v58, %v6131_v39  ;;  %v3554_v39 = vrot.slane %v3403_v31, 6 }
 0x872   :  { %5381 = vpow2.f32 %v4190_v3  ;;  %v3566_v63 = vadd.f32 %v3551_v4, %v6136_v30  ;;  %v3567_v22 = vadd.f32 %v3552_v27, %v6141_v60  ;;  %v3555_v48 = vrot.slane %v3403_v31, 7 }
 0x873   :  { %5383 = vpow2.f32 %v4191_v38  ;;  %v4195_v19 = vmul.f32 -1.442695, %v3564_v1  ;;  %v4196_v20 = vmul.f32 -1.442695, %v3565_v5  ;;  %v3568_v29 = vadd.f32 %v3553_v40, %v7573_v2 }
 0x874   :  { %5385 = vpow2.f32 %v4192_v57  ;;  %v4197_v47 = vmul.f32 -1.442695, %v3566_v63  ;;  %v3569_v8 = vadd.f32 %v3554_v39, %v7574_v7  ;;  %v4198_v17 = vmul.f32 -1.442695, %v3567_v22 }
 0x875   :  { %5387 = vpow2.f32 %v4193_v56  ;;  %v3570_v60 = vadd.f32 %v3555_v48, %v7746_v9  ;;  %v4199_v13 = vmul.f32 -1.442695, %v3568_v29  ;;  %v3571_v2 = vadd.f32 %v3403_v31, %v7747_v35 }
 0x876   :  { %5389 = vpow2.f32 %v4195_v19  ;;  %v4200_v15 = vmul.f32 -1.442695, %v3569_v8  ;;  %v3620_v3 = vadd.f32 %v7176_v26, %v7264_v24 }
 0x877   :  { %5391 = vpow2.f32 %v4196_v20  ;;  %v4201_v38 = vmul.f32 -1.442695, %v3570_v60  ;;  %v4202_v56 = vmul.f32 -1.442695, %v3571_v2 }
 0x878   :  { %5393 = vpow2.f32 %v4197_v47  ;;  %v3622_v4 = vrot.slane %v3620_v3, 1  ;;  %v3623_v5 = vrot.slane %v3620_v3, 2  ;;  %v3624_v63 = vrot.slane %v3620_v3, 3 }
 0x879   :  { %v3625_v26 = vrot.slane %v3620_v3, 4  ;;  %v3628_v39 = vrot.slane %v3620_v3, 7 }
 0x87b   :  { %v5374_v33 = vpop.eup %5373 }
 0x87c   :  { %v5376_v10 = vpop.eup %5375  ;;  %v3531_v0 = vadd.f32 1.0, %v5374_v33  ;;  %v3626_v33 = vrot.slane %v3620_v3, 5 }
 0x87d   :  { %v5378_v53 = vpop.eup %5377  ;;  %v3524_v59 = vadd.f32 1.0, %v5376_v10 }
 0x87e   :  { %v5380_v43 = vpop.eup %5379  ;;  %v3525_v32 = vadd.f32 1.0, %v5378_v53  ;;  %5395 = vrcp.f32 %v3531_v0  ;;  %v3627_v53 = vrot.slane %v3620_v3, 6 }
 0x87f   :  { %v5382_v30 = vpop.eup %5381  ;;  %v3526_v23 = vadd.f32 1.0, %v5380_v43  ;;  %5397 = vrcp.f32 %v3524_v59 }
 0x880   :  { %v5384_v61 = vpop.eup %5383  ;;  %v3527_v62 = vadd.f32 1.0, %v5382_v30  ;;  %5399 = vrcp.f32 %v3525_v32 }
 0x881   :  { %v5386_v45 = vpop.eup %5385  ;;  %v3528_v6 = vadd.f32 1.0, %v5384_v61  ;;  %5401 = vrcp.f32 %v3526_v23 }
 0x882   :  { %v5388_v46 = vpop.eup %5387  ;;  %v3529_v21 = vadd.f32 1.0, %v5386_v45  ;;  %5403 = vrcp.f32 %v3527_v62 }
 0x883   :  { %v3530_v41 = vadd.f32 1.0, %v5388_v46  ;;  %5405 = vrcp.f32 %v3528_v6  ;;  %v5390_v57 = vpop.eup %5389 }
 0x884   :  { %5407 = vrcp.f32 %v3529_v21  ;;  %v5392_v7 = vpop.eup %5391  ;;  %v3596_v9 = vadd.f32 1.0, %v5390_v57 }
 0x885   :  { %5409 = vrcp.f32 %v3530_v41  ;;  %v5394_v36 = vpop.eup %5393 }
 0x886   :  { %5411 = vpow2.f32 %v4198_v17 }
 0x887   :  { %5413 = vpow2.f32 %v4199_v13 }
 0x888   :  { %5415 = vpow2.f32 %v4200_v15 }
 0x889   :  { %5417 = vpow2.f32 %v4201_v38 }
 0x88a   :  { %5419 = vpow2.f32 %v4202_v56 }
 0x88b   :  { %v5396_v58 = vpop.eup %5395  ;;  %5421 = vrcp.f32 %v3596_v9 }
 0x88c   :  { %v5398_v1 = vpop.eup %5397  ;;  %v3644_v35 = vmul.f32 %v5396_v58, %v3620_v3 }
 0x88d   :  { %v5400_v31 = vpop.eup %5399  ;;  %v3637_v19 = vmul.f32 %v5398_v1, %v3622_v4 }
 0x88e   :  { %v5402_v20 = vpop.eup %5401  ;;  %v3638_v24 = vmul.f32 %v5400_v31, %v3623_v5  ;;  %v3652_v47 = vadd.f32 %v3644_v35, %v7753_v54  ;;  %v3597_v54 = vadd.f32 1.0, %v5392_v7 }
 0x88f   :  { %v5404_v27 = vpop.eup %5403  ;;  %v3639_v40 = vmul.f32 %v5402_v20, %v3624_v63  ;;  %v3645_v10 = vadd.f32 %v3637_v19, %v6205_v52  ;;  %v3598_v52 = vadd.f32 1.0, %v5394_v36 }
 0x890   :  { %v5406_v0 = vpop.eup %5405  ;;  %v3640_v59 = vmul.f32 %v5404_v27, %v3625_v26  ;;  %v3646_v43 = vadd.f32 %v3638_v24, %v6202_v55  ;;  %5423 = vtanh.f32 %v3652_v47 }
 0x891   :  { %v5408_v32 = vpop.eup %5407  ;;  %v3641_v22 = vmul.f32 %v5406_v0, %v3626_v33  ;;  %v3647_v30 = vadd.f32 %v3639_v40, %v7749_v28  ;;  %5425 = vtanh.f32 %v3645_v10 }
 0x892   :  { %v5410_v23 = vpop.eup %5409  ;;  %v3642_v48 = vmul.f32 %v5408_v32, %v3627_v53  ;;  %v3648_v29 = vadd.f32 %v3640_v59, %v7750_v25  ;;  %5427 = vtanh.f32 %v3646_v43 }
 0x893   :  { %v5412_v61 = vpop.eup %5411  ;;  %v3643_v62 = vmul.f32 %v5410_v23, %v3628_v39  ;;  %v3649_v45 = vadd.f32 %v3641_v22, %v7751_v18  ;;  %5429 = vtanh.f32 %v3647_v30 }
 0x894   :  { %v5414_v55 = vpop.eup %5413  ;;  %v3650_v6 = vadd.f32 %v3642_v48, %v7665_v34  ;;  %5431 = vtanh.f32 %v3648_v29  ;;  %v3599_v28 = vadd.f32 1.0, %v5412_v61 }
 0x895   :  { %v3651_v46 = vadd.f32 %v3643_v62, %v7752_v12  ;;  %5433 = vtanh.f32 %v3649_v45  ;;  %v5416_v21 = vpop.eup %5415  ;;  %v3600_v8 = vadd.f32 1.0, %v5414_v55 }
 0x896   :  { %5435 = vrcp.f32 %v3597_v54  ;;  %v5418_v25 = vpop.eup %5417  ;;  %v3601_v41 = vadd.f32 1.0, %v5416_v21 }
 0x897   :  { %5437 = vrcp.f32 %v3598_v52  ;;  %v5420_v17 = vpop.eup %5419  ;;  %v3602_v18 = vadd.f32 1.0, %v5418_v25 }
 0x898   :  { %5439 = vtanh.f32 %v3650_v6  ;;  %v5422_v60 = vpop.eup %5421  ;;  %v3603_v13 = vadd.f32 1.0, %v5420_v17 }
 0x899   :  { %5441 = vtanh.f32 %v3651_v46 }
 0x89a   :  { %5443 = vrcp.f32 %v3599_v28 }
 0x89b   :  { %5445 = vrcp.f32 %v3600_v8 }
 0x89c   :  { %5447 = vrcp.f32 %v3601_v41 }
 0x89d   :  { %v7292_v34 = vpop.eup %5423  ;;  %5449 = vrcp.f32 %v3602_v18 }
 0x89e   :  { %v5426_v2 = vpop.eup %5425  ;;  %5451 = vrcp.f32 %v3603_v13  ;;  %v3676_v4 = vrot.slane %v7292_v34, 1 }
 0x89f   :  { %v5428_v12 = vpop.eup %5427  ;;  %v3669_v15 = vrot.slane %v5426_v2, 1 }
 0x8a0   :  { %v5430_v3 = vpop.eup %5429  ;;  %v3670_v38 = vrot.slane %v5428_v12, 1  ;;  %v3692_v40 = vsub.f32 %v7219_v16, %v3676_v4  ;;  %v3958_v4 = vld [vmem:[#allocation8 + $0x70] sm:$0xff] }
 0x8a1   :  { %v5432_v57 = vpop.eup %5431  ;;  %v3671_v56 = vrot.slane %v5430_v3, 1  ;;  %v3685_v7 = vsub.f32 %v7197_v14, %v3669_v15 }
 0x8a2   :  { %v5434_v36 = vpop.eup %5433  ;;  %v3672_v58 = vrot.slane %v5432_v57, 1  ;;  %v3686_v9 = vsub.f32 %v7200_v50, %v3670_v38  ;;  %v3708_v29 = vrot.slane %v3692_v40, 7 }
 0x8a3   :  { %v5436_v1 = vpop.eup %5435  ;;  %v3673_v5 = vrot.slane %v5434_v36, 1  ;;  %v3687_v35 = vsub.f32 %v7203_v42, %v3671_v56  ;;  %v3701_v31 = vrot.slane %v3685_v7, 7  ;;  %v3852_v56 = vld [vmem:[#allocation7 + $0x10] sm:$0xff]  ;;  %v3851_v7 = vld [vmem:[#allocation7 + $0x8] sm:$0xff] }
 0x8a4   :  { %v5438_v63 = vpop.eup %5437  ;;  %v3688_v19 = vsub.f32 %v7206_v51, %v3672_v58  ;;  %v3702_v20 = vrot.slane %v3686_v9, 7  ;;  %4758 = vmatpush3.msra.mxu1 %v3852_v56  ;;  %v3959_v58 = vld [vmem:[#allocation8 + $0x78] sm:$0xff]  ;;  %v3956_v9 = vld [vmem:[#allocation8 + $0x60] sm:$0xff] }
 0x8a5   :  { %v5440_v26 = vpop.eup %5439  ;;  %v3689_v24 = vsub.f32 %v7209_v44, %v3673_v5  ;;  %v3703_v47 = vrot.slane %v3687_v35, 7  ;;  %v3717_v14 = vmul.f32 %v5422_v60, %v3701_v31  ;;  %4759 = vmatprep.subr.mxu1 %v7543_v37  ;;  %v3954_v5 = vld [vmem:[#allocation8 + $0x50] sm:$0xff]  ;;  %v3953_v35 = vld [vmem:[#allocation8 + $0x48] sm:$0xff]  ;;  %v3952_v31 = vld [vmem:[#allocation8 + $0x40] sm:$0xff] }
 0x8a6   :  { %v5442_v27 = vpop.eup %5441  ;;  %v3674_v33 = vrot.slane %v5440_v26, 1  ;;  %v3704_v10 = vrot.slane %v3688_v19, 7  ;;  %v3718_v50 = vmul.f32 %v5436_v1, %v3702_v20  ;;  %4760 = vmatpush3.msra.mxu1 %v3851_v7  ;;  %v3955_v1 = vld [vmem:[#allocation8 + $0x58] sm:$0xff]  ;;  %v3950_v19 = vld [vmem:[#allocation8 + $0x30] sm:$0xff]  ;;  %v3949_v20 = vld [vmem:[#allocation8 + $0x28] sm:$0xff] }
 0x8a7   :  { %v5444_v0 = vpop.eup %5443  ;;  %v3675_v53 = vrot.slane %v5442_v27, 1  ;;  %v3705_v59 = vrot.slane %v3689_v24, 7  ;;  %v3719_v42 = vmul.f32 %v5438_v63, %v3703_v47  ;;  %v3725_v43 = vadd.f32 %v5426_v2, %v3717_v14  ;;  %4761 = vmatprep.subr.mxu1 %v7543_v37  ;;  %v3951_v63 = vld [vmem:[#allocation8 + $0x38] sm:$0xff]  ;;  %v4203_v47 = vld [vmem:[%s7348_s6] ss:$0 sm:$0xff] }
 0x8a8   :  { %v5446_v32 = vpop.eup %5445  ;;  %v3690_v51 = vsub.f32 %v7216_v11, %v3674_v33  ;;  %v3720_v39 = vmul.f32 %v5444_v0, %v3704_v10  ;;  %v3726_v22 = vadd.f32 %v5428_v12, %v3718_v50  ;;  %v3947_v24 = vld [vmem:[#allocation8 + $0x18] sm:$0xff]  ;;  %v3946_v10 = vld [vmem:[#allocation8 + $0x10] sm:$0xff]  ;;  %v3945_v50 = vld [vmem:[#allocation8 + $0x8] sm:$0xff] }
 0x8a9   :  { %v3691_v44 = vsub.f32 %v7224_v49, %v3675_v53  ;;  %v3721_v30 = vmul.f32 %v5446_v32, %v3705_v59  ;;  %v3727_v23 = vadd.f32 %v5430_v3, %v3719_v42  ;;  %v3764_v54 = vrot.slane %v3725_v43, 7  ;;  %v5448_v52 = vpop.eup %5447  ;;  %v3944_v0 = vld [vmem:[#allocation8] sm:$0xff] }
 0x8aa   :  { %v3706_v48 = vrot.slane %v3690_v51, 7  ;;  %v3728_v16 = vadd.f32 %v5432_v57, %v3720_v39  ;;  %v3765_v61 = vrot.slane %v3726_v22, 6  ;;  %v5450_v6 = vpop.eup %5449  ;;  %v4204_v53 = vld [vmem:[%s7350_s8] ss:$0 sm:$0xff] }
 0x8ab   :  { %v3707_v62 = vrot.slane %v3691_v44, 7  ;;  %v3729_v45 = vadd.f32 %v5434_v36, %v3721_v30  ;;  %v3767_v55 = vrot.slane %v3727_v23, 5  ;;  %v5452_v21 = vpop.eup %5451  ;;  %v3850_v36 = vld [vmem:[#allocation7] sm:$0xff] }
 0x8ac   :  { %v3722_v46 = vmul.f32 %v5448_v52, %v3706_v48  ;;  %v3766_v28 = vsel %vm788_vm3, %v3765_v61, %v3764_v54  ;;  %v3769_v11 = vrot.slane %v3728_v16, 4  ;;  %v3724_v17 = vmul.f32 %v5452_v21, %v3708_v29  ;;  %4762 = vmatpush3.msra.mxu1 %v3850_v36  ;;  %v4205_v51 = vld [vmem:[%s7352_s10] ss:$0 sm:$0xff] }
 0x8ad   :  { %v3723_v8 = vmul.f32 %v5450_v6, %v3707_v62  ;;  %v3768_v49 = vsel %vm791_vm4, %v3767_v55, %v3766_v28  ;;  %v3771_v25 = vrot.slane %v3729_v45, 3 }
 0x8ae   :  { %v3730_v41 = vadd.f32 %v5440_v26, %v3722_v46  ;;  %v3770_v18 = vsel %vm794_vm5, %v3769_v11, %v3768_v49  ;;  %v3732_v15 = vadd.f32 %v7292_v34, %v3724_v17  ;;  %v3957_v34 = vld [vmem:[#allocation8 + $0x68] sm:$0xff]  ;;  %v3948_v26 = vld [vmem:[#allocation8 + $0x20] sm:$0xff] }
 0x8af   :  { %v3731_v60 = vadd.f32 %v5442_v27, %v3723_v8  ;;  %v3772_v13 = vsel %vm797_vm6, %v3771_v25, %v3770_v18 }
 0x8b0   :  { %v3773_v2 = vrot.slane %v3730_v41, 2 }
 0x8b1   :  { %v3775_v12 = vrot.slane %v3731_v60, 1 }
 0x8b2   :  { %v3774_v3 = vsel %vm800_vm7, %v3773_v2, %v3772_v13 }
 0x8b3   :  { %v3776_v38 = vsel %vm803_vm8, %v3775_v12, %v3774_v3 }
 0x8b4   :  { %v3777_v57 = vsel %vm806_vm9, %v3732_v15, %v3776_v38 }
 0x8b5   :  { %4729 = vmatmul.mubr.f32.vlgmr.msra.gmra.mxu0 %v3777_v57 }
 0x8b6   :  { %4798 = vmatprep.mubr.msk.f32.mxu0 %vm5717_vm2, %v7543_v37  ;;  %4767 = vmatpush3.msra.mxu0 %v3959_v58 }
 0x8b7   :  { %4768 = vmatprep.subr.mxu0 %v7543_v37 }
 0x8b8   :  { %4769 = vmatpush3.msra.mxu0 %v3958_v4 }
 0x8b9   :  { %4770 = vmatprep.subr.mxu0 %v7543_v37 }
 0x8ba   :  { %4771 = vmatpush3.msra.mxu0 %v3957_v34 }
 0x8bb   :  { %4772 = vmatprep.subr.mxu0 %v7543_v37 }
 0x8bc   :  { %4773 = vmatpush3.msra.mxu0 %v3956_v9 }
 0x8bd   :  { %4774 = vmatprep.subr.mxu0 %v7543_v37 }
 0x8be   :  { %4775 = vmatpush3.msra.mxu0 %v3955_v1 }
 0x8bf   :  { %4776 = vmatprep.subr.mxu0 %v7543_v37 }
 0x8c0   :  { %4777 = vmatpush3.msra.mxu0 %v3954_v5 }
 0x8c1   :  { %4778 = vmatprep.subr.mxu0 %v7543_v37 }
 0x8c2   :  { %4779 = vmatpush3.msra.mxu0 %v3953_v35 }
 0x8c3   :  { %4780 = vmatprep.subr.mxu0 %v7543_v37 }
 0x8c4   :  { %4781 = vmatpush3.msra.mxu0 %v3952_v31 }
 0x8c5   :  { %4782 = vmatprep.subr.mxu0 %v7543_v37 }
 0x8c6   :  { %4783 = vmatpush3.msra.mxu0 %v3951_v63 }
 0x8c7   :  { %4784 = vmatprep.subr.mxu0 %v7543_v37 }
 0x8c8   :  { %4785 = vmatpush3.msra.mxu0 %v3950_v19 }
 0x8c9   :  { %4786 = vmatprep.subr.mxu0 %v7543_v37 }
 0x8ca   :  { %4787 = vmatpush3.msra.mxu0 %v3949_v20 }
 0x8cb   :  { %4788 = vmatprep.subr.mxu0 %v7543_v37 }
 0x8cc   :  { %4789 = vmatpush3.msra.mxu0 %v3948_v26 }
 0x8cd   :  { %4790 = vmatprep.subr.mxu0 %v7543_v37 }
 0x8ce   :  { %4791 = vmatpush3.msra.mxu0 %v3947_v24 }
 0x8cf   :  { %4792 = vmatprep.subr.mxu0 %v7543_v37 }
 0x8d0   :  { %4793 = vmatpush3.msra.mxu0 %v3946_v10 }
 0x8d1   :  { %4794 = vmatprep.subr.mxu0 %v7543_v37 }
 0x8d2   :  { %4795 = vmatpush3.msra.mxu0 %v3945_v50 }
 0x8d3   :  { %4796 = vmatprep.subr.mxu0 %v7543_v37 }
 0x8d4   :  { %4797 = vmatpush3.msra.mxu0 %v3944_v0 }
 0x975   :  { %v3845_v14 = vpop.f32.mrf.mxu0 }
 0x976   :  { %v3846_v27 = vadd.f32 %v4203_v47, %v3845_v14 }
 0x977   :  { %v4730_v33 = vpop.f32.mrf.mxu0 }
 0x978   :  { %v3849_v40 = vmax.f32 %v3846_v27, 0.0 }
 0x97a   :  { %4764 = vmatmul.mubr.f32.vlgmr.msra.gmra.mxu1 %v3849_v40 }
 0xa3a   :  { %v3939_v59 = vpop.f32.mrf.mxu1 }
 0xa3b   :  { %v3940_v42 = vadd.f32 %v4204_v53, %v3939_v59 }
 0xa3c   :  { %v4765_v43 = vpop.f32.mrf.mxu1 }
 0xa3d   :  { %v3943_v32 = vmax.f32 %v3940_v42, 0.0 }
 0xa3f   :  { %4799 = vmatmul.mubr.f32.vlgmr.msra.gmra.mxu0 %v3943_v32 }
 0xaff   :  { %v4033_v39 = vpop.f32.mrf.mxu0 }
 0xb00   :  { %v4034_v22 = vadd.f32 %v4205_v51, %v4033_v39 }
 0xb01   :  { %v4800_v37 = vpop.f32.mrf.mxu0 }
 0xb02   :  { %4037 = vst [vmem:[#allocation10] sm:$0xff] %v4034_v22 }
 0xb03   :  { %5691 = shalt.err (!%p5688_p10)
}
 0xb04   :  { %4047 = dma.vmem_to_hbm [thread:$0]  %s4045_s27, 128, %s7353_s11, [#allocation4]  }
 0xb05   :  { %5706 = dma.done.wait [#allocation4], 128  }
 0xb06   :  { %5707 = vsyncadd [#allocation4], 4294967168 }
 0xb07   :  { %4051 = vsyncpa [#allocation3], 1 }
 0xb08   :  { %4052 = vsyncpa [#allocation6], 1 }
 0xb09   :  { %4053 = vsyncpa [#allocation9], 1 }
 0xb0a   :  { %4054 = vsyncpa [#allocation4], 1 }

</bundles_post_ra>
